<compile_context>
chip_gen: v7x
topology: tpu7x:2x2x1
jax: 0.10.0
libtpu: 0.0.40
codegen_flags: <defaults>
</compile_context>

<pallas_src>
import jax
import jax.numpy as jnp
from jax.experimental import pallas as pl
from jax.experimental.pallas import tpu as pltpu


def _se_fused_kernel(x534_ref, w1_ref, b1_ref, x_ref, w2_ref, o_ref):
    """Fused SE tail: gate = sigmoid(w1 @ x534 + b1); out = w2 @ (gate * x).

    x534_ref: [1, C_in]       f32   squeezed input pixel (row)
    w1_ref  : [C_mid, C_in]   f32   conv2d170 weight, OIHW viewed as [O, I]
    b1_ref  : [C_mid, 1]      f32   conv2d170 bias (column)
    x_ref   : [C_mid, HW]     f32   feature map, channels-major (free NCHW view)
    w2_ref  : [C_out, C_mid]  bf16  conv2d171 weight (pre-cast once at init)
    o_ref   : [C_out, HW]     f32
    """
    # ---- gate: 1-pixel 1x1 conv == matvec, done as sublane-bcast mul + lane reduce
    # (avoids an M/N==1 MXU matmul; VPU/XLU work hides under the x/w2 HBM DMA).
    prod = w1_ref[...] * x534_ref[...]                              # [C_mid, C_in]
    logits = jnp.sum(prod, axis=1, keepdims=True) + b1_ref[...]     # [C_mid, 1]
    # sigmoid via EUP exp + approx reciprocal (both in their own VLIW slots).
    gate = pl.reciprocal(1.0 + jnp.exp(-logits), approx=True)       # [C_mid, 1]

    # ---- scale features in f32 (v5e has no bf16 VPU), feed the MXU in bf16 ----
    scaled = (gate * x_ref[...]).astype(w2_ref.dtype)               # [C_mid, HW] bf16
    # out[C_out, HW] = w2[C_out, C_mid] @ scaled[C_mid, HW], f32 accumulation.
    o_ref[...] = jnp.dot(w2_ref[...], scaled, preferred_element_type=jnp.float32)


def prepare_params(w1_torch, b1, w2_torch):
    """One-time parameter prep (call OUTSIDE jit).

    Free reshapes of the conv weights plus the single f32->bf16 cast of w2, so no
    per-call convert HLO appears inside the jitted forward.
      w1_torch: [C_mid, C_in, 1, 1] -> [C_mid, C_in]  f32
      b1      : [C_mid]             -> [C_mid, 1]     f32
      w2_torch: [C_out, C_mid, 1,1] -> [C_out, C_mid] bf16
    """
    c_mid, c_in = w1_torch.shape[0], w1_torch.shape[1]
    c_out = w2_torch.shape[0]
    w1_mat = w1_torch.reshape(c_mid, c_in)
    b1_col = b1.reshape(c_mid, 1)
    w2_bf16 = w2_torch.reshape(c_out, c_mid).astype(jnp.bfloat16)
    return w1_mat, b1_col, w2_bf16


def se_conv_block(x534_nchw, x531_nchw, w1_mat, b1_col, w2_bf16):
    """
    x534_nchw: [1, 56, 1, 1]     squeeze vector
    x531_nchw: [1, 1344, 14, 14] feature map
    w1_mat   : [1344, 56]   f32  (from prepare_params)
    b1_col   : [1344, 1]    f32  (from prepare_params)
    w2_bf16  : [224, 1344]  bf16 (from prepare_params, cast once at init)
    returns  : [1, 224, 14, 14]  f32
    """
    n, c_mid, h, w = x531_nchw.shape
    c_in = x534_nchw.shape[1]
    c_out = w2_bf16.shape[0]
    hw = h * w
    assert n == 1

    # Free (no-copy) layout views: stay channels-major / NCHW throughout.
    x534_row = x534_nchw.reshape(1, c_in)      # [1, 56]
    x_mat = x531_nchw.reshape(c_mid, hw)       # [1344, 196]

    bytes_accessed = (
        x_mat.size * 4            # feature map (f32) - dominant
        + w2_bf16.size * 2        # expand weights (bf16)
        + w1_mat.size * 4         # squeeze weights (f32)
        + b1_col.size * 4
        + x534_row.size * 4
        + c_out * hw * 4          # output (f32)
    )

    out_mat = pl.pallas_call(
        _se_fused_kernel,
        out_shape=jax.ShapeDtypeStruct((c_out, hw), jnp.float32),
        grid=(1,),  # single fully-resident block (<3 MiB VMEM, fits all gens)
        in_specs=[
            pl.BlockSpec((1, c_in), lambda i: (0, 0)),        # x534 row
            pl.BlockSpec((c_mid, c_in), lambda i: (0, 0)),    # w1
            pl.BlockSpec((c_mid, 1), lambda i: (0, 0)),       # b1 column
            pl.BlockSpec((c_mid, hw), lambda i: (0, 0)),      # feature map
            pl.BlockSpec((c_out, c_mid), lambda i: (0, 0)),   # w2 (bf16)
        ],
        out_specs=pl.BlockSpec((c_out, hw), lambda i: (0, 0)),
        compiler_params=pltpu.CompilerParams(
            dimension_semantics=("arbitrary",),
        ),
        cost_estimate=pl.CostEstimate(
            flops=2 * hw * c_mid * c_out + 2 * c_mid * c_in + 2 * c_mid * hw,
            transcendentals=c_mid,
            bytes_accessed=bytes_accessed,
        ),
    )(x534_row, w1_mat, b1_col, x_mat, w2_bf16)

    # [224, 196] -> [1, 224, 14, 14]: a free reshape, no transpose.
    return out_mat.reshape(1, c_out, h, w)


if __name__ == "__main__":
    key = jax.random.PRNGKey(0)
    k1, k2, k3, k4, k5 = jax.random.split(key, 5)

    # Shapes implied by the module's forward (fixed by the conv channel counts).
    C_IN, C_MID, C_OUT, H, W = 56, 1344, 224, 14, 14

    # inputs
    x534 = jax.random.normal(k1, (1, C_IN, 1, 1), dtype=jnp.float32)
    x531 = jax.random.normal(k2, (1, C_MID, H, W), dtype=jnp.float32)

    # deterministic parameter init (shapes from the module's __init__)
    w1 = jax.random.normal(k3, (C_MID, C_IN, 1, 1), dtype=jnp.float32) * 0.05
    b1 = jax.random.normal(k4, (C_MID,), dtype=jnp.float32) * 0.05
    w2 = jax.random.normal(k5, (C_OUT, C_MID, 1, 1), dtype=jnp.float32) * 0.05

    # One-time parameter prep (outside jit): reshapes + the single w2 bf16 cast.
    w1_mat, b1_col, w2_bf16 = jax.block_until_ready(prepare_params(w1, b1, w2))

    fwd = jax.jit(se_conv_block)
    out = jax.block_until_ready(fwd(x534, x531, w1_mat, b1_col, w2_bf16))

    # pure-JAX f32 reference for semantics sanity-check
    gate_ref = jax.nn.sigmoid(
        jnp.einsum("oi,i->o", w1.reshape(C_MID, C_IN), x534.reshape(C_IN)) + b1
    )  # [1344]
    scaled_ref = x531 * gate_ref.reshape(1, C_MID, 1, 1)
    ref = jnp.einsum("oc,nchw->nohw", w2.reshape(C_OUT, C_MID), scaled_ref)

    assert out.shape == (1, C_OUT, H, W), out.shape
    # Big matmul runs with bf16 operands (f32 accumulation) -> bf16-level tolerance.
    err = float(jnp.max(jnp.abs(out - ref)))
    assert jnp.allclose(out, ref, atol=5e-2, rtol=5e-2), err
    print("KERNEL_OK")
</pallas_src>

<mosaic_0001>
module attributes {stable_mosaic.version = 11 : i64} {
  func.func @_se_fused_kernel(%arg0: i32, %arg1: memref<1x56xf32, #tpu.memory_space<vmem>>, %arg2: memref<1344x56xf32, #tpu.memory_space<vmem>>, %arg3: memref<1344x1xf32, #tpu.memory_space<vmem>>, %arg4: memref<1344x196xf32, #tpu.memory_space<vmem>>, %arg5: memref<224x1344xbf16, #tpu.memory_space<vmem>>, %arg6: memref<224x196xf32, #tpu.memory_space<vmem>>) attributes {dimension_semantics = [#tpu.dimension_semantics<arbitrary>], iteration_bounds = array<i64: 1>, scalar_prefetch = 0 : i64, scratch_operands = 0 : i64, tpu.core_type = #tpu.core_type<tc>, window_params = [{pipeline_mode = #tpu.pipeline_mode<synchronous>, transform_indices = @transform_0, window_bounds = array<i64: 1, 56>}, {pipeline_mode = #tpu.pipeline_mode<synchronous>, transform_indices = @transform_1, window_bounds = array<i64: 1344, 56>}, {pipeline_mode = #tpu.pipeline_mode<synchronous>, transform_indices = @transform_2, window_bounds = array<i64: 1344, 1>}, {pipeline_mode = #tpu.pipeline_mode<synchronous>, transform_indices = @transform_3, window_bounds = array<i64: 1344, 196>}, {pipeline_mode = #tpu.pipeline_mode<synchronous>, transform_indices = @transform_4, window_bounds = array<i64: 224, 1344>}, {pipeline_mode = #tpu.pipeline_mode<synchronous>, transform_indices = @transform_5, window_bounds = array<i64: 224, 196>}]} {
    %c0 = arith.constant 0 : index
    %c0_0 = arith.constant 0 : index
    %0 = vector.load %arg2[%c0, %c0_0] : memref<1344x56xf32, #tpu.memory_space<vmem>>, vector<1344x56xf32>
    %c0_1 = arith.constant 0 : index
    %c0_2 = arith.constant 0 : index
    %1 = vector.load %arg1[%c0_1, %c0_2] : memref<1x56xf32, #tpu.memory_space<vmem>>, vector<1x56xf32>
    %2 = vector.broadcast %1 : vector<1x56xf32> to vector<1344x56xf32>
    %3 = arith.mulf %0, %2 : vector<1344x56xf32>
    %cst = arith.constant dense<0.000000e+00> : vector<1344xf32>
    %4 = vector.multi_reduction <add>, %3, %cst [1] : vector<1344x56xf32> to vector<1344xf32>
    %5 = vector.shape_cast %4 : vector<1344xf32> to vector<1344x1xf32>
    %c0_3 = arith.constant 0 : index
    %c0_4 = arith.constant 0 : index
    %6 = vector.load %arg3[%c0_3, %c0_4] : memref<1344x1xf32, #tpu.memory_space<vmem>>, vector<1344x1xf32>
    %7 = arith.addf %5, %6 : vector<1344x1xf32>
    %cst_5 = arith.constant 0.000000e+00 : f32
    %8 = vector.broadcast %cst_5 : f32 to vector<1344x1xf32>
    %9 = arith.subf %8, %7 : vector<1344x1xf32>
    %10 = math.exp %9 : vector<1344x1xf32>
    %cst_6 = arith.constant 1.000000e+00 : f32
    %11 = vector.broadcast %cst_6 : f32 to vector<1344x1xf32>
    %12 = arith.addf %11, %10 : vector<1344x1xf32>
    %13 = tpu.reciprocal %12 {approx = true} : vector<1344x1xf32> -> vector<1344x1xf32>
    %c0_7 = arith.constant 0 : index
    %c0_8 = arith.constant 0 : index
    %14 = vector.load %arg4[%c0_7, %c0_8] : memref<1344x196xf32, #tpu.memory_space<vmem>>, vector<1344x196xf32>
    %15 = vector.broadcast %13 : vector<1344x1xf32> to vector<1344x196xf32>
    %16 = arith.mulf %15, %14 : vector<1344x196xf32>
    %17 = arith.truncf %16 : vector<1344x196xf32> to vector<1344x196xbf16>
    %c0_9 = arith.constant 0 : index
    %c0_10 = arith.constant 0 : index
    %18 = vector.load %arg5[%c0_9, %c0_10] : memref<224x1344xbf16, #tpu.memory_space<vmem>>, vector<224x1344xbf16>
    %cst_11 = arith.constant dense<0.000000e+00> : vector<224x196xf32>
    %19 = tpu.matmul %18, %17, %cst_11 {dimension_numbers = #tpu.dot_dimension_numbers<[1], [0], [0], [1], [0, 0, 1, 1], [], []>} : vector<224x1344xbf16>, vector<1344x196xbf16>, vector<224x196xf32> -> vector<224x196xf32>
    %c0_12 = arith.constant 0 : index
    %c0_13 = arith.constant 0 : index
    %20 = vector.load %arg6[%c0_12, %c0_13] : memref<224x196xf32, #tpu.memory_space<vmem>>, vector<224x196xf32>
    tpu.vector_store %arg6[%c0_12, %c0_13], %19 {strides = array<i32>} : memref<224x196xf32, #tpu.memory_space<vmem>>, vector<224x196xf32>,
    return
  }
  func.func @transform_0(%arg0: i32) -> (i32, i32) {
    %c0_i32 = arith.constant 0 : i32
    %c0_i32_0 = arith.constant 0 : i32
    %c0_i32_1 = arith.constant 0 : i32
    return %c0_i32, %c0_i32_0 : i32, i32
  }
  func.func @transform_1(%arg0: i32) -> (i32, i32) {
    %c0_i32 = arith.constant 0 : i32
    %c0_i32_0 = arith.constant 0 : i32
    %c0_i32_1 = arith.constant 0 : i32
    return %c0_i32, %c0_i32_0 : i32, i32
  }
  func.func @transform_2(%arg0: i32) -> (i32, i32) {
    %c0_i32 = arith.constant 0 : i32
    %c0_i32_0 = arith.constant 0 : i32
    %c0_i32_1 = arith.constant 0 : i32
    return %c0_i32, %c0_i32_0 : i32, i32
  }
  func.func @transform_3(%arg0: i32) -> (i32, i32) {
    %c0_i32 = arith.constant 0 : i32
    %c0_i32_0 = arith.constant 0 : i32
    %c0_i32_1 = arith.constant 0 : i32
    return %c0_i32, %c0_i32_0 : i32, i32
  }
  func.func @transform_4(%arg0: i32) -> (i32, i32) {
    %c0_i32 = arith.constant 0 : i32
    %c0_i32_0 = arith.constant 0 : i32
    %c0_i32_1 = arith.constant 0 : i32
    return %c0_i32, %c0_i32_0 : i32, i32
  }
  func.func @transform_5(%arg0: i32) -> (i32, i32) {
    %c0_i32 = arith.constant 0 : i32
    %c0_i32_0 = arith.constant 0 : i32
    %c0_i32_1 = arith.constant 0 : i32
    return %c0_i32, %c0_i32_0 : i32, i32
  }
}

</mosaic_0001>

<bundles_post_ra>
// kernel: se_conv_block.1
= control target key start
LH: loop header
LB: loop body
LE: loop exit
PB: predicated region body
PF: predicated region fallthrough
CT: control target
= control target key end

     0   :  { %vm364_vm0 = vcmask 457728   ;;  %vm4663_vm1 = vcmask 523264   ;;  %vm5745_vm2 = vcmask 556032   ;;  %s11472_s0 = inlined_call_operand.vmem [shape: f32[1,56], index: 0, kind: input, shape index: {}]   ;;  %s11473_s1 = inlined_call_operand.vmem [shape: f32[1344,56], index: 1, kind: input, shape index: {}]   ;;  %s11474_s2 = inlined_call_operand.vmem [shape: f32[1344,1], index: 2, kind: input, shape index: {}]   ;;  %s11475_s3 = inlined_call_operand.vmem [shape: f32[1344,196], index: 3, kind: input, shape index: {}]   ;;  %s11476_s4 = inlined_call_operand.vmem [shape: bf16[224,1344], index: 4, kind: input, shape index: {}]   ;;  %s11477_s5 = inlined_call_operand.vmem [shape: f32[224,196], index: 5, kind: output, shape index: {}]  }
   0x1   :  { %v23_v0 = vld [vmem:[%s11473_s1 + $0x10] sm:$0xff]  ;;  %v7191_v1 = vld [vmem:[%s11472_s0] ss:$0 sm:$0xff]  ;;  %v24_v5 = vld [vmem:[%s11473_s1 + $0x18] sm:$0xff] }
   0x2   :  { %v21_v2 = vld [vmem:[%s11473_s1] sm:$0xff]  ;;  %v198_v3 = vmul.f32 %v7191_v1, %v23_v0  ;;  %v22_v6 = vld [vmem:[%s11473_s1 + $0x8] sm:$0xff]  ;;  %v199_v7 = vmul.f32 %v7191_v1, %v24_v5  ;;  %v28_v17 = vld [vmem:[%s11473_s1 + $0x38] sm:$0xff] }
   0x3   :  { %v196_v4 = vmul.f32 %v7191_v1, %v21_v2  ;;  %v197_v8 = vmul.f32 %v7191_v1, %v22_v6  ;;  %v26_v9 = vld [vmem:[%s11473_s1 + $0x28] sm:$0xff]  ;;  %v25_v10 = vld [vmem:[%s11473_s1 + $0x20] sm:$0xff]  ;;  %v27_v18 = vld [vmem:[%s11473_s1 + $0x30] sm:$0xff]  ;;  %v203_v21 = vmul.f32 %v7191_v1, %v28_v17 }
   0x4   :  { %v371_v11 = vsel %vm364_vm0, %v198_v3, 0.0  ;;  %v374_v13 = vsel %vm364_vm0, %v199_v7, 0.0  ;;  %v201_v15 = vmul.f32 %v7191_v1, %v26_v9  ;;  %v200_v16 = vmul.f32 %v7191_v1, %v25_v10  ;;  %v30_v23 = vld [vmem:[%s11473_s1 + $0x48] sm:$0xff]  ;;  %v29_v24 = vld [vmem:[%s11473_s1 + $0x40] sm:$0xff]  ;;  %v32_v29 = vld [vmem:[%s11473_s1 + $0x58] sm:$0xff] }
   0x5   :  { %v365_v12 = vsel %vm364_vm0, %v196_v4, 0.0  ;;  %372 = vadd.xlane.f32.xlu1 %v371_v11  ;;  %v368_v14 = vsel %vm364_vm0, %v197_v8, 0.0  ;;  %v202_v22 = vmul.f32 %v7191_v1, %v27_v18  ;;  %v386_v25 = vsel %vm364_vm0, %v203_v21, 0.0  ;;  %v31_v30 = vld [vmem:[%s11473_s1 + $0x50] sm:$0xff]  ;;  %v34_v35 = vld [vmem:[%s11473_s1 + $0x68] sm:$0xff]  ;;  %v33_v36 = vld [vmem:[%s11473_s1 + $0x60] sm:$0xff] }
   0x6   :  { %366 = vadd.xlane.f32.xlu0 %v365_v12  ;;  %v380_v19 = vsel %vm364_vm0, %v201_v15, 0.0  ;;  %v377_v20 = vsel %vm364_vm0, %v200_v16, 0.0  ;;  %v205_v27 = vmul.f32 %v7191_v1, %v30_v23  ;;  %v204_v28 = vmul.f32 %v7191_v1, %v29_v24  ;;  %v36_v41 = vld [vmem:[%s11473_s1 + $0x78] sm:$0xff]  ;;  %v35_v42 = vld [vmem:[%s11473_s1 + $0x70] sm:$0xff]  ;;  %v38_v47 = vld [vmem:[%s11473_s1 + $0x88] sm:$0xff] }
   0x7   :  { %v383_v26 = vsel %vm364_vm0, %v202_v22, 0.0  ;;  %v207_v33 = vmul.f32 %v7191_v1, %v32_v29  ;;  %v206_v34 = vmul.f32 %v7191_v1, %v31_v30  ;;  %v209_v39 = vmul.f32 %v7191_v1, %v34_v35  ;;  %v37_v48 = vld [vmem:[%s11473_s1 + $0x80] sm:$0xff]  ;;  %v40_v53 = vld [vmem:[%s11473_s1 + $0x98] sm:$0xff]  ;;  %v39_v54 = vld [vmem:[%s11473_s1 + $0x90] sm:$0xff] }
   0x8   :  { %v392_v31 = vsel %vm364_vm0, %v205_v27, 0.0  ;;  %v389_v32 = vsel %vm364_vm0, %v204_v28, 0.0  ;;  %v208_v40 = vmul.f32 %v7191_v1, %v33_v36  ;;  %v211_v45 = vmul.f32 %v7191_v1, %v36_v41  ;;  %v42_v59 = vld [vmem:[%s11473_s1 + $0xa8] sm:$0xff]  ;;  %v41_v60 = vld [vmem:[%s11473_s1 + $0xa0] sm:$0xff]  ;;  %v44_v2 = vld [vmem:[%s11473_s1 + $0xb8] sm:$0xff] }
   0x9   :  { %375 = vadd.xlane.f32.xlu1 %v374_v13  ;;  %v398_v37 = vsel %vm364_vm0, %v207_v33, 0.0  ;;  %v395_v38 = vsel %vm364_vm0, %v206_v34, 0.0  ;;  %v404_v43 = vsel %vm364_vm0, %v209_v39, 0.0  ;;  %v210_v46 = vmul.f32 %v7191_v1, %v35_v42  ;;  %v43_v3 = vld [vmem:[%s11473_s1 + $0xb0] sm:$0xff]  ;;  %v46_v8 = vld [vmem:[%s11473_s1 + $0xc8] sm:$0xff]  ;;  %v45_v9 = vld [vmem:[%s11473_s1 + $0xc0] sm:$0xff] }
   0xa   :  { %369 = vadd.xlane.f32.xlu0 %v368_v14  ;;  %v401_v44 = vsel %vm364_vm0, %v208_v40, 0.0  ;;  %v410_v49 = vsel %vm364_vm0, %v211_v45, 0.0  ;;  %v213_v51 = vmul.f32 %v7191_v1, %v38_v47  ;;  %v212_v52 = vmul.f32 %v7191_v1, %v37_v48  ;;  %v48_v14 = vld [vmem:[%s11473_s1 + $0xd8] sm:$0xff]  ;;  %v47_v15 = vld [vmem:[%s11473_s1 + $0xd0] sm:$0xff]  ;;  %v49_v21 = vld [vmem:[%s11473_s1 + $0xe0] sm:$0xff] }
   0xb   :  { %v407_v50 = vsel %vm364_vm0, %v210_v46, 0.0  ;;  %v215_v57 = vmul.f32 %v7191_v1, %v40_v53  ;;  %v214_v58 = vmul.f32 %v7191_v1, %v39_v54  ;;  %v217_v63 = vmul.f32 %v7191_v1, %v42_v59  ;;  %v51_v27 = vld [vmem:[%s11473_s1 + $0xf0] sm:$0xff]  ;;  %v53_v33 = vld [vmem:[%s11473_s1 + $0x100] sm:$0xff] }
   0xc   :  { %v416_v55 = vsel %vm364_vm0, %v213_v51, 0.0  ;;  %v413_v56 = vsel %vm364_vm0, %v212_v52, 0.0  ;;  %v216_v0 = vmul.f32 %v7191_v1, %v41_v60  ;;  %v219_v6 = vmul.f32 %v7191_v1, %v44_v2  ;;  %v55_v39 = vld [vmem:[%s11473_s1 + $0x110] sm:$0xff]  ;;  %v57_v45 = vld [vmem:[%s11473_s1 + $0x120] sm:$0xff] }
   0xd   :  { %381 = vadd.xlane.f32.xlu1 %v380_v19  ;;  %v422_v61 = vsel %vm364_vm0, %v215_v57, 0.0  ;;  %v419_v62 = vsel %vm364_vm0, %v214_v58, 0.0  ;;  %v428_v4 = vsel %vm364_vm0, %v217_v63, 0.0  ;;  %v218_v7 = vmul.f32 %v7191_v1, %v43_v3  ;;  %v59_v51 = vld [vmem:[%s11473_s1 + $0x130] sm:$0xff]  ;;  %v61_v57 = vld [vmem:[%s11473_s1 + $0x140] sm:$0xff] }
   0xe   :  { %378 = vadd.xlane.f32.xlu0 %v377_v20  ;;  %v425_v5 = vsel %vm364_vm0, %v216_v0, 0.0  ;;  %v434_v10 = vsel %vm364_vm0, %v219_v6, 0.0  ;;  %v221_v12 = vmul.f32 %v7191_v1, %v46_v8  ;;  %v220_v13 = vmul.f32 %v7191_v1, %v45_v9  ;;  %v50_v20 = vld [vmem:[%s11473_s1 + $0xe8] sm:$0xff]  ;;  %v63_v63 = vld [vmem:[%s11473_s1 + $0x150] sm:$0xff]  ;;  %v65_v6 = vld [vmem:[%s11473_s1 + $0x160] sm:$0xff] }
   0xf   :  { %v431_v11 = vsel %vm364_vm0, %v218_v7, 0.0  ;;  %v223_v18 = vmul.f32 %v7191_v1, %v48_v14  ;;  %v222_v19 = vmul.f32 %v7191_v1, %v47_v15  ;;  %v225_v24 = vmul.f32 %v7191_v1, %v50_v20 }
  0x10   :  { %v440_v16 = vsel %vm364_vm0, %v221_v12, 0.0  ;;  %v437_v17 = vsel %vm364_vm0, %v220_v13, 0.0  ;;  %v67_v12 = vld [vmem:[%s11473_s1 + $0x170] sm:$0xff] }
  0x11   :  { %387 = vadd.xlane.f32.xlu1 %v386_v25  ;;  %v446_v22 = vsel %vm364_vm0, %v223_v18, 0.0  ;;  %v443_v23 = vsel %vm364_vm0, %v222_v19, 0.0  ;;  %v224_v25 = vmul.f32 %v7191_v1, %v49_v21  ;;  %v452_v28 = vsel %vm364_vm0, %v225_v24, 0.0  ;;  %v69_v18 = vld [vmem:[%s11473_s1 + $0x180] sm:$0xff]  ;;  %v71_v24 = vld [vmem:[%s11473_s1 + $0x190] sm:$0xff] }
  0x12   :  { %384 = vadd.xlane.f32.xlu0 %v383_v26  ;;  %v52_v26 = vld [vmem:[%s11473_s1 + $0xf8] sm:$0xff] }
  0x13   :  { %v449_v29 = vsel %vm364_vm0, %v224_v25, 0.0  ;;  %v227_v30 = vmul.f32 %v7191_v1, %v52_v26 }
  0x15   :  { %393 = vadd.xlane.f32.xlu1 %v392_v31  ;;  %v226_v31 = vmul.f32 %v7191_v1, %v51_v27  ;;  %v458_v34 = vsel %vm364_vm0, %v227_v30, 0.0  ;;  %v73_v30 = vld [vmem:[%s11473_s1 + $0x1a0] sm:$0xff] }
  0x16   :  { %390 = vadd.xlane.f32.xlu0 %v389_v32  ;;  %v54_v32 = vld [vmem:[%s11473_s1 + $0x108] sm:$0xff] }
  0x17   :  { %v455_v35 = vsel %vm364_vm0, %v226_v31, 0.0  ;;  %v229_v36 = vmul.f32 %v7191_v1, %v54_v32 }
  0x19   :  { %399 = vadd.xlane.f32.xlu1 %v398_v37  ;;  %v228_v37 = vmul.f32 %v7191_v1, %v53_v33  ;;  %v464_v40 = vsel %vm364_vm0, %v229_v36, 0.0  ;;  %v75_v36 = vld [vmem:[%s11473_s1 + $0x1b0] sm:$0xff] }
  0x1a   :  { %396 = vadd.xlane.f32.xlu0 %v395_v38  ;;  %v56_v38 = vld [vmem:[%s11473_s1 + $0x118] sm:$0xff] }
  0x1b   :  { %v461_v41 = vsel %vm364_vm0, %v228_v37, 0.0  ;;  %v231_v42 = vmul.f32 %v7191_v1, %v56_v38 }
  0x1d   :  { %405 = vadd.xlane.f32.xlu1 %v404_v43  ;;  %v230_v43 = vmul.f32 %v7191_v1, %v55_v39  ;;  %v470_v46 = vsel %vm364_vm0, %v231_v42, 0.0  ;;  %v77_v42 = vld [vmem:[%s11473_s1 + $0x1c0] sm:$0xff] }
  0x1e   :  { %402 = vadd.xlane.f32.xlu0 %v401_v44  ;;  %v58_v44 = vld [vmem:[%s11473_s1 + $0x128] sm:$0xff] }
  0x1f   :  { %v467_v47 = vsel %vm364_vm0, %v230_v43, 0.0  ;;  %v233_v48 = vmul.f32 %v7191_v1, %v58_v44 }
  0x21   :  { %411 = vadd.xlane.f32.xlu1 %v410_v49  ;;  %v232_v49 = vmul.f32 %v7191_v1, %v57_v45  ;;  %v476_v52 = vsel %vm364_vm0, %v233_v48, 0.0  ;;  %v79_v48 = vld [vmem:[%s11473_s1 + $0x1d0] sm:$0xff] }
  0x22   :  { %408 = vadd.xlane.f32.xlu0 %v407_v50  ;;  %v60_v50 = vld [vmem:[%s11473_s1 + $0x138] sm:$0xff] }
  0x23   :  { %v473_v53 = vsel %vm364_vm0, %v232_v49, 0.0  ;;  %v235_v54 = vmul.f32 %v7191_v1, %v60_v50 }
  0x25   :  { %417 = vadd.xlane.f32.xlu1 %v416_v55  ;;  %v234_v55 = vmul.f32 %v7191_v1, %v59_v51  ;;  %v482_v58 = vsel %vm364_vm0, %v235_v54, 0.0  ;;  %v81_v54 = vld [vmem:[%s11473_s1 + $0x1e0] sm:$0xff] }
  0x26   :  { %414 = vadd.xlane.f32.xlu0 %v413_v56  ;;  %v62_v56 = vld [vmem:[%s11473_s1 + $0x148] sm:$0xff] }
  0x27   :  { %v479_v59 = vsel %vm364_vm0, %v234_v55, 0.0  ;;  %v237_v60 = vmul.f32 %v7191_v1, %v62_v56 }
  0x29   :  { %423 = vadd.xlane.f32.xlu1 %v422_v61  ;;  %v236_v61 = vmul.f32 %v7191_v1, %v61_v57  ;;  %v488_v0 = vsel %vm364_vm0, %v237_v60, 0.0  ;;  %v83_v60 = vld [vmem:[%s11473_s1 + $0x1f0] sm:$0xff] }
  0x2a   :  { %420 = vadd.xlane.f32.xlu0 %v419_v62  ;;  %v64_v62 = vld [vmem:[%s11473_s1 + $0x158] sm:$0xff] }
  0x2b   :  { %v485_v2 = vsel %vm364_vm0, %v236_v61, 0.0  ;;  %v239_v3 = vmul.f32 %v7191_v1, %v64_v62 }
  0x2d   :  { %429 = vadd.xlane.f32.xlu1 %v428_v4  ;;  %v238_v4 = vmul.f32 %v7191_v1, %v63_v63  ;;  %v494_v7 = vsel %vm364_vm0, %v239_v3, 0.0  ;;  %v85_v3 = vld [vmem:[%s11473_s1 + $0x200] sm:$0xff] }
  0x2e   :  { %426 = vadd.xlane.f32.xlu0 %v425_v5  ;;  %v66_v5 = vld [vmem:[%s11473_s1 + $0x168] sm:$0xff] }
  0x2f   :  { %v491_v8 = vsel %vm364_vm0, %v238_v4, 0.0  ;;  %v241_v9 = vmul.f32 %v7191_v1, %v66_v5 }
  0x31   :  { %435 = vadd.xlane.f32.xlu1 %v434_v10  ;;  %v240_v10 = vmul.f32 %v7191_v1, %v65_v6  ;;  %v500_v13 = vsel %vm364_vm0, %v241_v9, 0.0  ;;  %v87_v9 = vld [vmem:[%s11473_s1 + $0x210] sm:$0xff] }
  0x32   :  { %432 = vadd.xlane.f32.xlu0 %v431_v11  ;;  %v68_v11 = vld [vmem:[%s11473_s1 + $0x178] sm:$0xff] }
  0x33   :  { %v497_v14 = vsel %vm364_vm0, %v240_v10, 0.0  ;;  %v243_v15 = vmul.f32 %v7191_v1, %v68_v11 }
  0x35   :  { %441 = vadd.xlane.f32.xlu1 %v440_v16  ;;  %v242_v16 = vmul.f32 %v7191_v1, %v67_v12  ;;  %v506_v19 = vsel %vm364_vm0, %v243_v15, 0.0  ;;  %v89_v15 = vld [vmem:[%s11473_s1 + $0x220] sm:$0xff] }
  0x36   :  { %438 = vadd.xlane.f32.xlu0 %v437_v17  ;;  %v70_v17 = vld [vmem:[%s11473_s1 + $0x188] sm:$0xff] }
  0x37   :  { %v503_v20 = vsel %vm364_vm0, %v242_v16, 0.0  ;;  %v245_v21 = vmul.f32 %v7191_v1, %v70_v17 }
  0x39   :  { %447 = vadd.xlane.f32.xlu1 %v446_v22  ;;  %v244_v22 = vmul.f32 %v7191_v1, %v69_v18  ;;  %v512_v25 = vsel %vm364_vm0, %v245_v21, 0.0  ;;  %v91_v21 = vld [vmem:[%s11473_s1 + $0x230] sm:$0xff] }
  0x3a   :  { %444 = vadd.xlane.f32.xlu0 %v443_v23  ;;  %v72_v23 = vld [vmem:[%s11473_s1 + $0x198] sm:$0xff] }
  0x3b   :  { %v509_v26 = vsel %vm364_vm0, %v244_v22, 0.0  ;;  %v247_v27 = vmul.f32 %v7191_v1, %v72_v23 }
  0x3d   :  { %453 = vadd.xlane.f32.xlu1 %v452_v28  ;;  %v246_v28 = vmul.f32 %v7191_v1, %v71_v24  ;;  %v518_v31 = vsel %vm364_vm0, %v247_v27, 0.0  ;;  %v93_v27 = vld [vmem:[%s11473_s1 + $0x240] sm:$0xff] }
  0x3e   :  { %450 = vadd.xlane.f32.xlu0 %v449_v29  ;;  %v74_v29 = vld [vmem:[%s11473_s1 + $0x1a8] sm:$0xff] }
  0x3f   :  { %v515_v32 = vsel %vm364_vm0, %v246_v28, 0.0  ;;  %v249_v33 = vmul.f32 %v7191_v1, %v74_v29 }
  0x41   :  { %459 = vadd.xlane.f32.xlu1 %v458_v34  ;;  %v248_v34 = vmul.f32 %v7191_v1, %v73_v30  ;;  %v524_v37 = vsel %vm364_vm0, %v249_v33, 0.0  ;;  %v95_v33 = vld [vmem:[%s11473_s1 + $0x250] sm:$0xff] }
  0x42   :  { %456 = vadd.xlane.f32.xlu0 %v455_v35  ;;  %v76_v35 = vld [vmem:[%s11473_s1 + $0x1b8] sm:$0xff] }
  0x43   :  { %v521_v38 = vsel %vm364_vm0, %v248_v34, 0.0  ;;  %v251_v39 = vmul.f32 %v7191_v1, %v76_v35 }
  0x45   :  { %465 = vadd.xlane.f32.xlu1 %v464_v40  ;;  %v250_v40 = vmul.f32 %v7191_v1, %v75_v36  ;;  %v530_v43 = vsel %vm364_vm0, %v251_v39, 0.0  ;;  %v270_v39 = vmul.f32 %v7191_v1, %v95_v33  ;;  %v112_v33 = vld [vmem:[%s11473_s1 + $0x2d8] sm:$0xff] }
  0x46   :  { %462 = vadd.xlane.f32.xlu0 %v461_v41  ;;  %v78_v41 = vld [vmem:[%s11473_s1 + $0x1c8] sm:$0xff] }
  0x47   :  { %v527_v44 = vsel %vm364_vm0, %v250_v40, 0.0  ;;  %v253_v45 = vmul.f32 %v7191_v1, %v78_v41  ;;  %v98_v40 = vld [vmem:[%s11473_s1 + $0x268] sm:$0xff]  ;;  %v97_v41 = vld [vmem:[%s11473_s1 + $0x260] sm:$0xff] }
  0x49   :  { %471 = vadd.xlane.f32.xlu1 %v470_v46  ;;  %v252_v46 = vmul.f32 %v7191_v1, %v77_v42  ;;  %v536_v49 = vsel %vm364_vm0, %v253_v45, 0.0  ;;  %v587_v45 = vsel %vm364_vm0, %v270_v39, 0.0 }
  0x4a   :  { %468 = vadd.xlane.f32.xlu0 %v467_v47  ;;  %v80_v47 = vld [vmem:[%s11473_s1 + $0x1d8] sm:$0xff] }
  0x4b   :  { %v533_v50 = vsel %vm364_vm0, %v252_v46, 0.0  ;;  %v255_v51 = vmul.f32 %v7191_v1, %v80_v47  ;;  %v273_v46 = vmul.f32 %v7191_v1, %v98_v40  ;;  %v272_v47 = vmul.f32 %v7191_v1, %v97_v41 }
  0x4c   :  { %v287_v41 = vmul.f32 %v7191_v1, %v112_v33 }
  0x4d   :  { %477 = vadd.xlane.f32.xlu1 %v476_v52  ;;  %v254_v52 = vmul.f32 %v7191_v1, %v79_v48  ;;  %v542_v55 = vsel %vm364_vm0, %v255_v51, 0.0  ;;  %v100_v48 = vld [vmem:[%s11473_s1 + $0x278] sm:$0xff] }
  0x4e   :  { %474 = vadd.xlane.f32.xlu0 %v473_v53  ;;  %v82_v53 = vld [vmem:[%s11473_s1 + $0x1e8] sm:$0xff] }
  0x4f   :  { %v539_v56 = vsel %vm364_vm0, %v254_v52, 0.0  ;;  %v257_v57 = vmul.f32 %v7191_v1, %v82_v53  ;;  %v596_v52 = vsel %vm364_vm0, %v273_v46, 0.0  ;;  %v593_v53 = vsel %vm364_vm0, %v272_v47, 0.0  ;;  %v113_v46 = vld [vmem:[%s11473_s1 + $0x2e0] sm:$0xff] }
  0x51   :  { %483 = vadd.xlane.f32.xlu1 %v482_v58  ;;  %v256_v58 = vmul.f32 %v7191_v1, %v81_v54  ;;  %v548_v61 = vsel %vm364_vm0, %v257_v57, 0.0  ;;  %v275_v54 = vmul.f32 %v7191_v1, %v100_v48  ;;  %v101_v57 = vld [vmem:[%s11473_s1 + $0x280] sm:$0xff] }
  0x52   :  { %480 = vadd.xlane.f32.xlu0 %v479_v59  ;;  %v84_v59 = vld [vmem:[%s11473_s1 + $0x1f8] sm:$0xff] }
  0x53   :  { %v545_v62 = vsel %vm364_vm0, %v256_v58, 0.0  ;;  %v259_v63 = vmul.f32 %v7191_v1, %v84_v59 }
  0x55   :  { %489 = vadd.xlane.f32.xlu1 %v488_v0  ;;  %v258_v0 = vmul.f32 %v7191_v1, %v83_v60  ;;  %v554_v4 = vsel %vm364_vm0, %v259_v63, 0.0  ;;  %v602_v60 = vsel %vm364_vm0, %v275_v54, 0.0  ;;  %v276_v63 = vmul.f32 %v7191_v1, %v101_v57 }
  0x56   :  { %486 = vadd.xlane.f32.xlu0 %v485_v2  ;;  %v86_v2 = vld [vmem:[%s11473_s1 + $0x208] sm:$0xff]  ;;  %v288_v54 = vmul.f32 %v7191_v1, %v113_v46 }
  0x57   :  { %v551_v5 = vsel %vm364_vm0, %v258_v0, 0.0  ;;  %v261_v6 = vmul.f32 %v7191_v1, %v86_v2  ;;  %v104_v0 = vld [vmem:[%s11473_s1 + $0x298] sm:$0xff]  ;;  %v103_v2 = vld [vmem:[%s11473_s1 + $0x290] sm:$0xff] }
  0x59   :  { %495 = vadd.xlane.f32.xlu1 %v494_v7  ;;  %v260_v7 = vmul.f32 %v7191_v1, %v85_v3  ;;  %v560_v10 = vsel %vm364_vm0, %v261_v6, 0.0  ;;  %v605_v6 = vsel %vm364_vm0, %v276_v63, 0.0 }
  0x5a   :  { %492 = vadd.xlane.f32.xlu0 %v491_v8  ;;  %v88_v8 = vld [vmem:[%s11473_s1 + $0x218] sm:$0xff] }
  0x5b   :  { %v557_v11 = vsel %vm364_vm0, %v260_v7, 0.0  ;;  %v263_v12 = vmul.f32 %v7191_v1, %v88_v8  ;;  %v279_v7 = vmul.f32 %v7191_v1, %v104_v0  ;;  %v278_v8 = vmul.f32 %v7191_v1, %v103_v2  ;;  %v118_v2 = vld [vmem:[%s11473_s1 + $0x308] sm:$0xff] }
  0x5d   :  { %501 = vadd.xlane.f32.xlu1 %v500_v13  ;;  %v262_v13 = vmul.f32 %v7191_v1, %v87_v9  ;;  %v566_v16 = vsel %vm364_vm0, %v263_v12, 0.0  ;;  %v106_v9 = vld [vmem:[%s11473_s1 + $0x2a8] sm:$0xff] }
  0x5e   :  { %498 = vadd.xlane.f32.xlu0 %v497_v14  ;;  %v90_v14 = vld [vmem:[%s11473_s1 + $0x228] sm:$0xff] }
  0x5f   :  { %v563_v17 = vsel %vm364_vm0, %v262_v13, 0.0  ;;  %v265_v18 = vmul.f32 %v7191_v1, %v90_v14  ;;  %v614_v13 = vsel %vm364_vm0, %v279_v7, 0.0  ;;  %v611_v14 = vsel %vm364_vm0, %v278_v8, 0.0 }
  0x61   :  { %507 = vadd.xlane.f32.xlu1 %v506_v19  ;;  %v264_v19 = vmul.f32 %v7191_v1, %v89_v15  ;;  %v572_v22 = vsel %vm364_vm0, %v265_v18, 0.0  ;;  %v281_v15 = vmul.f32 %v7191_v1, %v106_v9  ;;  %v107_v18 = vld [vmem:[%s11473_s1 + $0x2b0] sm:$0xff] }
  0x62   :  { %504 = vadd.xlane.f32.xlu0 %v503_v20  ;;  %v92_v20 = vld [vmem:[%s11473_s1 + $0x238] sm:$0xff] }
  0x63   :  { %v569_v23 = vsel %vm364_vm0, %v264_v19, 0.0  ;;  %v267_v24 = vmul.f32 %v7191_v1, %v92_v20 }
  0x65   :  { %513 = vadd.xlane.f32.xlu1 %v512_v25  ;;  %v266_v25 = vmul.f32 %v7191_v1, %v91_v21  ;;  %v578_v28 = vsel %vm364_vm0, %v267_v24, 0.0  ;;  %v620_v21 = vsel %vm364_vm0, %v281_v15, 0.0  ;;  %v282_v24 = vmul.f32 %v7191_v1, %v107_v18  ;;  %v119_v15 = vld [vmem:[%s11473_s1 + $0x310] sm:$0xff] }
  0x66   :  { %510 = vadd.xlane.f32.xlu0 %v509_v26  ;;  %v94_v26 = vld [vmem:[%s11473_s1 + $0x248] sm:$0xff] }
  0x67   :  { %v575_v29 = vsel %vm364_vm0, %v266_v25, 0.0  ;;  %v269_v30 = vmul.f32 %v7191_v1, %v94_v26  ;;  %v110_v25 = vld [vmem:[%s11473_s1 + $0x2c8] sm:$0xff]  ;;  %v109_v26 = vld [vmem:[%s11473_s1 + $0x2c0] sm:$0xff] }
  0x69   :  { %519 = vadd.xlane.f32.xlu1 %v518_v31  ;;  %v268_v31 = vmul.f32 %v7191_v1, %v93_v27  ;;  %v584_v36 = vsel %vm364_vm0, %v269_v30, 0.0  ;;  %v623_v30 = vsel %vm364_vm0, %v282_v24, 0.0  ;;  %v122_v24 = vld [vmem:[%s11473_s1 + $0x328] sm:$0xff] }
  0x6a   :  { %516 = vadd.xlane.f32.xlu0 %v515_v32  ;;  %v96_v32 = vld [vmem:[%s11473_s1 + $0x258] sm:$0xff] }
  0x6d   :  { %525 = vadd.xlane.f32.xlu1 %v524_v37  ;;  %v581_v37 = vsel %vm364_vm0, %v268_v31, 0.0  ;;  %v285_v31 = vmul.f32 %v7191_v1, %v110_v25  ;;  %v121_v25 = vld [vmem:[%s11473_s1 + $0x320] sm:$0xff] }
  0x6e   :  { %522 = vadd.xlane.f32.xlu0 %v521_v38  ;;  %v271_v38 = vmul.f32 %v7191_v1, %v96_v32  ;;  %v284_v32 = vmul.f32 %v7191_v1, %v109_v26  ;;  %v296_v33 = vmul.f32 %v7191_v1, %v121_v25 }
  0x6f   :  { %v632_v39 = vsel %vm364_vm0, %v285_v31, 0.0 }
  0x70   :  { %v629_v40 = vsel %vm364_vm0, %v284_v32, 0.0  ;;  %v297_v32 = vmul.f32 %v7191_v1, %v122_v24 }
  0x71   :  { %531 = vadd.xlane.f32.xlu1 %v530_v43 }
  0x72   :  { %528 = vadd.xlane.f32.xlu0 %v527_v44  ;;  %v590_v44 = vsel %vm364_vm0, %v271_v38, 0.0 }
  0x75   :  { %537 = vadd.xlane.f32.xlu1 %v536_v49  ;;  %v99_v49 = vld [vmem:[%s11473_s1 + $0x270] sm:$0xff] }
  0x76   :  { %534 = vadd.xlane.f32.xlu0 %v533_v50 }
  0x79   :  { %543 = vadd.xlane.f32.xlu1 %v542_v55  ;;  %v274_v55 = vmul.f32 %v7191_v1, %v99_v49  ;;  %v638_v49 = vsel %vm364_vm0, %v287_v41, 0.0 }
  0x7a   :  { %540 = vadd.xlane.f32.xlu0 %v539_v56  ;;  %v102_v56 = vld [vmem:[%s11473_s1 + $0x288] sm:$0xff] }
  0x7d   :  { %549 = vadd.xlane.f32.xlu1 %v548_v61  ;;  %v599_v61 = vsel %vm364_vm0, %v274_v55, 0.0  ;;  %v116_v55 = vld [vmem:[%s11473_s1 + $0x2f8] sm:$0xff] }
  0x7e   :  { %546 = vadd.xlane.f32.xlu0 %v545_v62  ;;  %v277_v62 = vmul.f32 %v7191_v1, %v102_v56  ;;  %v115_v56 = vld [vmem:[%s11473_s1 + $0x2f0] sm:$0xff]  ;;  %v291_v63 = vmul.f32 %v7191_v1, %v116_v55 }
  0x7f   :  { %v290_v0 = vmul.f32 %v7191_v1, %v115_v56 }
  0x80   :  { %v650_v8 = vsel %vm364_vm0, %v291_v63, 0.0 }
  0x81   :  { %555 = vadd.xlane.f32.xlu1 %v554_v4  ;;  %v647_v9 = vsel %vm364_vm0, %v290_v0, 0.0  ;;  %v128_v0 = vld [vmem:[%s11473_s1 + $0x358] sm:$0xff] }
  0x82   :  { %552 = vadd.xlane.f32.xlu0 %v551_v5  ;;  %v608_v5 = vsel %vm364_vm0, %v277_v62, 0.0  ;;  %v641_v62 = vsel %vm364_vm0, %v288_v54, 0.0 }
  0x85   :  { %561 = vadd.xlane.f32.xlu1 %v560_v10  ;;  %v105_v10 = vld [vmem:[%s11473_s1 + $0x2a0] sm:$0xff] }
  0x86   :  { %558 = vadd.xlane.f32.xlu0 %v557_v11 }
  0x89   :  { %567 = vadd.xlane.f32.xlu1 %v566_v16  ;;  %v280_v16 = vmul.f32 %v7191_v1, %v105_v10  ;;  %v293_v10 = vmul.f32 %v7191_v1, %v118_v2  ;;  %v127_v2 = vld [vmem:[%s11473_s1 + $0x350] sm:$0xff] }
  0x8a   :  { %564 = vadd.xlane.f32.xlu0 %v563_v17  ;;  %v108_v17 = vld [vmem:[%s11473_s1 + $0x2b8] sm:$0xff] }
  0x8b   :  { %v656_v18 = vsel %vm364_vm0, %v293_v10, 0.0 }
  0x8d   :  { %573 = vadd.xlane.f32.xlu1 %v572_v22  ;;  %v617_v22 = vsel %vm364_vm0, %v280_v16, 0.0 }
  0x8e   :  { %570 = vadd.xlane.f32.xlu0 %v569_v23  ;;  %v283_v23 = vmul.f32 %v7191_v1, %v108_v17 }
  0x91   :  { %579 = vadd.xlane.f32.xlu1 %v578_v28 }
  0x92   :  { %576 = vadd.xlane.f32.xlu0 %v575_v29  ;;  %v7564_v34 = vpop.xlane.xlu1 %372  ;;  %v626_v29 = vsel %vm364_vm0, %v283_v23, 0.0  ;;  %v294_v23 = vmul.f32 %v7191_v1, %v119_v15  ;;  %v130_v15 = vld [vmem:[%s11473_s1 + $0x368] sm:$0xff] }
  0x93   :  { %v7566_v35 = vpop.xlane.xlu0 %366  ;;  %v305_v25 = vmul.f32 %v7191_v1, %v130_v15 }
  0x94   :  { %v659_v31 = vsel %vm364_vm0, %v294_v23, 0.0 }
  0x95   :  { %585 = vadd.xlane.f32.xlu1 %v584_v36  ;;  %v111_v36 = vld [vmem:[%s11473_s1 + $0x2d0] sm:$0xff] }
  0x96   :  { %582 = vadd.xlane.f32.xlu0 %v581_v37  ;;  %v7578_v42 = vpop.xlane.xlu1 %375 }
  0x97   :  { %v7580_v43 = vpop.xlane.xlu0 %369 }
  0x99   :  { %591 = vadd.xlane.f32.xlu1 %v590_v44  ;;  %v286_v44 = vmul.f32 %v7191_v1, %v111_v36  ;;  %v124_v36 = vld [vmem:[%s11473_s1 + $0x338] sm:$0xff] }
  0x9a   :  { %588 = vadd.xlane.f32.xlu0 %v587_v45  ;;  %v7592_v50 = vpop.xlane.xlu1 %381  ;;  %v114_v45 = vld [vmem:[%s11473_s1 + $0x2e8] sm:$0xff]  ;;  %v299_v46 = vmul.f32 %v7191_v1, %v124_v36 }
  0x9b   :  { %v7594_v51 = vpop.xlane.xlu0 %378 }
  0x9c   :  { %v674_v56 = vsel %vm364_vm0, %v299_v46, 0.0 }
  0x9d   :  { %597 = vadd.xlane.f32.xlu1 %v596_v52  ;;  %v635_v52 = vsel %vm364_vm0, %v286_v44, 0.0  ;;  %v668_v44 = vsel %vm364_vm0, %v297_v32, 0.0  ;;  %v131_v32 = vld [vmem:[%s11473_s1 + $0x370] sm:$0xff] }
  0x9e   :  { %594 = vadd.xlane.f32.xlu0 %v593_v53  ;;  %v7606_v58 = vpop.xlane.xlu1 %387  ;;  %v289_v53 = vmul.f32 %v7191_v1, %v114_v45  ;;  %v665_v45 = vsel %vm364_vm0, %v296_v33, 0.0  ;;  %v306_v46 = vmul.f32 %v7191_v1, %v131_v32 }
  0x9f   :  { %v7608_v59 = vpop.xlane.xlu0 %384 }
  0xa1   :  { %603 = vadd.xlane.f32.xlu1 %v602_v60 }
  0xa2   :  { %600 = vadd.xlane.f32.xlu0 %v599_v61  ;;  %v7620_v3 = vpop.xlane.xlu1 %393  ;;  %v644_v61 = vsel %vm364_vm0, %v289_v53, 0.0  ;;  %v125_v53 = vld [vmem:[%s11473_s1 + $0x340] sm:$0xff] }
  0xa3   :  { %v7622_v4 = vpop.xlane.xlu0 %390  ;;  %v300_v63 = vmul.f32 %v7191_v1, %v125_v53 }
  0xa5   :  { %609 = vadd.xlane.f32.xlu1 %v608_v5  ;;  %v117_v5 = vld [vmem:[%s11473_s1 + $0x300] sm:$0xff]  ;;  %v677_v10 = vsel %vm364_vm0, %v300_v63, 0.0 }
  0xa6   :  { %606 = vadd.xlane.f32.xlu0 %v605_v6  ;;  %v7634_v11 = vpop.xlane.xlu1 %399 }
  0xa7   :  { %v7636_v12 = vpop.xlane.xlu0 %396 }
  0xa9   :  { %615 = vadd.xlane.f32.xlu1 %v614_v13  ;;  %v292_v13 = vmul.f32 %v7191_v1, %v117_v5 }
  0xaa   :  { %612 = vadd.xlane.f32.xlu0 %v611_v14  ;;  %v7648_v19 = vpop.xlane.xlu1 %405  ;;  %v120_v14 = vld [vmem:[%s11473_s1 + $0x318] sm:$0xff] }
  0xab   :  { %v7650_v20 = vpop.xlane.xlu0 %402 }
  0xad   :  { %621 = vadd.xlane.f32.xlu1 %v620_v21  ;;  %v653_v21 = vsel %vm364_vm0, %v292_v13, 0.0  ;;  %v303_v13 = vmul.f32 %v7191_v1, %v128_v0 }
  0xae   :  { %618 = vadd.xlane.f32.xlu0 %v617_v22  ;;  %v7662_v27 = vpop.xlane.xlu1 %411  ;;  %v295_v22 = vmul.f32 %v7191_v1, %v120_v14  ;;  %v302_v14 = vmul.f32 %v7191_v1, %v127_v2  ;;  %v136_v2 = vld [vmem:[%s11473_s1 + $0x398] sm:$0xff] }
  0xaf   :  { %v7664_v28 = vpop.xlane.xlu0 %408  ;;  %v686_v23 = vsel %vm364_vm0, %v303_v13, 0.0 }
  0xb0   :  { %v683_v24 = vsel %vm364_vm0, %v302_v14, 0.0 }
  0xb1   :  { %627 = vadd.xlane.f32.xlu1 %v626_v29 }
  0xb2   :  { %624 = vadd.xlane.f32.xlu0 %v623_v30  ;;  %v7676_v37 = vpop.xlane.xlu1 %417  ;;  %v662_v30 = vsel %vm364_vm0, %v295_v22, 0.0 }
  0xb3   :  { %v7678_v38 = vpop.xlane.xlu0 %414 }
  0xb5   :  { %633 = vadd.xlane.f32.xlu1 %v632_v39  ;;  %v123_v39 = vld [vmem:[%s11473_s1 + $0x330] sm:$0xff] }
  0xb6   :  { %630 = vadd.xlane.f32.xlu0 %v629_v40  ;;  %v7690_v47 = vpop.xlane.xlu1 %423 }
  0xb7   :  { %v7692_v48 = vpop.xlane.xlu0 %420 }
  0xb9   :  { %639 = vadd.xlane.f32.xlu1 %v638_v49  ;;  %v298_v49 = vmul.f32 %v7191_v1, %v123_v39  ;;  %v692_v39 = vsel %vm364_vm0, %v305_v25, 0.0  ;;  %v137_v25 = vld [vmem:[%s11473_s1 + $0x3a0] sm:$0xff] }
  0xba   :  { %636 = vadd.xlane.f32.xlu0 %v635_v52  ;;  %v7704_v57 = vpop.xlane.xlu1 %429  ;;  %v126_v52 = vld [vmem:[%s11473_s1 + $0x348] sm:$0xff] }
  0xbb   :  { %v7706_v60 = vpop.xlane.xlu0 %426 }
  0xbd   :  { %645 = vadd.xlane.f32.xlu1 %v644_v61  ;;  %v671_v61 = vsel %vm364_vm0, %v298_v49, 0.0  ;;  %v134_v49 = vld [vmem:[%s11473_s1 + $0x388] sm:$0xff] }
  0xbe   :  { %642 = vadd.xlane.f32.xlu0 %v641_v62  ;;  %v7718_v6 = vpop.xlane.xlu1 %435  ;;  %v301_v62 = vmul.f32 %v7191_v1, %v126_v52  ;;  %v133_v52 = vld [vmem:[%s11473_s1 + $0x380] sm:$0xff]  ;;  %v309_v63 = vmul.f32 %v7191_v1, %v134_v49  ;;  %v140_v49 = vld [vmem:[%s11473_s1 + $0x3b8] sm:$0xff] }
  0xbf   :  { %v7720_v7 = vpop.xlane.xlu0 %432  ;;  %v308_v0 = vmul.f32 %v7191_v1, %v133_v52  ;;  %v139_v52 = vld [vmem:[%s11473_s1 + $0x3b0] sm:$0xff] }
  0xc0   :  { %v704_v14 = vsel %vm364_vm0, %v309_v63, 0.0 }
  0xc1   :  { %651 = vadd.xlane.f32.xlu1 %v650_v8  ;;  %v701_v15 = vsel %vm364_vm0, %v308_v0, 0.0  ;;  %v7883_v0 = vld [vmem:[%s11472_s0] ss:$0 sm:$0xff] }
  0xc2   :  { %648 = vadd.xlane.f32.xlu0 %v647_v9  ;;  %v7732_v16 = vpop.xlane.xlu1 %441  ;;  %v680_v9 = vsel %vm364_vm0, %v301_v62, 0.0  ;;  %v695_v62 = vsel %vm364_vm0, %v306_v46, 0.0  ;;  %v11478_v46 = vmov 0  }
  0xc3   :  { %v7734_v17 = vpop.xlane.xlu0 %438  ;;  %6256 = vset.pattern.permute.xlu1 %v11478_v46  ;;  %6255 = vset.pattern.permute.xlu0 %v11478_v46  ;;  %v148_v46 = vld [vmem:[%s11473_s1 + $0x3f8] sm:$0xff] }
  0xc5   :  { %657 = vadd.xlane.f32.xlu1 %v656_v18  ;;  %v129_v18 = vld [vmem:[%s11473_s1 + $0x360] sm:$0xff] }
  0xc6   :  { %654 = vadd.xlane.f32.xlu0 %v653_v21  ;;  %v7746_v26 = vpop.xlane.xlu1 %447 }
  0xc7   :  { %v7748_v29 = vpop.xlane.xlu0 %444 }
  0xc9   :  { %663 = vadd.xlane.f32.xlu1 %v662_v30  ;;  %v304_v30 = vmul.f32 %v7191_v1, %v129_v18  ;;  %v311_v18 = vmul.f32 %v7191_v1, %v136_v2  ;;  %v315_v2 = vmul.f32 %v7883_v0, %v140_v49 }
  0xca   :  { %660 = vadd.xlane.f32.xlu0 %v659_v31  ;;  %v7760_v40 = vpop.xlane.xlu1 %453  ;;  %v132_v31 = vld [vmem:[%s11473_s1 + $0x378] sm:$0xff] }
  0xcb   :  { %v7762_v41 = vpop.xlane.xlu0 %450  ;;  %v710_v32 = vsel %vm364_vm0, %v311_v18, 0.0 }
  0xcd   :  { %669 = vadd.xlane.f32.xlu1 %v668_v44  ;;  %v689_v44 = vsel %vm364_vm0, %v304_v30, 0.0 }
  0xce   :  { %666 = vadd.xlane.f32.xlu0 %v665_v45  ;;  %v7774_v54 = vpop.xlane.xlu1 %459  ;;  %v307_v45 = vmul.f32 %v7191_v1, %v132_v31 }
  0xcf   :  { %v7776_v55 = vpop.xlane.xlu0 %456 }
  0xd1   :  { %675 = vadd.xlane.f32.xlu1 %v674_v56 }
  0xd2   :  { %672 = vadd.xlane.f32.xlu0 %v671_v61  ;;  %v7788_v5 = vpop.xlane.xlu1 %465  ;;  %v698_v61 = vsel %vm364_vm0, %v307_v45, 0.0  ;;  %v312_v45 = vmul.f32 %v7191_v1, %v137_v25 }
  0xd3   :  { %v7790_v8 = vpop.xlane.xlu0 %462 }
  0xd4   :  { %v713_v63 = vsel %vm364_vm0, %v312_v45, 0.0  ;;  %v143_v45 = vld [vmem:[%s11473_s1 + $0x3d0] sm:$0xff] }
  0xd5   :  { %681 = vadd.xlane.f32.xlu1 %v680_v9  ;;  %v135_v9 = vld [vmem:[%s11473_s1 + $0x390] sm:$0xff] }
  0xd6   :  { %678 = vadd.xlane.f32.xlu0 %v677_v10  ;;  %v7802_v21 = vpop.xlane.xlu1 %471 }
  0xd7   :  { %v7804_v22 = vpop.xlane.xlu0 %468 }
  0xd9   :  { %687 = vadd.xlane.f32.xlu1 %v686_v23  ;;  %v310_v23 = vmul.f32 %v7191_v1, %v135_v9  ;;  %v314_v9 = vmul.f32 %v7883_v0, %v139_v52 }
  0xda   :  { %684 = vadd.xlane.f32.xlu0 %v683_v24  ;;  %v7816_v33 = vpop.xlane.xlu1 %477  ;;  %v138_v24 = vld [vmem:[%s11473_s1 + $0x3a8] sm:$0xff] }
  0xdb   :  { %v7818_v36 = vpop.xlane.xlu0 %474  ;;  %v719_v25 = vsel %vm364_vm0, %v314_v9, 0.0  ;;  %v318_v9 = vmul.f32 %v7883_v0, %v143_v45 }
  0xdd   :  { %693 = vadd.xlane.f32.xlu1 %v692_v39  ;;  %v707_v39 = vsel %vm364_vm0, %v310_v23, 0.0 }
  0xde   :  { %690 = vadd.xlane.f32.xlu0 %v689_v44  ;;  %v7830_v53 = vpop.xlane.xlu1 %483  ;;  %v313_v44 = vmul.f32 %v7191_v1, %v138_v24  ;;  %v722_v24 = vsel %vm364_vm0, %v315_v2, 0.0 }
  0xdf   :  { %v7832_v56 = vpop.xlane.xlu0 %480 }
  0xe0   :  { %v716_v1 = vsel %vm364_vm0, %v313_v44, 0.0  ;;  %v144_v44 = vld [vmem:[%s11473_s1 + $0x3d8] sm:$0xff] }
  0xe1   :  { %699 = vadd.xlane.f32.xlu1 %v698_v61  ;;  %v319_v2 = vmul.f32 %v7883_v0, %v144_v44 }
  0xe2   :  { %696 = vadd.xlane.f32.xlu0 %v695_v62  ;;  %v7844_v10 = vpop.xlane.xlu1 %489 }
  0xe3   :  { %v7846_v13 = vpop.xlane.xlu0 %486 }
  0xe5   :  { %705 = vadd.xlane.f32.xlu1 %v704_v14  ;;  %v142_v14 = vld [vmem:[%s11473_s1 + $0x3c8] sm:$0xff] }
  0xe6   :  { %702 = vadd.xlane.f32.xlu0 %v701_v15  ;;  %v7858_v30 = vpop.xlane.xlu1 %495  ;;  %v141_v15 = vld [vmem:[%s11473_s1 + $0x3c0] sm:$0xff] }
  0xe7   :  { %v7860_v31 = vpop.xlane.xlu0 %492 }
  0xe9   :  { %711 = vadd.xlane.f32.xlu1 %v710_v32  ;;  %v317_v32 = vmul.f32 %v7883_v0, %v142_v14  ;;  %v146_v14 = vld [vmem:[%s11473_s1 + $0x3e8] sm:$0xff] }
  0xea   :  { %708 = vadd.xlane.f32.xlu0 %v707_v39  ;;  %v7874_v61 = vpop.xlane.xlu1 %501  ;;  %v316_v39 = vmul.f32 %v7883_v0, %v141_v15  ;;  %v145_v15 = vld [vmem:[%s11473_s1 + $0x3e0] sm:$0xff]  ;;  %v321_v44 = vmul.f32 %v7883_v0, %v146_v14  ;;  %v323_v14 = vmul.f32 %v7883_v0, %v148_v46 }
  0xeb   :  { %v7876_v62 = vpop.xlane.xlu0 %498  ;;  %v320_v45 = vmul.f32 %v7883_v0, %v145_v15 }
  0xec   :  { %11480 = vst [vmem:[#allocation2_spill] sm:$0xff] %v7876_v62 }
  0xed   :  { %717 = vadd.xlane.f32.xlu1 %v716_v1  ;;  %v728_v1 = vsel %vm364_vm0, %v317_v32, 0.0  ;;  %v734_v32 = vsel %vm364_vm0, %v319_v2, 0.0  ;;  %v740_v2 = vsel %vm364_vm0, %v321_v44, 0.0  ;;  %v746_v44 = vsel %vm364_vm0, %v323_v14, 0.0 }
  0xee   :  { %714 = vadd.xlane.f32.xlu0 %v713_v63  ;;  %v7893_v18 = vpop.xlane.xlu1 %507  ;;  %v725_v63 = vsel %vm364_vm0, %v316_v39, 0.0  ;;  %v731_v39 = vsel %vm364_vm0, %v318_v9, 0.0  ;;  %v737_v9 = vsel %vm364_vm0, %v320_v45, 0.0 }
  0xef   :  { %11481 = vst [vmem:[#allocation3_spill] sm:$0xff] %v7893_v18  ;;  %v7895_v23 = vpop.xlane.xlu0 %504 }
  0xf0   :  { %11482 = vst [vmem:[#allocation4_spill] sm:$0xff] %v7895_v23 }
  0xf1   :  { %723 = vadd.xlane.f32.xlu1 %v722_v24 }
  0xf2   :  { %720 = vadd.xlane.f32.xlu0 %v719_v25  ;;  %v7907_v49 = vpop.xlane.xlu1 %513 }
  0xf3   :  { %11483 = vst [vmem:[#allocation5_spill] sm:$0xff] %v7907_v49  ;;  %v7909_v52 = vpop.xlane.xlu0 %510 }
  0xf4   :  { %11484 = vst [vmem:[#allocation6_spill] sm:$0xff] %v7909_v52 }
  0xf5   :  { %729 = vadd.xlane.f32.xlu1 %v728_v1  ;;  %v147_v1 = vld [vmem:[%s11473_s1 + $0x3f0] sm:$0xff] }
  0xf6   :  { %726 = vadd.xlane.f32.xlu0 %v725_v63  ;;  %v7921_v24 = vpop.xlane.xlu1 %519  ;;  %v322_v15 = vmul.f32 %v7883_v0, %v147_v1 }
  0xf7   :  { %11485 = vst [vmem:[#allocation7_spill] sm:$0xff] %v7921_v24  ;;  %v7923_v25 = vpop.xlane.xlu0 %516  ;;  %v150_v24 = vld [vmem:[%s11473_s1 + $0x408] sm:$0xff] }
  0xf8   :  { %11486 = vst [vmem:[#allocation8_spill] sm:$0xff] %v7923_v25  ;;  %v743_v46 = vsel %vm364_vm0, %v322_v15, 0.0  ;;  %v325_v45 = vmul.f32 %v7883_v0, %v150_v24 }
  0xf9   :  { %735 = vadd.xlane.f32.xlu1 %v734_v32  ;;  %v149_v32 = vld [vmem:[%s11473_s1 + $0x400] sm:$0xff] }
  0xfa   :  { %732 = vadd.xlane.f32.xlu0 %v731_v39  ;;  %v7935_v63 = vpop.xlane.xlu1 %525  ;;  %v324_v1 = vmul.f32 %v7883_v0, %v149_v32  ;;  %v752_v14 = vsel %vm364_vm0, %v325_v45, 0.0 }
  0xfb   :  { %11487 = vst [vmem:[#allocation9_spill] sm:$0xff] %v7935_v63  ;;  %v7937_v25 = vpop.xlane.xlu0 %522  ;;  %v152_v63 = vld [vmem:[%s11473_s1 + $0x418] sm:$0xff] }
  0xfc   :  { %11488 = vst [vmem:[#allocation10_spill] sm:$0xff] %v7937_v25  ;;  %v749_v24 = vsel %vm364_vm0, %v324_v1, 0.0  ;;  %v327_v15 = vmul.f32 %v7883_v0, %v152_v63 }
  0xfd   :  { %741 = vadd.xlane.f32.xlu1 %v740_v2  ;;  %v151_v2 = vld [vmem:[%s11473_s1 + $0x410] sm:$0xff] }
  0xfe   :  { %738 = vadd.xlane.f32.xlu0 %v737_v9  ;;  %v7949_v39 = vpop.xlane.xlu1 %531  ;;  %v326_v32 = vmul.f32 %v7883_v0, %v151_v2  ;;  %v758_v45 = vsel %vm364_vm0, %v327_v15, 0.0 }
  0xff   :  { %11489 = vst [vmem:[#allocation11_spill] sm:$0xff] %v7949_v39  ;;  %v7951_v25 = vpop.xlane.xlu0 %528  ;;  %v154_v39 = vld [vmem:[%s11473_s1 + $0x428] sm:$0xff] }
 0x100   :  { %11490 = vst [vmem:[#allocation12_spill] sm:$0xff] %v7951_v25  ;;  %v755_v63 = vsel %vm364_vm0, %v326_v32, 0.0  ;;  %v329_v1 = vmul.f32 %v7883_v0, %v154_v39 }
 0x101   :  { %747 = vadd.xlane.f32.xlu1 %v746_v44  ;;  %v153_v44 = vld [vmem:[%s11473_s1 + $0x420] sm:$0xff] }
 0x102   :  { %744 = vadd.xlane.f32.xlu0 %v743_v46  ;;  %v7963_v9 = vpop.xlane.xlu1 %537  ;;  %v328_v2 = vmul.f32 %v7883_v0, %v153_v44  ;;  %v764_v15 = vsel %vm364_vm0, %v329_v1, 0.0 }
 0x103   :  { %11491 = vst [vmem:[#allocation13_spill] sm:$0xff] %v7963_v9  ;;  %v7965_v25 = vpop.xlane.xlu0 %534  ;;  %v156_v9 = vld [vmem:[%s11473_s1 + $0x438] sm:$0xff] }
 0x104   :  { %11492 = vst [vmem:[#allocation14_spill] sm:$0xff] %v7965_v25  ;;  %v761_v39 = vsel %vm364_vm0, %v328_v2, 0.0  ;;  %v331_v32 = vmul.f32 %v7883_v0, %v156_v9 }
 0x105   :  { %753 = vadd.xlane.f32.xlu1 %v752_v14  ;;  %v155_v14 = vld [vmem:[%s11473_s1 + $0x430] sm:$0xff] }
 0x106   :  { %750 = vadd.xlane.f32.xlu0 %v749_v24  ;;  %v7977_v46 = vpop.xlane.xlu1 %543  ;;  %v330_v44 = vmul.f32 %v7883_v0, %v155_v14  ;;  %v770_v1 = vsel %vm364_vm0, %v331_v32, 0.0 }
 0x107   :  { %11493 = vst [vmem:[#allocation15_spill] sm:$0xff] %v7977_v46  ;;  %v7979_v25 = vpop.xlane.xlu0 %540  ;;  %v158_v46 = vld [vmem:[%s11473_s1 + $0x448] sm:$0xff] }
 0x108   :  { %11494 = vst [vmem:[#allocation16_spill] sm:$0xff] %v7979_v25  ;;  %v767_v9 = vsel %vm364_vm0, %v330_v44, 0.0  ;;  %v333_v2 = vmul.f32 %v7883_v0, %v158_v46 }
 0x109   :  { %759 = vadd.xlane.f32.xlu1 %v758_v45  ;;  %v157_v45 = vld [vmem:[%s11473_s1 + $0x440] sm:$0xff] }
 0x10a   :  { %756 = vadd.xlane.f32.xlu0 %v755_v63  ;;  %v7991_v24 = vpop.xlane.xlu1 %549  ;;  %v332_v14 = vmul.f32 %v7883_v0, %v157_v45  ;;  %v776_v32 = vsel %vm364_vm0, %v333_v2, 0.0 }
 0x10b   :  { %11495 = vst [vmem:[#allocation17_spill] sm:$0xff] %v7991_v24  ;;  %v7993_v25 = vpop.xlane.xlu0 %546  ;;  %v160_v24 = vld [vmem:[%s11473_s1 + $0x458] sm:$0xff] }
 0x10c   :  { %11496 = vst [vmem:[#allocation18_spill] sm:$0xff] %v7993_v25  ;;  %v773_v46 = vsel %vm364_vm0, %v332_v14, 0.0  ;;  %v335_v44 = vmul.f32 %v7883_v0, %v160_v24 }
 0x10d   :  { %765 = vadd.xlane.f32.xlu1 %v764_v15  ;;  %v159_v15 = vld [vmem:[%s11473_s1 + $0x450] sm:$0xff] }
 0x10e   :  { %762 = vadd.xlane.f32.xlu0 %v761_v39  ;;  %v8005_v63 = vpop.xlane.xlu1 %555  ;;  %v334_v45 = vmul.f32 %v7883_v0, %v159_v15  ;;  %v782_v2 = vsel %vm364_vm0, %v335_v44, 0.0 }
 0x10f   :  { %11497 = vst [vmem:[#allocation19_spill] sm:$0xff] %v8005_v63  ;;  %v8007_v25 = vpop.xlane.xlu0 %552  ;;  %v162_v63 = vld [vmem:[%s11473_s1 + $0x468] sm:$0xff] }
 0x110   :  { %11498 = vst [vmem:[#allocation20_spill] sm:$0xff] %v8007_v25  ;;  %v779_v24 = vsel %vm364_vm0, %v334_v45, 0.0  ;;  %v337_v14 = vmul.f32 %v7883_v0, %v162_v63 }
 0x111   :  { %771 = vadd.xlane.f32.xlu1 %v770_v1  ;;  %v161_v1 = vld [vmem:[%s11473_s1 + $0x460] sm:$0xff] }
 0x112   :  { %768 = vadd.xlane.f32.xlu0 %v767_v9  ;;  %v8019_v39 = vpop.xlane.xlu1 %561  ;;  %v336_v15 = vmul.f32 %v7883_v0, %v161_v1  ;;  %v788_v44 = vsel %vm364_vm0, %v337_v14, 0.0 }
 0x113   :  { %11499 = vst [vmem:[#allocation21_spill] sm:$0xff] %v8019_v39  ;;  %v8021_v25 = vpop.xlane.xlu0 %558  ;;  %v164_v39 = vld [vmem:[%s11473_s1 + $0x478] sm:$0xff] }
 0x114   :  { %11500 = vst [vmem:[#allocation22_spill] sm:$0xff] %v8021_v25  ;;  %v785_v63 = vsel %vm364_vm0, %v336_v15, 0.0  ;;  %v339_v45 = vmul.f32 %v7883_v0, %v164_v39 }
 0x115   :  { %777 = vadd.xlane.f32.xlu1 %v776_v32  ;;  %v163_v32 = vld [vmem:[%s11473_s1 + $0x470] sm:$0xff] }
 0x116   :  { %774 = vadd.xlane.f32.xlu0 %v773_v46  ;;  %v8033_v9 = vpop.xlane.xlu1 %567  ;;  %v338_v1 = vmul.f32 %v7883_v0, %v163_v32  ;;  %v794_v14 = vsel %vm364_vm0, %v339_v45, 0.0 }
 0x117   :  { %11501 = vst [vmem:[#allocation23_spill] sm:$0xff] %v8033_v9  ;;  %v8035_v25 = vpop.xlane.xlu0 %564  ;;  %v166_v9 = vld [vmem:[%s11473_s1 + $0x488] sm:$0xff] }
 0x118   :  { %11502 = vst [vmem:[#allocation24_spill] sm:$0xff] %v8035_v25  ;;  %v791_v39 = vsel %vm364_vm0, %v338_v1, 0.0  ;;  %v341_v15 = vmul.f32 %v7883_v0, %v166_v9  ;;  %v869_v9 = vld [vmem:[%s11474_s2] sm:$0xff] }
 0x119   :  { %783 = vadd.xlane.f32.xlu1 %v782_v2  ;;  %v165_v2 = vld [vmem:[%s11473_s1 + $0x480] sm:$0xff] }
 0x11a   :  { %780 = vadd.xlane.f32.xlu0 %v779_v24  ;;  %v8047_v46 = vpop.xlane.xlu1 %573  ;;  %v340_v32 = vmul.f32 %v7883_v0, %v165_v2  ;;  %v800_v2 = vsel %vm364_vm0, %v341_v15, 0.0 }
 0x11b   :  { %11503 = vst [vmem:[#allocation25_spill] sm:$0xff] %v8047_v46  ;;  %v8049_v25 = vpop.xlane.xlu0 %570  ;;  %v168_v46 = vld [vmem:[%s11473_s1 + $0x498] sm:$0xff] }
 0x11c   :  { %11504 = vst [vmem:[#allocation26_spill] sm:$0xff] %v8049_v25 }
 0x11d   :  { %789 = vadd.xlane.f32.xlu1 %v788_v44  ;;  %v167_v44 = vld [vmem:[%s11473_s1 + $0x490] sm:$0xff] }
 0x11e   :  { %786 = vadd.xlane.f32.xlu0 %v785_v63  ;;  %v8061_v24 = vpop.xlane.xlu1 %579  ;;  %v871_v63 = vld [vmem:[%s11474_s2 + $0x10] sm:$0xff]  ;;  %v342_v52 = vmul.f32 %v7883_v0, %v167_v44 }
 0x11f   :  { %11505 = vst [vmem:[#allocation27_spill] sm:$0xff] %v8061_v24  ;;  %v8063_v25 = vpop.xlane.xlu0 %576  ;;  %v343_v24 = vmul.f32 %v7883_v0, %v168_v46  ;;  %v872_v46 = vld [vmem:[%s11474_s2 + $0x18] sm:$0xff] }
 0x120   :  { %11506 = vst [vmem:[#allocation28_spill] sm:$0xff] %v8063_v25  ;;  %v797_v25 = vsel %vm364_vm0, %v340_v32, 0.0  ;;  %v803_v49 = vsel %vm364_vm0, %v342_v52, 0.0  ;;  %v870_v52 = vld [vmem:[%s11474_s2 + $0x8] sm:$0xff] }
 0x121   :  { %795 = vadd.xlane.f32.xlu1 %v794_v14  ;;  %v170_v14 = vld [vmem:[%s11473_s1 + $0x4a8] sm:$0xff]  ;;  %v806_v44 = vsel %vm364_vm0, %v343_v24, 0.0 }
 0x122   :  { %792 = vadd.xlane.f32.xlu0 %v791_v39  ;;  %v8081_v45 = vpop.xlane.xlu1 %585  ;;  %v169_v39 = vld [vmem:[%s11473_s1 + $0x4a0] sm:$0xff]  ;;  %v345_v23 = vmul.f32 %v7883_v0, %v170_v14 }
 0x123   :  { %11507 = vst [vmem:[#allocation29_spill] sm:$0xff] %v8081_v45  ;;  %v8083_v1 = vpop.xlane.xlu0 %582  ;;  %v1039_v45 = vadd.f32 %v871_v63, %v7564_v34  ;;  %v344_v34 = vmul.f32 %v7883_v0, %v169_v39 }
 0x124   :  { %11508 = vst [vmem:[#allocation30_spill] sm:$0xff] %v8083_v1  ;;  %v1037_v1 = vadd.f32 %v869_v9, %v7566_v35  ;;  %v172_v35 = vld [vmem:[%s11473_s1 + $0x4b8] sm:$0xff]  ;;  %v812_v39 = vsel %vm364_vm0, %v345_v23, 0.0 }
 0x125   :  { %801 = vadd.xlane.f32.xlu1 %v800_v2  ;;  %v1207_v63 = vsub.f32 0.0, %v1039_v45  ;;  %v1040_v2 = vadd.f32 %v872_v46, %v7578_v42  ;;  %v174_v42 = vld [vmem:[%s11473_s1 + $0x4c8] sm:$0xff] }
 0x126   :  { %798 = vadd.xlane.f32.xlu0 %v797_v25  ;;  %v8100_v15 = vpop.xlane.xlu1 %591  ;;  %v171_v25 = vld [vmem:[%s11473_s1 + $0x4b0] sm:$0xff]  ;;  %v1205_v9 = vsub.f32 0.0, %v1037_v1  ;;  %v874_v46 = vld [vmem:[%s11474_s2 + $0x28] sm:$0xff] }
 0x127   :  { %11509 = vst [vmem:[#allocation31_spill] sm:$0xff] %v8100_v15  ;;  %v8102_v32 = vpop.xlane.xlu0 %588  ;;  %v347_v15 = vmul.f32 %v7883_v0, %v172_v35  ;;  %v346_v45 = vmul.f32 %v7883_v0, %v171_v25  ;;  %v1377_v1 = vmul.f32 1.442695, %v1207_v63  ;;  %v873_v35 = vld [vmem:[%s11474_s2 + $0x20] sm:$0xff]  ;;  %v876_v25 = vld [vmem:[%s11474_s2 + $0x38] sm:$0xff] }
 0x128   :  { %11510 = vst [vmem:[#allocation32_spill] sm:$0xff] %v8102_v32  ;;  %v809_v32 = vsel %vm364_vm0, %v344_v34, 0.0  ;;  %v1373_v23 = vmul.f32 1.442695, %v1205_v9  ;;  %v1038_v34 = vadd.f32 %v870_v52, %v7580_v43  ;;  %v349_v43 = vmul.f32 %v7883_v0, %v174_v42 }
 0x129   :  { %807 = vadd.xlane.f32.xlu1 %v806_v44  ;;  %v1208_v44 = vsub.f32 0.0, %v1040_v2  ;;  %v815_v9 = vsel %vm364_vm0, %v346_v45, 0.0  ;;  %v1042_v52 = vadd.f32 %v874_v46, %v7592_v50  ;;  %6481 = vpow2.f32 %v1377_v1 }
 0x12a   :  { %804 = vadd.xlane.f32.xlu0 %v803_v49  ;;  %v8118_v24 = vpop.xlane.xlu1 %597  ;;  %v173_v49 = vld [vmem:[%s11473_s1 + $0x4c0] sm:$0xff]  ;;  %6483 = vpow2.f32 %v1373_v23  ;;  %v1206_v42 = vsub.f32 0.0, %v1038_v34  ;;  %v1044_v50 = vadd.f32 %v876_v25, %v7606_v58 }
 0x12b   :  { %11511 = vst [vmem:[#allocation33_spill] sm:$0xff] %v8118_v24  ;;  %v8120_v14 = vpop.xlane.xlu0 %594  ;;  %v818_v24 = vsel %vm364_vm0, %v347_v15, 0.0  ;;  %v348_v2 = vmul.f32 %v7883_v0, %v173_v49  ;;  %v875_v15 = vld [vmem:[%s11474_s2 + $0x30] sm:$0xff]  ;;  %v1379_v45 = vmul.f32 1.442695, %v1208_v44  ;;  %v878_v49 = vld [vmem:[%s11474_s2 + $0x48] sm:$0xff] }
 0x12c   :  { %11512 = vst [vmem:[#allocation34_spill] sm:$0xff] %v8120_v14  ;;  %v1210_v34 = vsub.f32 0.0, %v1042_v52  ;;  %v1043_v58 = vadd.f32 %v875_v15, %v7608_v59  ;;  %v177_v25 = vld [vmem:[%s11473_s1 + $0x4e0] sm:$0xff]  ;;  %v880_v59 = vld [vmem:[%s11474_s2 + $0x58] sm:$0xff] }
 0x12d   :  { %813 = vadd.xlane.f32.xlu1 %v812_v39  ;;  %v175_v39 = vld [vmem:[%s11473_s1 + $0x4d0] sm:$0xff]  ;;  %6485 = vpow2.f32 %v1379_v45  ;;  %v877_v52 = vld [vmem:[%s11474_s2 + $0x40] sm:$0xff]  ;;  %v352_v45 = vmul.f32 %v7883_v0, %v177_v25  ;;  %v882_v25 = vld [vmem:[%s11474_s2 + $0x68] sm:$0xff] }
 0x12e   :  { %810 = vadd.xlane.f32.xlu0 %v809_v32  ;;  %v8142_v14 = vpop.xlane.xlu1 %603  ;;  %v176_v32 = vld [vmem:[%s11473_s1 + $0x4d8] sm:$0xff]  ;;  %v350_v44 = vmul.f32 %v7883_v0, %v175_v39 }
 0x12f   :  { %11513 = vst [vmem:[#allocation35_spill] sm:$0xff] %v8142_v14  ;;  %v8144_v63 = vpop.xlane.xlu0 %600  ;;  %v351_v23 = vmul.f32 %v7883_v0, %v176_v32 }
 0x130   :  { %11514 = vst [vmem:[#allocation36_spill] sm:$0xff] %v8144_v63  ;;  %v1041_v63 = vadd.f32 %v873_v35, %v7594_v51  ;;  %v824_v51 = vsel %vm364_vm0, %v349_v43, 0.0  ;;  %v821_v35 = vsel %vm364_vm0, %v348_v2, 0.0  ;;  %v1046_v43 = vadd.f32 %v878_v49, %v7620_v3  ;;  %v180_v49 = vld [vmem:[%s11473_s1 + $0x4f8] sm:$0xff] }
 0x131   :  { %819 = vadd.xlane.f32.xlu1 %v818_v24  ;;  %v178_v24 = vld [vmem:[%s11473_s1 + $0x4e8] sm:$0xff]  ;;  %v1375_v2 = vmul.f32 1.442695, %v1206_v42  ;;  %v827_v3 = vsel %vm364_vm0, %v350_v44, 0.0  ;;  %v1383_v42 = vmul.f32 1.442695, %v1210_v34 }
 0x132   :  { %816 = vadd.xlane.f32.xlu0 %v815_v9  ;;  %v8165_v46 = vpop.xlane.xlu1 %609  ;;  %v1209_v9 = vsub.f32 0.0, %v1041_v63  ;;  %v830_v63 = vsel %vm364_vm0, %v351_v23, 0.0  ;;  %v353_v15 = vmul.f32 %v7883_v0, %v178_v24  ;;  %v1045_v23 = vadd.f32 %v877_v52, %v7622_v4  ;;  %v879_v34 = vld [vmem:[%s11474_s2 + $0x50] sm:$0xff] }
 0x133   :  { %11515 = vst [vmem:[#allocation37_spill] sm:$0xff] %v8165_v46  ;;  %v8167_v1 = vpop.xlane.xlu0 %606  ;;  %6487 = vpow2.f32 %v1375_v2  ;;  %v1048_v24 = vadd.f32 %v880_v59, %v7634_v11  ;;  %v355_v11 = vmul.f32 %v7883_v0, %v180_v49  ;;  %v182_v59 = vld [vmem:[%s11473_s1 + $0x508] sm:$0xff] }
 0x134   :  { %11516 = vst [vmem:[#allocation38_spill] sm:$0xff] %v8167_v1  ;;  %v1212_v1 = vsub.f32 0.0, %v1044_v50  ;;  %v1211_v50 = vsub.f32 0.0, %v1043_v58  ;;  %v6482_v58 = vpop.eup %6481  ;;  %v836_v4 = vsel %vm364_vm0, %v353_v15, 0.0  ;;  %6489 = vpow2.f32 %v1383_v42  ;;  %v881_v42 = vld [vmem:[%s11474_s2 + $0x60] sm:$0xff] }
 0x135   :  { %825 = vadd.xlane.f32.xlu1 %v824_v51  ;;  %v179_v51 = vld [vmem:[%s11473_s1 + $0x4f0] sm:$0xff]  ;;  %v6484_v2 = vpop.eup %6483  ;;  %v1213_v15 = vsub.f32 0.0, %v1045_v23  ;;  %v1216_v49 = vsub.f32 0.0, %v1048_v24  ;;  %v184_v24 = vld [vmem:[%s11473_s1 + $0x518] sm:$0xff] }
 0x136   :  { %822 = vadd.xlane.f32.xlu0 %v821_v35  ;;  %v8187_v32 = vpop.xlane.xlu1 %615  ;;  %v1381_v35 = vmul.f32 1.442695, %v1209_v9  ;;  %v1387_v44 = vmul.f32 1.442695, %v1212_v1  ;;  %v833_v1 = vsel %vm364_vm0, %v352_v45, 0.0  ;;  %v1047_v45 = vadd.f32 %v879_v34, %v7636_v12  ;;  %v183_v34 = vld [vmem:[%s11473_s1 + $0x510] sm:$0xff] }
 0x137   :  { %11517 = vst [vmem:[#allocation39_spill] sm:$0xff] %v8187_v32  ;;  %v8189_v39 = vpop.xlane.xlu0 %612  ;;  %v1385_v52 = vmul.f32 1.442695, %v1211_v50  ;;  %v357_v12 = vmul.f32 %v7883_v0, %v182_v59 }
 0x138   :  { %11518 = vst [vmem:[#allocation40_spill] sm:$0xff] %v8189_v39  ;;  %v1214_v39 = vsub.f32 0.0, %v1046_v43  ;;  %v354_v43 = vmul.f32 %v7883_v0, %v179_v51  ;;  %6491 = vpow2.f32 %v1381_v35  ;;  %v1050_v51 = vadd.f32 %v882_v25, %v7648_v19 }
 0x139   :  { %831 = vadd.xlane.f32.xlu1 %v830_v63  ;;  %v181_v63 = vld [vmem:[%s11473_s1 + $0x500] sm:$0xff]  ;;  %6493 = vpow2.f32 %v1387_v44  ;;  %v6486_v44 = vpop.eup %6485  ;;  %v1709_v19 = vadd.f32 1.0, %v6484_v2  ;;  %v1215_v25 = vsub.f32 0.0, %v1047_v45  ;;  %v848_v59 = vsel %vm364_vm0, %v357_v12, 0.0  ;;  %v186_v45 = vld [vmem:[%s11473_s1 + $0x528] sm:$0xff] }
 0x13a   :  { %828 = vadd.xlane.f32.xlu0 %v827_v3  ;;  %v8209_v32 = vpop.xlane.xlu1 %621  ;;  %v1391_v3 = vmul.f32 1.442695, %v1214_v39  ;;  %v842_v39 = vsel %vm364_vm0, %v355_v11, 0.0  ;;  %v839_v35 = vsel %vm364_vm0, %v354_v43, 0.0  ;;  %v356_v23 = vmul.f32 %v7883_v0, %v181_v63  ;;  %v884_v43 = vld [vmem:[%s11474_s2 + $0x78] sm:$0xff] }
 0x13b   :  { %11519 = vst [vmem:[#allocation41_spill] sm:$0xff] %v8209_v32  ;;  %v8211_v9 = vpop.xlane.xlu0 %618  ;;  %6495 = vpow2.f32 %v1385_v52  ;;  %v1049_v11 = vadd.f32 %v881_v42, %v7650_v20  ;;  %v1712_v20 = vadd.f32 1.0, %v6486_v44  ;;  %v883_v42 = vld [vmem:[%s11474_s2 + $0x70] sm:$0xff] }
 0x13c   :  { %11520 = vst [vmem:[#allocation42_spill] sm:$0xff] %v8211_v9  ;;  %v1711_v9 = vadd.f32 1.0, %v6482_v58  ;;  %6497 = vpow2.f32 %v1391_v3  ;;  %v1389_v58 = vmul.f32 1.442695, %v1213_v15  ;;  %v845_v63 = vsel %vm364_vm0, %v356_v23, 0.0 }
 0x13d   :  { %837 = vadd.xlane.f32.xlu1 %v836_v4  ;;  %v1395_v4 = vmul.f32 1.442695, %v1216_v49  ;;  %v358_v3 = vmul.f32 %v7883_v0, %v183_v34  ;;  %v6488_v15 = vpop.eup %6487  ;;  %v185_v49 = vld [vmem:[%s11473_s1 + $0x520] sm:$0xff]  ;;  %v1217_v12 = vsub.f32 0.0, %v1049_v11  ;;  %v1052_v23 = vadd.f32 %v884_v43, %v7662_v27  ;;  %v188_v11 = vld [vmem:[%s11473_s1 + $0x538] sm:$0xff]  ;;  %v187_v43 = vld [vmem:[%s11473_s1 + $0x530] sm:$0xff] }
 0x13e   :  { %834 = vadd.xlane.f32.xlu0 %v833_v1  ;;  %v8228_v50 = vpop.xlane.xlu1 %627  ;;  %6499 = vrcp.f32 %v1711_v9  ;;  %v1218_v1 = vsub.f32 0.0, %v1050_v51  ;;  %v359_v9 = vmul.f32 %v7883_v0, %v184_v24  ;;  %v1393_v51 = vmul.f32 1.442695, %v1215_v25 }
 0x13f   :  { %11521 = vst [vmem:[#allocation43_spill] sm:$0xff] %v8228_v50  ;;  %v8230_v32 = vpop.xlane.xlu0 %624  ;;  %6501 = vrcp.f32 %v1709_v19  ;;  %v361_v25 = vmul.f32 %v7883_v0, %v186_v45  ;;  %v1051_v27 = vadd.f32 %v883_v42, %v7664_v28  ;;  %v885_v28 = vld [vmem:[%s11474_s2 + $0x80] sm:$0xff] }
 0x140   :  { %11522 = vst [vmem:[#allocation44_spill] sm:$0xff] %v8230_v32  ;;  %6503 = vpow2.f32 %v1389_v58  ;;  %v854_v34 = vsel %vm364_vm0, %v359_v9, 0.0  ;;  %v851_v58 = vsel %vm364_vm0, %v358_v3, 0.0  ;;  %v891_v32 = vld [vmem:[%s11474_s2 + $0xb0] sm:$0xff] }
 0x141   :  { %843 = vadd.xlane.f32.xlu1 %v842_v39  ;;  %v6490_v39 = vpop.eup %6489  ;;  %6505 = vpow2.f32 %v1395_v4 }
 0x142   :  { %840 = vadd.xlane.f32.xlu0 %v839_v35  ;;  %v8246_v2 = vpop.xlane.xlu1 %633  ;;  %v1399_v35 = vmul.f32 1.442695, %v1218_v1  ;;  %v6492_v44 = vpop.eup %6491  ;;  %6507 = vrcp.f32 %v1712_v20  ;;  %v1710_v1 = vadd.f32 1.0, %v6488_v15  ;;  %v1397_v15 = vmul.f32 1.442695, %v1217_v12 }
 0x143   :  { %11523 = vst [vmem:[#allocation45_spill] sm:$0xff] %v8246_v2  ;;  %v8248_v52 = vpop.xlane.xlu0 %630  ;;  %v6494_v4 = vpop.eup %6493  ;;  %6509 = vpow2.f32 %v1393_v51  ;;  %v1713_v3 = vadd.f32 1.0, %v6492_v44  ;;  %v1220_v20 = vsub.f32 0.0, %v1052_v23  ;;  %v860_v51 = vsel %vm364_vm0, %v361_v25, 0.0 }
 0x144   :  { %11524 = vst [vmem:[#allocation46_spill] sm:$0xff] %v8248_v52  ;;  %v360_v52 = vmul.f32 %v7883_v0, %v185_v49  ;;  %6511 = vpow2.f32 %v1399_v35  ;;  %v363_v44 = vmul.f32 %v7883_v0, %v188_v11  ;;  %v362_v35 = vmul.f32 %v7883_v0, %v187_v43 }
 0x145   :  { %849 = vadd.xlane.f32.xlu1 %v848_v59  ;;  %v1714_v59 = vadd.f32 1.0, %v6490_v39  ;;  %v6496_v9 = vpop.eup %6495  ;;  %6513 = vrcp.f32 %v1710_v1  ;;  %v1716_v23 = vadd.f32 1.0, %v6494_v4  ;;  %v1403_v4 = vmul.f32 1.442695, %v1220_v20 }
 0x146   :  { %846 = vadd.xlane.f32.xlu0 %v845_v63  ;;  %v8264_v19 = vpop.xlane.xlu1 %639  ;;  %v886_v63 = vld [vmem:[%s11474_s2 + $0x88] sm:$0xff]  ;;  %v6498_v45 = vpop.eup %6497  ;;  %v857_v39 = vsel %vm364_vm0, %v360_v52, 0.0  ;;  %v888_v52 = vld [vmem:[%s11474_s2 + $0x98] sm:$0xff]  ;;  %v1059_v2 = vadd.f32 %v891_v32, %v7720_v7  ;;  %v893_v32 = vld [vmem:[%s11474_s2 + $0xc0] sm:$0xff] }
 0x147   :  { %11525 = vst [vmem:[#allocation47_spill] sm:$0xff] %v8264_v19  ;;  %v8266_v24 = vpop.xlane.xlu0 %636  ;;  %6515 = vrcp.f32 %v1714_v59  ;;  %v1718_v25 = vadd.f32 1.0, %v6498_v45 }
 0x148   :  { %11526 = vst [vmem:[#allocation48_spill] sm:$0xff] %v8266_v24  ;;  %v8293_v12 = vpop.eup %6499  ;;  %v1219_v24 = vsub.f32 0.0, %v1051_v27  ;;  %6517 = vpow2.f32 %v1397_v15  ;;  %v866_v27 = vsel %vm364_vm0, %v363_v44, 0.0 }
 0x149   :  { %855 = vadd.xlane.f32.xlu1 %v854_v34  ;;  %v1054_v34 = vadd.f32 %v886_v63, %v7676_v37  ;;  %6519 = vrcp.f32 %v1713_v3  ;;  %v966_v3 = vld [vmem:[%s11474_s2 + $0x308] sm:$0xff] }
 0x14a   :  { %852 = vadd.xlane.f32.xlu0 %v851_v58  ;;  %v8285_v49 = vpop.xlane.xlu1 %645  ;;  %v1715_v58 = vadd.f32 1.0, %v6496_v9  ;;  %6521 = vrcp.f32 %v1716_v23  ;;  %v1401_v43 = vmul.f32 1.442695, %v1219_v24  ;;  %v1056_v9 = vadd.f32 %v888_v52, %v7690_v47  ;;  %v965_v24 = vld [vmem:[%s11474_s2 + $0x300] sm:$0xff] }
 0x14b   :  { %11527 = vst [vmem:[#allocation49_spill] sm:$0xff] %v8285_v49  ;;  %v8287_v42 = vpop.xlane.xlu0 %642  ;;  %v1053_v49 = vadd.f32 %v885_v28, %v7678_v38  ;;  %v863_v38 = vsel %vm364_vm0, %v362_v35, 0.0  ;;  %v1222_v59 = vsub.f32 0.0, %v1054_v34  ;;  %v887_v28 = vld [vmem:[%s11474_s2 + $0x90] sm:$0xff]  ;;  %v889_v52 = vld [vmem:[%s11474_s2 + $0xa0] sm:$0xff] }
 0x14c   :  { %11528 = vst [vmem:[#allocation50_spill] sm:$0xff] %v8287_v42  ;;  %v8297_v42 = vpop.eup %6501  ;;  %6523 = vrcp.f32 %v1715_v58  ;;  %v1224_v58 = vsub.f32 0.0, %v1056_v9 }
 0x14d   :  { %861 = vadd.xlane.f32.xlu1 %v860_v51  ;;  %v6504_v0 = vpop.eup %6503  ;;  %v1221_v63 = vsub.f32 0.0, %v1053_v49  ;;  %6525 = vrcp.f32 %v1718_v25  ;;  %v890_v49 = vld [vmem:[%s11474_s2 + $0xa8] sm:$0xff]  ;;  %v1407_v35 = vmul.f32 1.442695, %v1222_v59  ;;  %v1055_v25 = vadd.f32 %v887_v28, %v7692_v48 }
 0x14e   :  { %858 = vadd.xlane.f32.xlu0 %v857_v39  ;;  %v8302_v1 = vpop.xlane.xlu1 %651  ;;  %v6506_v11 = vpop.eup %6505  ;;  %v1717_v20 = vadd.f32 1.0, %v6504_v0  ;;  %6527 = vpow2.f32 %v1403_v4 }
 0x14f   :  { %11529 = vst [vmem:[#allocation51_spill] sm:$0xff] %v8302_v1  ;;  %v8304_v37 = vpop.xlane.xlu0 %648  ;;  %v8312_v15 = vpop.eup %6507  ;;  %v1720_v47 = vadd.f32 1.0, %v6506_v11  ;;  %6529 = vpow2.f32 %v1401_v43  ;;  %v1405_v34 = vmul.f32 1.442695, %v1221_v63 }
 0x150   :  { %11530 = vst [vmem:[#allocation52_spill] sm:$0xff] %v8304_v37  ;;  %v6510_v45 = vpop.eup %6509  ;;  %6531 = vrcp.f32 %v1717_v20  ;;  %v1411_v20 = vmul.f32 1.442695, %v1224_v58 }
 0x151   :  { %867 = vadd.xlane.f32.xlu1 %v866_v27  ;;  %v6512_v44 = vpop.eup %6511  ;;  %v1719_v27 = vadd.f32 1.0, %v6510_v45  ;;  %6533 = vrcp.f32 %v1720_v47  ;;  %v1223_v45 = vsub.f32 0.0, %v1055_v25  ;;  %v967_v47 = vld [vmem:[%s11474_s2 + $0x310] sm:$0xff] }
 0x152   :  { %864 = vadd.xlane.f32.xlu0 %v863_v38  ;;  %v658_v51 = vpop.xlane.xlu1 %657  ;;  %v8327_v4 = vpop.eup %6513  ;;  %v1058_v38 = vadd.f32 %v890_v49, %v7704_v57  ;;  %v1722_v43 = vadd.f32 1.0, %v6512_v44  ;;  %6535 = vpow2.f32 %v1407_v35  ;;  %v970_v57 = vld [vmem:[%s11474_s2 + $0x328] sm:$0xff] }
 0x153   :  { %v655_v39 = vpop.xlane.xlu0 %654  ;;  %v1134_v23 = vadd.f32 %v966_v3, %v658_v51  ;;  %v8330_v37 = vpop.eup %6515  ;;  %v1057_v3 = vadd.f32 %v889_v52, %v7706_v60  ;;  %6537 = vpow2.f32 %v1405_v34  ;;  %v892_v60 = vld [vmem:[%s11474_s2 + $0xb8] sm:$0xff] }
 0x154   :  { %v1133_v0 = vadd.f32 %v965_v24, %v655_v39  ;;  %v6518_v48 = vpop.eup %6517  ;;  %6539 = vrcp.f32 %v1719_v27  ;;  %v1226_v51 = vsub.f32 0.0, %v1058_v38 }
 0x155   :  { %v1302_v11 = vsub.f32 0.0, %v1134_v23  ;;  %v8333_v24 = vpop.eup %6519  ;;  %6541 = vrcp.f32 %v1722_v43  ;;  %v1721_v35 = vadd.f32 1.0, %v6518_v48  ;;  %v968_v23 = vld [vmem:[%s11474_s2 + $0x318] sm:$0xff]  ;;  %v1225_v52 = vsub.f32 0.0, %v1057_v3 }
 0x156   :  { %v1301_v59 = vsub.f32 0.0, %v1133_v0  ;;  %v664_v63 = vpop.xlane.xlu1 %663  ;;  %v8341_v49 = vpop.eup %6521  ;;  %v972_v43 = vld [vmem:[%s11474_s2 + $0x338] sm:$0xff]  ;;  %v1415_v1 = vmul.f32 1.442695, %v1226_v51 }
 0x157   :  { %v661_v9 = vpop.xlane.xlu0 %660  ;;  %v1567_v28 = vmul.f32 1.442695, %v1302_v11  ;;  %v8346_v44 = vpop.eup %6523  ;;  %v1409_v11 = vmul.f32 1.442695, %v1223_v45  ;;  %v1136_v3 = vadd.f32 %v968_v23, %v664_v63  ;;  %v974_v63 = vld [vmem:[%s11474_s2 + $0x348] sm:$0xff] }
 0x158   :  { %v1565_v39 = vmul.f32 1.442695, %v1301_v59  ;;  %v8353_v25 = vpop.eup %6525  ;;  %v1135_v27 = vadd.f32 %v967_v47, %v661_v9  ;;  %v1060_v59 = vadd.f32 %v892_v60, %v7718_v6  ;;  %v1413_v6 = vmul.f32 1.442695, %v1225_v52 }
 0x159   :  { %6543 = vpow2.f32 %v1567_v28  ;;  %v6528_v38 = vpop.eup %6527  ;;  %v1304_v23 = vsub.f32 0.0, %v1136_v3 }
 0x15a   :  { %v670_v34 = vpop.xlane.xlu1 %669  ;;  %6545 = vpow2.f32 %v1411_v20  ;;  %v6530_v48 = vpop.eup %6529  ;;  %v1303_v47 = vsub.f32 0.0, %v1135_v27  ;;  %v1724_v51 = vadd.f32 1.0, %v6528_v38  ;;  %v1228_v19 = vsub.f32 0.0, %v1060_v59  ;;  %v894_v27 = vld [vmem:[%s11474_s2 + $0xc8] sm:$0xff] }
 0x15b   :  { %v8351_v58 = vpop.xlane.xlu0 %666  ;;  %v1138_v0 = vadd.f32 %v970_v57, %v670_v34  ;;  %6547 = vpow2.f32 %v1565_v39  ;;  %v8364_v20 = vpop.eup %6531 }
 0x15c   :  { %6549 = vrcp.f32 %v1721_v35  ;;  %v8366_v34 = vpop.eup %6533  ;;  %v1723_v35 = vadd.f32 1.0, %v6530_v48  ;;  %v1419_v3 = vmul.f32 1.442695, %v1228_v19 }
 0x15d   :  { %v1306_v28 = vsub.f32 0.0, %v1138_v0  ;;  %6551 = vpow2.f32 %v1409_v11  ;;  %v6536_v39 = vpop.eup %6535 }
 0x15e   :  { %v676_v9 = vpop.xlane.xlu1 %675  ;;  %6553 = vpow2.f32 %v1415_v1  ;;  %v6538_v52 = vpop.eup %6537  ;;  %v1569_v1 = vmul.f32 1.442695, %v1303_v47  ;;  %v1061_v47 = vadd.f32 %v893_v32, %v7734_v17  ;;  %v896_v17 = vld [vmem:[%s11474_s2 + $0xd8] sm:$0xff] }
 0x15f   :  { %v8362_v57 = vpop.xlane.xlu0 %672  ;;  %v1575_v45 = vmul.f32 1.442695, %v1306_v28  ;;  %v1140_v60 = vadd.f32 %v972_v43, %v676_v9  ;;  %v8378_v7 = vpop.eup %6539  ;;  %v1227_v28 = vsub.f32 0.0, %v1059_v2 }
 0x160   :  { %v8383_v48 = vpop.eup %6541 }
 0x161   :  { %v1308_v0 = vsub.f32 0.0, %v1140_v60  ;;  %6555 = vpow2.f32 %v1575_v45  ;;  %v1571_v45 = vmul.f32 1.442695, %v1304_v23 }
 0x162   :  { %v682_v38 = vpop.xlane.xlu1 %681  ;;  %2388 = vperm.xlu1 %6256, %v8327_v4   ;;  %6557 = vpow2.f32 %v1413_v6  ;;  %v969_v4 = vld [vmem:[%s11474_s2 + $0x320] sm:$0xff]  ;;  %v1062_v6 = vadd.f32 %v894_v27, %v7732_v16 }
 0x163   :  { %v8376_v11 = vpop.xlane.xlu0 %678  ;;  %v1579_v59 = vmul.f32 1.442695, %v1308_v0  ;;  %v1142_v43 = vadd.f32 %v974_v63, %v682_v38  ;;  %6559 = vrcp.f32 %v1724_v51  ;;  %v6544_v9 = vpop.eup %6543  ;;  %v1137_v2 = vadd.f32 %v969_v4, %v8351_v58 }
 0x164   :  { %6561 = vrcp.f32 %v1723_v35  ;;  %v6546_v50 = vpop.eup %6545  ;;  %v1806_v19 = vadd.f32 1.0, %v6544_v9  ;;  %v976_v35 = vld [vmem:[%s11474_s2 + $0x358] sm:$0xff]  ;;  %v1417_v38 = vmul.f32 1.442695, %v1227_v28  ;;  %v1230_v32 = vsub.f32 0.0, %v1062_v6 }
 0x165   :  { %v1310_v60 = vsub.f32 0.0, %v1142_v43  ;;  %6563 = vpow2.f32 %v1579_v59  ;;  %v6548_v51 = vpop.eup %6547  ;;  %v1726_v58 = vadd.f32 1.0, %v6536_v39  ;;  %v1229_v59 = vsub.f32 0.0, %v1061_v47  ;;  %v971_v39 = vld [vmem:[%s11474_s2 + $0x330] sm:$0xff] }
 0x166   :  { %v688_v63 = vpop.xlane.xlu1 %687  ;;  %6565 = vpow2.f32 %v1569_v1  ;;  %v8397_v16 = vpop.eup %6549  ;;  %v1805_v23 = vadd.f32 1.0, %v6548_v51  ;;  %v1305_v46 = vsub.f32 0.0, %v1137_v2  ;;  %v1423_v6 = vmul.f32 1.442695, %v1230_v32 }
 0x167   :  { %v8390_v0 = vpop.xlane.xlu0 %684  ;;  %6567 = vpow2.f32 %v1419_v3  ;;  %v1583_v27 = vmul.f32 1.442695, %v1310_v60  ;;  %v6552_v1 = vpop.eup %6551  ;;  %v1144_v43 = vadd.f32 %v976_v35, %v688_v63  ;;  %v1064_v3 = vadd.f32 %v896_v17, %v7746_v26 }
 0x168   :  { %2383 = vperm.xlu0 %6255, %v8297_v42   ;;  %6569 = vpow2.f32 %v1571_v45  ;;  %v6554_v42 = vpop.eup %6553  ;;  %v1725_v60 = vadd.f32 1.0, %v6538_v52  ;;  %v1421_v26 = vmul.f32 1.442695, %v1229_v59  ;;  %v1573_v35 = vmul.f32 1.442695, %v1305_v46  ;;  %v898_v46 = vld [vmem:[%s11474_s2 + $0xe8] sm:$0xff] }
 0x169   :  { %6571 = vrcp.f32 %v1805_v23  ;;  %v1312_v63 = vsub.f32 0.0, %v1144_v43  ;;  %v1232_v52 = vsub.f32 0.0, %v1064_v3  ;;  %v1139_v17 = vadd.f32 %v971_v39, %v8362_v57  ;;  %v978_v23 = vld [vmem:[%s11474_s2 + $0x368] sm:$0xff] }
 0x16a   :  { %v694_v4 = vpop.xlane.xlu1 %693  ;;  %6573 = vrcp.f32 %v1806_v19  ;;  %v1730_v62 = vadd.f32 1.0, %v6554_v42 }
 0x16b   :  { %v8402_v9 = vpop.xlane.xlu0 %690  ;;  %v6556_v51 = vpop.eup %6555  ;;  %6575 = vpow2.f32 %v1583_v27  ;;  %v1587_v57 = vmul.f32 1.442695, %v1312_v63  ;;  %v1146_v3 = vadd.f32 %v978_v23, %v694_v4  ;;  %v1427_v39 = vmul.f32 1.442695, %v1232_v52 }
 0x16c   :  { %2408 = vperm.xlu0 %6255, %v8330_v37   ;;  %v8409_v28 = vpop.eup %6557  ;;  %6577 = vpow2.f32 %v1417_v38  ;;  %v1810_v45 = vadd.f32 1.0, %v6556_v51  ;;  %v1728_v38 = vadd.f32 1.0, %v6546_v50  ;;  %v1727_v63 = vadd.f32 1.0, %v6552_v1  ;;  %v980_v1 = vld [vmem:[%s11474_s2 + $0x378] sm:$0xff] }
 0x16d   :  { %v8411_v47 = vpop.eup %6559  ;;  %6579 = vrcp.f32 %v1726_v58  ;;  %v895_v58 = vld [vmem:[%s11474_s2 + $0xd0] sm:$0xff]  ;;  %v1066_v4 = vadd.f32 %v898_v46, %v7760_v40  ;;  %v1314_v52 = vsub.f32 0.0, %v1146_v3 }
 0x16e   :  { %v700_v19 = vpop.xlane.xlu1 %699  ;;  %v8415_v37 = vpop.eup %6561  ;;  %6581 = vrcp.f32 %v1810_v45 }
 0x16f   :  { %v8413_v2 = vpop.xlane.xlu0 %696  ;;  %v6564_v27 = vpop.eup %6563  ;;  %6583 = vrcp.f32 %v1725_v60  ;;  %v1234_v46 = vsub.f32 0.0, %v1066_v4 }
 0x170   :  { %v6566_v32 = vpop.eup %6565  ;;  %6585 = vpow2.f32 %v1423_v6  ;;  %v1812_v59 = vadd.f32 1.0, %v6564_v27  ;;  %v1307_v6 = vsub.f32 0.0, %v1139_v17  ;;  %v1063_v27 = vadd.f32 %v895_v58, %v7748_v29 }
 0x171   :  { %v8424_v43 = vpop.eup %6567  ;;  %6587 = vpow2.f32 %v1421_v26  ;;  %v1807_v14 = vadd.f32 1.0, %v6566_v32  ;;  %v973_v26 = vld [vmem:[%s11474_s2 + $0x340] sm:$0xff] }
 0x172   :  { %v8429_v51 = vpop.xlane.xlu1 %705  ;;  %v6570_v50 = vpop.eup %6569  ;;  %6589 = vpow2.f32 %v1573_v35  ;;  %v1141_v32 = vadd.f32 %v973_v26, %v8376_v11  ;;  %v1231_v58 = vsub.f32 0.0, %v1063_v27  ;;  %v900_v11 = vld [vmem:[%s11474_s2 + $0xf8] sm:$0xff]  ;;  %v1729_v26 = vadd.f32 1.0, %v8409_v28 }
 0x173   :  { %v8431_v60 = vpop.xlane.xlu0 %702  ;;  %v6572_v45 = vpop.eup %6571  ;;  %6591 = vrcp.f32 %v1728_v38  ;;  %v1577_v38 = vmul.f32 1.442695, %v1307_v6  ;;  %v1591_v6 = vmul.f32 1.442695, %v1314_v52  ;;  %v1431_v52 = vmul.f32 1.442695, %v1234_v46 }
 0x174   :  { %v6574_v18 = vpop.eup %6573  ;;  %6593 = vrcp.f32 %v1812_v59  ;;  %2863 = vperm.xlu1 %6256, %v6572_v45   ;;  %v1808_v59 = vadd.f32 1.0, %v6570_v50  ;;  %v1148_v45 = vadd.f32 %v980_v1, %v700_v19  ;;  %v1425_v4 = vmul.f32 1.442695, %v1231_v58  ;;  %v975_v19 = vld [vmem:[%s11474_s2 + $0x350] sm:$0xff] }
 0x175   :  { %v6576_v23 = vpop.eup %6575  ;;  %6595 = vpow2.f32 %v1587_v57  ;;  %v897_v57 = vld [vmem:[%s11474_s2 + $0xe0] sm:$0xff]  ;;  %v1068_v1 = vadd.f32 %v900_v11, %v7774_v54  ;;  %v1143_v54 = vadd.f32 %v975_v19, %v8390_v0 }
 0x176   :  { %v8438_v35 = vpop.xlane.xlu1 %711  ;;  %v6578_v29 = vpop.eup %6577  ;;  %6597 = vpow2.f32 %v1427_v39  ;;  %v1814_v3 = vadd.f32 1.0, %v6576_v23 }
 0x177   :  { %v8440_v17 = vpop.xlane.xlu0 %708  ;;  %v8446_v40 = vpop.eup %6579  ;;  %6599 = vrcp.f32 %v1807_v14  ;;  %v1236_v11 = vsub.f32 0.0, %v1068_v1 }
 0x178   :  { %v6582_v42 = vpop.eup %6581  ;;  %6601 = vrcp.f32 %v1727_v63  ;;  %2868 = vperm.xlu1 %6256, %v6574_v18   ;;  %v1309_v63 = vsub.f32 0.0, %v1141_v32  ;;  %v1316_v32 = vsub.f32 0.0, %v1148_v45 }
 0x179   :  { %v8451_v39 = vpop.eup %6583  ;;  %6603 = vrcp.f32 %v1730_v62  ;;  %2888 = vperm.xlu0 %6255, %v6582_v42   ;;  %v1065_v62 = vadd.f32 %v897_v57, %v7762_v41 }
 0x17a   :  { %v8456_v14 = vpop.xlane.xlu1 %717  ;;  %v6586_v27 = vpop.eup %6585  ;;  %6605 = vpow2.f32 %v1577_v38  ;;  %v1732_v38 = vadd.f32 1.0, %v8424_v43  ;;  %v1581_v42 = vmul.f32 1.442695, %v1309_v63  ;;  %v1595_v45 = vmul.f32 1.442695, %v1316_v32 }
 0x17b   :  { %v8458_v50 = vpop.xlane.xlu0 %714  ;;  %v8461_v18 = vpop.eup %6587  ;;  %6607 = vrcp.f32 %v1808_v59  ;;  %v1233_v43 = vsub.f32 0.0, %v1065_v62  ;;  %v1435_v32 = vmul.f32 1.442695, %v1236_v11 }
 0x17c   :  { %v6590_v23 = vpop.eup %6589  ;;  %6609 = vrcp.f32 %v1814_v3  ;;  %2393 = vperm.xlu1 %6256, %v8293_v12   ;;  %v982_v12 = vld [vmem:[%s11474_s2 + $0x388] sm:$0xff] }
 0x17d   :  { %v8469_v28 = vpop.eup %6591  ;;  %6611 = vpow2.f32 %v1591_v6  ;;  %2418 = vperm.xlu0 %6255, %v8341_v49   ;;  %v1809_v57 = vadd.f32 1.0, %v6590_v23  ;;  %v1731_v49 = vadd.f32 1.0, %v6578_v29  ;;  %v899_v6 = vld [vmem:[%s11474_s2 + $0xf0] sm:$0xff]  ;;  %v902_v29 = vld [vmem:[%s11474_s2 + $0x108] sm:$0xff]  ;;  %v1311_v23 = vsub.f32 0.0, %v1143_v54 }
 0x17e   :  { %v8473_v41 = vpop.xlane.xlu1 %723  ;;  %v6594_v59 = vpop.eup %6593  ;;  %6613 = vrcp.f32 %v1729_v26  ;;  %v1150_v26 = vadd.f32 %v982_v12, %v8429_v51  ;;  %v1067_v1 = vadd.f32 %v899_v6, %v7776_v55  ;;  %v977_v51 = vld [vmem:[%s11474_s2 + $0x360] sm:$0xff]  ;;  %v1734_v12 = vadd.f32 1.0, %v6586_v27 }
 0x17f   :  { %v8475_v58 = vpop.xlane.xlu0 %720  ;;  %v6596_v46 = vpop.eup %6595  ;;  %6615 = vpow2.f32 %v1425_v4  ;;  %v1145_v11 = vadd.f32 %v977_v51, %v8402_v9 }
 0x180   :  { %v8481_v3 = vpop.eup %6597  ;;  %6617 = vpow2.f32 %v1431_v52  ;;  %2398 = vperm.xlu1 %6256, %v8312_v15   ;;  %v1816_v19 = vadd.f32 1.0, %v6596_v46  ;;  %v1429_v52 = vmul.f32 1.442695, %v1233_v43  ;;  %v1070_v46 = vadd.f32 %v902_v29, %v7788_v5  ;;  %v984_v5 = vld [vmem:[%s11474_s2 + $0x398] sm:$0xff] }
 0x181   :  { %v6600_v0 = vpop.eup %6599  ;;  %6619 = vrcp.f32 %v1732_v38  ;;  %2898 = vperm.xlu0 %6255, %v6594_v59   ;;  %v1318_v54 = vsub.f32 0.0, %v1150_v26  ;;  %v1235_v6 = vsub.f32 0.0, %v1067_v1  ;;  %v904_v29 = vld [vmem:[%s11474_s2 + $0x118] sm:$0xff] }
 0x182   :  { %v8488_v63 = vpop.xlane.xlu1 %729  ;;  %v8492_v62 = vpop.eup %6601  ;;  %6621 = vpow2.f32 %v1581_v42  ;;  %v901_v42 = vld [vmem:[%s11474_s2 + $0x100] sm:$0xff] }
 0x183   :  { %v8490_v4 = vpop.xlane.xlu0 %726  ;;  %v8497_v15 = vpop.eup %6603  ;;  %6623 = vrcp.f32 %v1809_v57  ;;  %v1069_v26 = vadd.f32 %v901_v42, %v7790_v8  ;;  %v1313_v8 = vsub.f32 0.0, %v1145_v11  ;;  %v1433_v42 = vmul.f32 1.442695, %v1235_v6 }
 0x184   :  { %v6606_v38 = vpop.eup %6605  ;;  %6625 = vrcp.f32 %v1731_v49  ;;  %2873 = vperm.xlu1 %6256, %v6600_v0   ;;  %v1585_v49 = vmul.f32 1.442695, %v1311_v23  ;;  %v1599_v23 = vmul.f32 1.442695, %v1318_v54 }
 0x185   :  { %v6608_v59 = vpop.eup %6607  ;;  %6627 = vpow2.f32 %v1595_v45  ;;  %2428 = vperm.xlu0 %6255, %v8353_v25   ;;  %v1811_v0 = vadd.f32 1.0, %v6606_v38  ;;  %v1733_v25 = vadd.f32 1.0, %v8461_v18  ;;  %v1237_v54 = vsub.f32 0.0, %v1069_v26 }
 0x186   :  { %v8508_v55 = vpop.xlane.xlu1 %735  ;;  %v6610_v57 = vpop.eup %6609  ;;  %6629 = vrcp.f32 %v1816_v19  ;;  %v1238_v19 = vsub.f32 0.0, %v1070_v46  ;;  %v1736_v46 = vadd.f32 1.0, %v8481_v3 }
 0x187   :  { %v8510_v43 = vpop.xlane.xlu0 %732  ;;  %v6612_v27 = vpop.eup %6611  ;;  %6631 = vpow2.f32 %v1429_v52  ;;  %v1152_v52 = vadd.f32 %v984_v5, %v8438_v35 }
 0x188   :  { %v8516_v45 = vpop.eup %6613  ;;  %6633 = vpow2.f32 %v1435_v32  ;;  %2878 = vperm.xlu1 %6256, %v6608_v59   ;;  %v1818_v38 = vadd.f32 1.0, %v6612_v27  ;;  %v1072_v59 = vadd.f32 %v904_v29, %v7802_v21  ;;  %v1439_v11 = vmul.f32 1.442695, %v1238_v19 }
 0x189   :  { %v6616_v9 = vpop.eup %6615  ;;  %6635 = vrcp.f32 %v1734_v12  ;;  %2908 = vperm.xlu0 %6255, %v6610_v57   ;;  %v903_v12 = vld [vmem:[%s11474_s2 + $0x110] sm:$0xff]  ;;  %v1320_v21 = vsub.f32 0.0, %v1152_v52  ;;  %v906_v52 = vld [vmem:[%s11474_s2 + $0x128] sm:$0xff] }
 0x18a   :  { %v8524_v1 = vpop.xlane.xlu1 %741  ;;  %v6618_v18 = vpop.eup %6617  ;;  %6637 = vpow2.f32 %v1585_v49  ;;  %v979_v57 = vld [vmem:[%s11474_s2 + $0x370] sm:$0xff]  ;;  %v1071_v3 = vadd.f32 %v903_v12, %v7804_v22  ;;  %v1240_v26 = vsub.f32 0.0, %v1072_v59 }
 0x18b   :  { %v8526_v51 = vpop.xlane.xlu0 %738  ;;  %v8528_v32 = vpop.eup %6619  ;;  %6639 = vrcp.f32 %v1811_v0  ;;  %v1589_v0 = vmul.f32 1.442695, %v1313_v8 }
 0x18c   :  { %v6622_v35 = vpop.eup %6621  ;;  %6641 = vrcp.f32 %v1733_v25  ;;  %2403 = vperm.xlu1 %6256, %v8333_v24   ;;  %v986_v24 = vld [vmem:[%s11474_s2 + $0x3a8] sm:$0xff] }
 0x18d   :  { %v6624_v49 = vpop.eup %6623  ;;  %6643 = vpow2.f32 %v1599_v23  ;;  %2438 = vperm.xlu0 %6255, %v8366_v34   ;;  %v1813_v29 = vadd.f32 1.0, %v6622_v35  ;;  %v1147_v34 = vadd.f32 %v979_v57, %v8413_v2  ;;  %v1437_v23 = vmul.f32 1.442695, %v1237_v54 }
 0x18e   :  { %v8540_v5 = vpop.xlane.xlu1 %747  ;;  %v8544_v6 = vpop.eup %6625  ;;  %6645 = vrcp.f32 %v1818_v38  ;;  %v1603_v38 = vmul.f32 1.442695, %v1320_v21  ;;  %v1154_v8 = vadd.f32 %v986_v24, %v8456_v14  ;;  %v1239_v2 = vsub.f32 0.0, %v1071_v3  ;;  %v981_v3 = vld [vmem:[%s11474_s2 + $0x380] sm:$0xff] }
 0x18f   :  { %v8542_v27 = vpop.xlane.xlu0 %744  ;;  %v6628_v25 = vpop.eup %6627  ;;  %6647 = vpow2.f32 %v1433_v42  ;;  %v1443_v54 = vmul.f32 1.442695, %v1240_v26  ;;  %v1074_v57 = vadd.f32 %v906_v52, %v7816_v33  ;;  %v1315_v14 = vsub.f32 0.0, %v1147_v34 }
 0x190   :  { %v6630_v19 = vpop.eup %6629  ;;  %6649 = vrcp.f32 %v1736_v46  ;;  %2883 = vperm.xlu1 %6256, %v6624_v49   ;;  %v1820_v35 = vadd.f32 1.0, %v6628_v25  ;;  %v905_v49 = vld [vmem:[%s11474_s2 + $0x120] sm:$0xff]  ;;  %v1735_v21 = vadd.f32 1.0, %v6616_v9  ;;  %v1738_v24 = vadd.f32 1.0, %v6618_v18 }
 0x191   :  { %v6632_v22 = vpop.eup %6631  ;;  %6651 = vpow2.f32 %v1439_v11  ;;  %2918 = vperm.xlu0 %6255, %v6630_v19   ;;  %v1322_v25 = vsub.f32 0.0, %v1154_v8  ;;  %v1441_v9 = vmul.f32 1.442695, %v1239_v2  ;;  %v1073_v34 = vadd.f32 %v905_v49, %v7818_v36 }
 0x192   :  { %v8555_v12 = vpop.xlane.xlu1 %753  ;;  %v6634_v59 = vpop.eup %6633  ;;  %6653 = vpow2.f32 %v1589_v0  ;;  %v1242_v18 = vsub.f32 0.0, %v1074_v57 }
 0x193   :  { %v8557_v42 = vpop.xlane.xlu0 %750  ;;  %v8559_v46 = vpop.eup %6635  ;;  %6655 = vrcp.f32 %v1813_v29  ;;  %v1607_v2 = vmul.f32 1.442695, %v1322_v25  ;;  %v1737_v25 = vadd.f32 1.0, %v6632_v22 }
 0x194   :  { %v6638_v11 = vpop.eup %6637  ;;  %6657 = vpow2.f32 %v1437_v23  ;;  %2413 = vperm.xlu1 %6256, %v8346_v44   ;;  %v988_v44 = vld [vmem:[%s11474_s2 + $0x3b8] sm:$0xff]  ;;  %v1593_v23 = vmul.f32 1.442695, %v1315_v14  ;;  %v907_v14 = vld [vmem:[%s11474_s2 + $0x130] sm:$0xff] }
 0x195   :  { %v6640_v0 = vpop.eup %6639  ;;  %6659 = vpow2.f32 %v1603_v38  ;;  %2448 = vperm.xlu0 %6255, %v8383_v48   ;;  %v1149_v48 = vadd.f32 %v981_v3, %v8431_v60  ;;  %v908_v38 = vld [vmem:[%s11474_s2 + $0x138] sm:$0xff]  ;;  %v1815_v8 = vadd.f32 1.0, %v6638_v11  ;;  %v1241_v60 = vsub.f32 0.0, %v1073_v34 }
 0x196   :  { %v8570_v33 = vpop.xlane.xlu1 %759  ;;  %v8574_v29 = vpop.eup %6641  ;;  %6661 = vrcp.f32 %v1820_v35  ;;  %v1156_v35 = vadd.f32 %v988_v44, %v8473_v41  ;;  %v1447_v3 = vmul.f32 1.442695, %v1242_v18  ;;  %v983_v44 = vld [vmem:[%s11474_s2 + $0x390] sm:$0xff]  ;;  %v1740_v34 = vadd.f32 1.0, %v6634_v59 }
 0x197   :  { %v8572_v26 = vpop.xlane.xlu0 %756  ;;  %v6644_v19 = vpop.eup %6643  ;;  %6663 = vpow2.f32 %v1443_v54  ;;  %v1317_v41 = vsub.f32 0.0, %v1149_v48 }
 0x198   :  { %v6646_v52 = vpop.eup %6645  ;;  %6665 = vrcp.f32 %v1735_v21  ;;  %2893 = vperm.xlu1 %6256, %v6640_v0   ;;  %v1822_v11 = vadd.f32 1.0, %v6644_v19  ;;  %v1076_v0 = vadd.f32 %v908_v38, %v7830_v53  ;;  %v1324_v19 = vsub.f32 0.0, %v1156_v35 }
 0x199   :  { %v6648_v36 = vpop.eup %6647  ;;  %6667 = vrcp.f32 %v1738_v24  ;;  %2928 = vperm.xlu0 %6255, %v6646_v52   ;;  %v1075_v52 = vadd.f32 %v907_v14, %v7832_v56  ;;  %v1597_v56 = vmul.f32 1.442695, %v1317_v41  ;;  %v1151_v38 = vadd.f32 %v983_v44, %v8440_v17  ;;  %v910_v17 = vld [vmem:[%s11474_s2 + $0x148] sm:$0xff] }
 0x19a   :  { %v8585_v49 = vpop.xlane.xlu1 %765  ;;  %v8589_v57 = vpop.eup %6649  ;;  %6669 = vpow2.f32 %v1441_v9  ;;  %v1244_v59 = vsub.f32 0.0, %v1076_v0  ;;  %v1611_v14 = vmul.f32 1.442695, %v1324_v19 }
 0x19b   :  { %v8587_v54 = vpop.xlane.xlu0 %762  ;;  %v6652_v21 = vpop.eup %6651  ;;  %6671 = vpow2.f32 %v1593_v23  ;;  %v1445_v23 = vmul.f32 1.442695, %v1241_v60  ;;  %v1243_v35 = vsub.f32 0.0, %v1075_v52 }
 0x19c   :  { %v6654_v24 = vpop.eup %6653  ;;  %6673 = vrcp.f32 %v1815_v8  ;;  %2423 = vperm.xlu1 %6256, %v8364_v20   ;;  %v990_v20 = vld [vmem:[%s11474_s2 + $0x3c8] sm:$0xff] }
 0x19d   :  { %v6656_v9 = vpop.eup %6655  ;;  %6675 = vpow2.f32 %v1607_v2  ;;  %2458 = vperm.xlu0 %6255, %v8411_v47   ;;  %v1817_v47 = vadd.f32 1.0, %v6654_v24  ;;  %v1158_v60 = vadd.f32 %v990_v20, %v8488_v63  ;;  %v1451_v24 = vmul.f32 1.442695, %v1244_v59  ;;  %v909_v63 = vld [vmem:[%s11474_s2 + $0x140] sm:$0xff] }
 0x19e   :  { %v8601_v53 = vpop.xlane.xlu1 %771  ;;  %v8605_v22 = vpop.eup %6657  ;;  %6677 = vrcp.f32 %v1822_v11  ;;  %v1449_v19 = vmul.f32 1.442695, %v1243_v35 }
 0x19f   :  { %v8603_v18 = vpop.xlane.xlu0 %768  ;;  %v6660_v48 = vpop.eup %6659  ;;  %6679 = vpow2.f32 %v1447_v3  ;;  %v1326_v20 = vsub.f32 0.0, %v1158_v60 }
 0x1a0   :  { %11531 = vst [vmem:[#allocation53_spill] sm:$0xff] %v8603_v18  ;;  %v6662_v8 = vpop.eup %6661  ;;  %6681 = vrcp.f32 %v1737_v25  ;;  %2903 = vperm.xlu1 %6256, %v6656_v9   ;;  %v1824_v0 = vadd.f32 1.0, %v6660_v48  ;;  %v1319_v25 = vsub.f32 0.0, %v1151_v38  ;;  %v1739_v9 = vadd.f32 1.0, %v6648_v36 }
 0x1a1   :  { %v6664_v2 = vpop.eup %6663  ;;  %6683 = vrcp.f32 %v1740_v34  ;;  %2938 = vperm.xlu0 %6255, %v6662_v8   ;;  %v985_v34 = vld [vmem:[%s11474_s2 + $0x3a0] sm:$0xff]  ;;  %v1077_v38 = vadd.f32 %v909_v63, %v7846_v13 }
 0x1a2   :  { %v8612_v11 = vpop.xlane.xlu1 %777  ;;  %v8616_v3 = vpop.eup %6665  ;;  %6685 = vpow2.f32 %v1445_v23  ;;  %v1078_v23 = vadd.f32 %v910_v17, %v7844_v10  ;;  %v1601_v10 = vmul.f32 1.442695, %v1319_v25 }
 0x1a3   :  { %v8614_v18 = vpop.xlane.xlu0 %774  ;;  %v8621_v41 = vpop.eup %6667  ;;  %6687 = vpow2.f32 %v1597_v56  ;;  %v1742_v56 = vadd.f32 1.0, %v6652_v21  ;;  %v1615_v21 = vmul.f32 1.442695, %v1326_v20  ;;  %v987_v20 = vld [vmem:[%s11474_s2 + $0x3b0] sm:$0xff] }
 0x1a4   :  { %v8626_v44 = vpop.eup %6669  ;;  %6689 = vrcp.f32 %v1817_v47  ;;  %2433 = vperm.xlu1 %6256, %v8378_v7   ;;  %v992_v7 = vld [vmem:[%s11474_s2 + $0x3d8] sm:$0xff]  ;;  %v1153_v47 = vadd.f32 %v985_v34, %v8458_v50  ;;  %v1246_v60 = vsub.f32 0.0, %v1078_v23  ;;  %v1741_v34 = vadd.f32 1.0, %v8605_v22 }
 0x1a5   :  { %v6672_v52 = vpop.eup %6671  ;;  %6691 = vpow2.f32 %v1611_v14  ;;  %2468 = vperm.xlu0 %6255, %v8446_v40   ;;  %v1160_v13 = vadd.f32 %v992_v7, %v8508_v55  ;;  %v912_v50 = vld [vmem:[%s11474_s2 + $0x158] sm:$0xff]  ;;  %v911_v55 = vld [vmem:[%s11474_s2 + $0x150] sm:$0xff]  ;;  %v1744_v23 = vadd.f32 1.0, %v6664_v2 }
 0x1a6   :  { %v8634_v48 = vpop.xlane.xlu1 %783  ;;  %v6674_v36 = vpop.eup %6673  ;;  %6693 = vrcp.f32 %v1824_v0  ;;  %v1819_v40 = vadd.f32 1.0, %v6672_v52  ;;  %v1321_v52 = vsub.f32 0.0, %v1153_v47  ;;  %v1080_v22 = vadd.f32 %v912_v50, %v7858_v30 }
 0x1a7   :  { %v8636_v59 = vpop.xlane.xlu0 %780  ;;  %v6676_v8 = vpop.eup %6675  ;;  %6695 = vpow2.f32 %v1451_v24  ;;  %v1245_v24 = vsub.f32 0.0, %v1077_v38  ;;  %v1328_v38 = vsub.f32 0.0, %v1160_v13  ;;  %v1079_v47 = vadd.f32 %v911_v55, %v7860_v31 }
 0x1a8   :  { %v6678_v35 = vpop.eup %6677  ;;  %6697 = vrcp.f32 %v1739_v9  ;;  %2913 = vperm.xlu1 %6256, %v6674_v36   ;;  %v1826_v25 = vadd.f32 1.0, %v6676_v8  ;;  %v1605_v30 = vmul.f32 1.442695, %v1321_v52  ;;  %v1248_v13 = vsub.f32 0.0, %v1080_v22  ;;  %v989_v22 = vld [vmem:[%s11474_s2 + $0x3c0] sm:$0xff] }
 0x1a9   :  { %v6680_v14 = vpop.eup %6679  ;;  %6699 = vpow2.f32 %v1449_v19  ;;  %2948 = vperm.xlu0 %6255, %v6678_v35  }
 0x1aa   :  { %v8644_v17 = vpop.xlane.xlu1 %789  ;;  %v8648_v63 = vpop.eup %6681  ;;  %6701 = vrcp.f32 %v1742_v56  ;;  %v1455_v56 = vmul.f32 1.442695, %v1246_v60 }
 0x1ab   :  { %v8646_v0 = vpop.xlane.xlu0 %786  ;;  %v8653_v9 = vpop.eup %6683  ;;  %6703 = vpow2.f32 %v1601_v10  ;;  %v1453_v10 = vmul.f32 1.442695, %v1245_v24  ;;  %v1619_v24 = vmul.f32 1.442695, %v1328_v38 }
 0x1ac   :  { %v8659_v19 = vpop.eup %6685  ;;  %6705 = vrcp.f32 %v1819_v40  ;;  %2443 = vperm.xlu1 %6256, %v8397_v16   ;;  %v994_v16 = vld [vmem:[%s11474_s2 + $0x3e8] sm:$0xff]  ;;  %v1155_v40 = vadd.f32 %v987_v20, %v8475_v58  ;;  %v1743_v20 = vadd.f32 1.0, %v8626_v44 }
 0x1ad   :  { %v6688_v36 = vpop.eup %6687  ;;  %6707 = vpow2.f32 %v1615_v21  ;;  %2478 = vperm.xlu0 %6255, %v8469_v28   ;;  %v1162_v31 = vadd.f32 %v994_v16, %v8524_v1  ;;  %v914_v58 = vld [vmem:[%s11474_s2 + $0x168] sm:$0xff] }
 0x1ae   :  { %v8667_v7 = vpop.xlane.xlu1 %795  ;;  %v6690_v2 = vpop.eup %6689  ;;  %6709 = vrcp.f32 %v1826_v25  ;;  %v1821_v28 = vadd.f32 1.0, %v6688_v36  ;;  %v1323_v36 = vsub.f32 0.0, %v1155_v40 }
 0x1af   :  { %v8669_v8 = vpop.xlane.xlu0 %792  ;;  %v6692_v35 = vpop.eup %6691  ;;  %6711 = vrcp.f32 %v1741_v34  ;;  %v1247_v34 = vsub.f32 0.0, %v1079_v47  ;;  %v1330_v47 = vsub.f32 0.0, %v1162_v31  ;;  %v916_v31 = vld [vmem:[%s11474_s2 + $0x178] sm:$0xff] }
 0x1b0   :  { %v6694_v60 = vpop.eup %6693  ;;  %6713 = vrcp.f32 %v1744_v23  ;;  %2923 = vperm.xlu1 %6256, %v6690_v2   ;;  %v1828_v52 = vadd.f32 1.0, %v6692_v35  ;;  %v1459_v2 = vmul.f32 1.442695, %v1248_v13  ;;  %v1609_v40 = vmul.f32 1.442695, %v1323_v36  ;;  %v915_v36 = vld [vmem:[%s11474_s2 + $0x170] sm:$0xff] }
 0x1b1   :  { %v6696_v21 = vpop.eup %6695  ;;  %6715 = vpow2.f32 %v1455_v56  ;;  %2958 = vperm.xlu0 %6255, %v6694_v60   ;;  %v1746_v56 = vadd.f32 1.0, %v6680_v14  ;;  %v1457_v35 = vmul.f32 1.442695, %v1247_v34  ;;  %v1623_v34 = vmul.f32 1.442695, %v1330_v47 }
 0x1b2   :  { %v8677_v50 = vpop.xlane.xlu1 %801  ;;  %v8681_v55 = vpop.eup %6697  ;;  %6717 = vpow2.f32 %v1453_v10  ;;  %v1082_v10 = vadd.f32 %v914_v58, %v7874_v61  ;;  %v1157_v61 = vadd.f32 %v989_v22, %v8490_v4 }
 0x1b3   :  { %v8679_v25 = vpop.xlane.xlu0 %798  ;;  %v6700_v23 = vpop.eup %6699  ;;  %6719 = vpow2.f32 %v1605_v30  ;;  %v996_v30 = vld [vmem:[%s11474_s2 + $0x3f8] sm:$0xff] }
 0x1b4   :  { %v8687_v1 = vpop.eup %6701  ;;  %6721 = vrcp.f32 %v1821_v28  ;;  %2453 = vperm.xlu1 %6256, %v8415_v37   ;;  %v1164_v58 = vadd.f32 %v996_v30, %v8540_v5  ;;  %v1325_v5 = vsub.f32 0.0, %v1157_v61  ;;  %v11535_v30 = vld [vmem:[#allocation3_spill] sm:$0xff] }
 0x1b5   :  { %v6704_v38 = vpop.eup %6703  ;;  %6723 = vpow2.f32 %v1619_v24  ;;  %2488 = vperm.xlu0 %6255, %v8497_v15   ;;  %v913_v15 = vld [vmem:[%s11474_s2 + $0x160] sm:$0xff]  ;;  %v1250_v24 = vsub.f32 0.0, %v1082_v10 }
 0x1b6   :  { %v8695_v44 = vpop.xlane.xlu1 %807  ;;  %v6706_v14 = vpop.eup %6705  ;;  %6725 = vrcp.f32 %v1828_v52  ;;  %v1823_v28 = vadd.f32 1.0, %v6704_v38  ;;  %v1745_v38 = vadd.f32 1.0, %v8659_v19 }
 0x1b7   :  { %v8697_v16 = vpop.xlane.xlu0 %804  ;;  %v6708_v37 = vpop.eup %6707  ;;  %6727 = vrcp.f32 %v1743_v20 }
 0x1b8   :  { %11532 = vst [vmem:[#allocation54_spill] sm:$0xff] %v8697_v16  ;;  %v6710_v60 = vpop.eup %6709  ;;  %6729 = vrcp.f32 %v1746_v56  ;;  %2933 = vperm.xlu1 %6256, %v6706_v14   ;;  %v1830_v56 = vadd.f32 1.0, %v6708_v37  ;;  %v1748_v14 = vadd.f32 1.0, %v6696_v21  ;;  %v11536_v16 = vld [vmem:[#allocation4_spill] sm:$0xff] }
 0x1b9   :  { %v8706_v13 = vpop.eup %6711  ;;  %6731 = vpow2.f32 %v1459_v2  ;;  %2968 = vperm.xlu0 %6255, %v6710_v60   ;;  %v11534_v2 = vld [vmem:[#allocation2_spill] sm:$0xff]  ;;  %v1084_v60 = vadd.f32 %v916_v31, %v11535_v30  ;;  %v1083_v19 = vadd.f32 %v915_v36, %v11536_v16  ;;  %v998_v31 = vld [vmem:[%s11474_s2 + $0x408] sm:$0xff] }
 0x1ba   :  { %v8712_v4 = vpop.xlane.xlu1 %813  ;;  %v8716_v20 = vpop.eup %6713  ;;  %6733 = vpow2.f32 %v1457_v35  ;;  %v1081_v10 = vadd.f32 %v913_v15, %v11534_v2  ;;  %v991_v35 = vld [vmem:[%s11474_s2 + $0x3d0] sm:$0xff]  ;;  %v1332_v15 = vsub.f32 0.0, %v1164_v58  ;;  %v1613_v2 = vmul.f32 1.442695, %v1325_v5 }
 0x1bb   :  { %v8714_v52 = vpop.xlane.xlu0 %810  ;;  %v8721_v22 = vpop.eup %6715  ;;  %6735 = vpow2.f32 %v1609_v40  ;;  %v1159_v16 = vadd.f32 %v991_v35, %v8510_v43 }
 0x1bc   :  { %11533 = vst [vmem:[#allocation55_spill] sm:$0xff] %v8714_v52  ;;  %v8725_v47 = vpop.eup %6717  ;;  %6737 = vrcp.f32 %v1823_v28  ;;  %2463 = vperm.xlu1 %6256, %v8451_v39   ;;  %v1463_v52 = vmul.f32 1.442695, %v1250_v24  ;;  %v1747_v28 = vadd.f32 1.0, %v6700_v23  ;;  %v1249_v24 = vsub.f32 0.0, %v1081_v10 }
 0x1bd   :  { %v6720_v37 = vpop.eup %6719  ;;  %6739 = vpow2.f32 %v1623_v34  ;;  %2498 = vperm.xlu0 %6255, %v8528_v32   ;;  %v1252_v32 = vsub.f32 0.0, %v1084_v60  ;;  %v1251_v23 = vsub.f32 0.0, %v1083_v19  ;;  %v1627_v30 = vmul.f32 1.442695, %v1332_v15 }
 0x1be   :  { %v8734_v40 = vpop.xlane.xlu1 %819  ;;  %v6722_v61 = vpop.eup %6721  ;;  %6741 = vrcp.f32 %v1830_v56  ;;  %v1825_v58 = vadd.f32 1.0, %v6720_v37  ;;  %v918_v56 = vld [vmem:[%s11474_s2 + $0x188] sm:$0xff]  ;;  %v1461_v35 = vmul.f32 1.442695, %v1249_v24  ;;  %v1327_v37 = vsub.f32 0.0, %v1159_v16 }
 0x1bf   :  { %v8736_v21 = vpop.xlane.xlu0 %816  ;;  %v6724_v39 = vpop.eup %6723  ;;  %6743 = vrcp.f32 %v1745_v38  ;;  %v1166_v38 = vadd.f32 %v998_v31, %v8555_v12  ;;  %v993_v12 = vld [vmem:[%s11474_s2 + $0x3e0] sm:$0xff]  ;;  %v1467_v15 = vmul.f32 1.442695, %v1252_v32 }
 0x1c0   :  { %v6726_v34 = vpop.eup %6725  ;;  %6745 = vrcp.f32 %v1748_v14  ;;  %2943 = vperm.xlu1 %6256, %v6722_v61   ;;  %v1832_v14 = vadd.f32 1.0, %v6724_v39  ;;  %v11538_v61 = vld [vmem:[#allocation5_spill] sm:$0xff]  ;;  %v11539_v39 = vld [vmem:[#allocation6_spill] sm:$0xff] }
 0x1c1   :  { %v8742_v36 = vpop.eup %6727  ;;  %6747 = vpow2.f32 %v1463_v52  ;;  %2978 = vperm.xlu0 %6255, %v6726_v34   ;;  %v917_v52 = vld [vmem:[%s11474_s2 + $0x180] sm:$0xff]  ;;  %v1086_v31 = vadd.f32 %v918_v56, %v11538_v61  ;;  %v1465_v34 = vmul.f32 1.442695, %v1251_v23  ;;  %v1334_v24 = vsub.f32 0.0, %v1166_v38 }
 0x1c2   :  { %v8748_v10 = vpop.xlane.xlu1 %825  ;;  %v8752_v5 = vpop.eup %6729  ;;  %6749 = vrcp.f32 %v1747_v28 }
 0x1c3   :  { %v8750_v43 = vpop.xlane.xlu0 %822  ;;  %v8757_v60 = vpop.eup %6731  ;;  %6751 = vpow2.f32 %v1613_v2  ;;  %v1000_v2 = vld [vmem:[%s11474_s2 + $0x418] sm:$0xff] }
 0x1c4   :  { %11537 = vst [vmem:[#allocation2_spill] sm:$0xff] %v8750_v43  ;;  %v8762_v19 = vpop.eup %6733  ;;  %6753 = vrcp.f32 %v1825_v58  ;;  %2473 = vperm.xlu1 %6256, %v8492_v62   ;;  %v1085_v43 = vadd.f32 %v917_v52, %v11539_v39  ;;  %v1750_v58 = vadd.f32 1.0, %v8721_v22  ;;  %v1161_v62 = vadd.f32 %v993_v12, %v8526_v51  ;;  %v920_v22 = vld [vmem:[%s11474_s2 + $0x198] sm:$0xff] }
 0x1c5   :  { %v6736_v28 = vpop.eup %6735  ;;  %6755 = vpow2.f32 %v1627_v30  ;;  %2508 = vperm.xlu0 %6255, %v8559_v46   ;;  %v1617_v30 = vmul.f32 1.442695, %v1327_v37  ;;  %v1254_v52 = vsub.f32 0.0, %v1086_v31  ;;  %v1168_v39 = vadd.f32 %v1000_v2, %v8570_v33  ;;  %v919_v33 = vld [vmem:[%s11474_s2 + $0x190] sm:$0xff] }
 0x1c6   :  { %v8771_v16 = vpop.xlane.xlu1 %831  ;;  %v6738_v56 = vpop.eup %6737  ;;  %6757 = vrcp.f32 %v1832_v14  ;;  %v1827_v61 = vadd.f32 1.0, %v6736_v28  ;;  %v1631_v14 = vmul.f32 1.442695, %v1334_v24  ;;  %v1749_v31 = vadd.f32 1.0, %v8725_v47  ;;  %v11542_v24 = vld [vmem:[#allocation7_spill] sm:$0xff] }
 0x1c7   :  { %v8773_v32 = vpop.xlane.xlu0 %828  ;;  %v6740_v23 = vpop.eup %6739  ;;  %6759 = vpow2.f32 %v1461_v35  ;;  %v1088_v2 = vadd.f32 %v920_v22, %v11542_v24 }
 0x1c8   :  { %11540 = vst [vmem:[#allocation3_spill] sm:$0xff] %v8773_v32  ;;  %v6742_v38 = vpop.eup %6741  ;;  %6761 = vpow2.f32 %v1467_v15  ;;  %2953 = vperm.xlu1 %6256, %v6738_v56   ;;  %v1253_v32 = vsub.f32 0.0, %v1085_v43  ;;  %v1834_v12 = vadd.f32 1.0, %v6740_v23  ;;  %v1329_v15 = vsub.f32 0.0, %v1161_v62  ;;  %v995_v56 = vld [vmem:[%s11474_s2 + $0x3f0] sm:$0xff] }
 0x1c9   :  { %v8778_v46 = vpop.eup %6743  ;;  %6763 = vpow2.f32 %v1465_v34  ;;  %2988 = vperm.xlu0 %6255, %v6742_v38   ;;  %v1471_v34 = vmul.f32 1.442695, %v1254_v52  ;;  %v11543_v62 = vld [vmem:[#allocation8_spill] sm:$0xff] }
 0x1ca   :  { %v8783_v51 = vpop.xlane.xlu1 %837  ;;  %v8787_v37 = vpop.eup %6745  ;;  %6765 = vrcp.f32 %v1750_v58  ;;  %v1336_v58 = vsub.f32 0.0, %v1168_v39  ;;  %v1469_v23 = vmul.f32 1.442695, %v1253_v32  ;;  %v1002_v39 = vld [vmem:[%s11474_s2 + $0x428] sm:$0xff]  ;;  %v1163_v32 = vadd.f32 %v995_v56, %v8542_v27 }
 0x1cb   :  { %v8785_v35 = vpop.xlane.xlu0 %834  ;;  %v6748_v43 = vpop.eup %6747  ;;  %6767 = vpow2.f32 %v1617_v30  ;;  %v1751_v56 = vadd.f32 1.0, %v8762_v19  ;;  %v1004_v19 = vld [vmem:[%s11474_s2 + $0x438] sm:$0xff] }
 0x1cc   :  { %11541 = vst [vmem:[#allocation4_spill] sm:$0xff] %v8785_v35  ;;  %v8793_v28 = vpop.eup %6749  ;;  %6769 = vrcp.f32 %v1827_v61  ;;  %2483 = vperm.xlu1 %6256, %v8516_v45   ;;  %v1087_v35 = vadd.f32 %v919_v33, %v11543_v62  ;;  %v1621_v61 = vmul.f32 1.442695, %v1329_v15  ;;  %v1752_v45 = vadd.f32 1.0, %v8757_v60  ;;  %v922_v33 = vld [vmem:[%s11474_s2 + $0x1a8] sm:$0xff] }
 0x1cd   :  { %v6752_v38 = vpop.eup %6751  ;;  %6771 = vpow2.f32 %v1631_v14  ;;  %2518 = vperm.xlu0 %6255, %v8589_v57   ;;  %v1256_v57 = vsub.f32 0.0, %v1088_v2  ;;  %v1635_v24 = vmul.f32 1.442695, %v1336_v58  ;;  %v11548_v58 = vld [vmem:[#allocation9_spill] sm:$0xff] }
 0x1ce   :  { %v8802_v47 = vpop.xlane.xlu1 %843  ;;  %v6754_v52 = vpop.eup %6753  ;;  %6773 = vrcp.f32 %v1834_v12  ;;  %v1255_v15 = vsub.f32 0.0, %v1087_v35  ;;  %v1829_v62 = vadd.f32 1.0, %v6752_v38 }
 0x1cf   :  { %11544 = vst [vmem:[#allocation5_spill] sm:$0xff] %v8802_v47  ;;  %v8804_v30 = vpop.xlane.xlu0 %840  ;;  %v6756_v22 = vpop.eup %6755  ;;  %6775 = vrcp.f32 %v1749_v31  ;;  %v1475_v38 = vmul.f32 1.442695, %v1256_v57 }
 0x1d0   :  { %11545 = vst [vmem:[#allocation6_spill] sm:$0xff] %v8804_v30  ;;  %v6758_v14 = vpop.eup %6757  ;;  %6777 = vpow2.f32 %v1471_v34  ;;  %2963 = vperm.xlu1 %6256, %v6754_v52   ;;  %v1170_v30 = vadd.f32 %v1002_v39, %v8585_v49  ;;  %v1836_v34 = vadd.f32 1.0, %v6756_v22  ;;  %v1090_v52 = vadd.f32 %v922_v33, %v11548_v58  ;;  %v997_v49 = vld [vmem:[%s11474_s2 + $0x400] sm:$0xff] }
 0x1d1   :  { %v6760_v12 = vpop.eup %6759  ;;  %6779 = vpow2.f32 %v1469_v23  ;;  %2998 = vperm.xlu0 %6255, %v6758_v14   ;;  %v1331_v23 = vsub.f32 0.0, %v1163_v32  ;;  %v1754_v33 = vadd.f32 1.0, %v6748_v43  ;;  %v1165_v57 = vadd.f32 %v997_v49, %v8557_v42  ;;  %v924_v42 = vld [vmem:[%s11474_s2 + $0x1b8] sm:$0xff] }
 0x1d2   :  { %v8815_v31 = vpop.xlane.xlu1 %849  ;;  %v6762_v27 = vpop.eup %6761  ;;  %6781 = vpow2.f32 %v1621_v61  ;;  %v1473_v61 = vmul.f32 1.442695, %v1255_v15  ;;  %v1338_v22 = vsub.f32 0.0, %v1170_v30  ;;  %v1172_v58 = vadd.f32 %v1004_v19, %v8601_v53  ;;  %v999_v53 = vld [vmem:[%s11474_s2 + $0x410] sm:$0xff] }
 0x1d3   :  { %11546 = vst [vmem:[#allocation7_spill] sm:$0xff] %v8815_v31  ;;  %v8817_v60 = vpop.xlane.xlu0 %846  ;;  %v8819_v2 = vpop.eup %6763  ;;  %6783 = vrcp.f32 %v1752_v45  ;;  %v1625_v15 = vmul.f32 1.442695, %v1331_v23  ;;  %v1333_v49 = vsub.f32 0.0, %v1165_v57  ;;  %v1756_v57 = vadd.f32 1.0, %v6762_v27 }
 0x1d4   :  { %11547 = vst [vmem:[#allocation8_spill] sm:$0xff] %v8817_v60  ;;  %v8826_v35 = vpop.eup %6765  ;;  %6785 = vpow2.f32 %v1635_v24  ;;  %2493 = vperm.xlu1 %6256, %v8544_v6   ;;  %v1258_v24 = vsub.f32 0.0, %v1090_v52  ;;  %v1639_v43 = vmul.f32 1.442695, %v1338_v22 }
 0x1d5   :  { %v6768_v39 = vpop.eup %6767  ;;  %6787 = vrcp.f32 %v1829_v62  ;;  %2528 = vperm.xlu0 %6255, %v8621_v41   ;;  %v921_v62 = vld [vmem:[%s11474_s2 + $0x1a0] sm:$0xff] }
 0x1d6   :  { %v8833_v45 = vpop.xlane.xlu1 %855  ;;  %v6770_v14 = vpop.eup %6769  ;;  %6789 = vrcp.f32 %v1836_v34  ;;  %v1831_v41 = vadd.f32 1.0, %v6768_v39  ;;  %v1479_v39 = vmul.f32 1.442695, %v1258_v24 }
 0x1d7   :  { %11549 = vst [vmem:[#allocation9_spill] sm:$0xff] %v8833_v45  ;;  %v8835_v32 = vpop.xlane.xlu0 %852  ;;  %v6772_v6 = vpop.eup %6771  ;;  %6791 = vrcp.f32 %v1751_v56 }
 0x1d8   :  { %11550 = vst [vmem:[#allocation56_spill] sm:$0xff] %v8835_v32  ;;  %v6774_v30 = vpop.eup %6773  ;;  %6793 = vpow2.f32 %v1475_v38  ;;  %2973 = vperm.xlu1 %6256, %v6770_v14   ;;  %v1838_v23 = vadd.f32 1.0, %v6772_v6  ;;  %v1753_v14 = vadd.f32 1.0, %v6760_v12  ;;  %v1167_v6 = vadd.f32 %v999_v53, %v8572_v26  ;;  %v1006_v12 = vld [vmem:[%s11474_s2 + $0x448] sm:$0xff] }
 0x1d9   :  { %v8842_v32 = vpop.eup %6775  ;;  %6795 = vpow2.f32 %v1473_v61  ;;  %3008 = vperm.xlu0 %6255, %v6774_v30   ;;  %v11553_v61 = vld [vmem:[#allocation10_spill] sm:$0xff]  ;;  %v11554_v30 = vld [vmem:[#allocation11_spill] sm:$0xff] }
 0x1da   :  { %v8847_v34 = vpop.xlane.xlu1 %861  ;;  %v8851_v52 = vpop.eup %6777  ;;  %6797 = vrcp.f32 %v1754_v33  ;;  %v1089_v19 = vadd.f32 %v921_v62, %v11553_v61  ;;  %v1092_v60 = vadd.f32 %v924_v42, %v11554_v30  ;;  %v1174_v61 = vadd.f32 %v1006_v12, %v8612_v11  ;;  %v11557_v30 = vld [vmem:[#allocation12_spill] sm:$0xff] }
 0x1db   :  { %11551 = vst [vmem:[#allocation57_spill] sm:$0xff] %v8847_v34  ;;  %v8849_v56 = vpop.xlane.xlu0 %858  ;;  %v8856_v38 = vpop.eup %6779  ;;  %6799 = vpow2.f32 %v1625_v15  ;;  %v1629_v15 = vmul.f32 1.442695, %v1333_v49  ;;  %v926_v49 = vld [vmem:[%s11474_s2 + $0x1c8] sm:$0xff] }
 0x1dc   :  { %11552 = vst [vmem:[#allocation58_spill] sm:$0xff] %v8849_v56  ;;  %v6782_v22 = vpop.eup %6781  ;;  %6801 = vrcp.f32 %v1831_v41  ;;  %v1340_v56 = vsub.f32 0.0, %v1172_v58  ;;  %2503 = vperm.xlu1 %6256, %v8574_v29   ;;  %v1257_v42 = vsub.f32 0.0, %v1089_v19  ;;  %v1260_v26 = vsub.f32 0.0, %v1092_v60  ;;  %v1001_v60 = vld [vmem:[%s11474_s2 + $0x420] sm:$0xff] }
 0x1dd   :  { %v8861_v33 = vpop.eup %6783  ;;  %6803 = vpow2.f32 %v1639_v43  ;;  %2538 = vperm.xlu0 %6255, %v8653_v9   ;;  %v1833_v29 = vadd.f32 1.0, %v6782_v22  ;;  %v923_v9 = vld [vmem:[%s11474_s2 + $0x1b0] sm:$0xff] }
 0x1de   :  { %v8865_v24 = vpop.xlane.xlu1 %867  ;;  %v6786_v62 = vpop.eup %6785  ;;  %6805 = vrcp.f32 %v1838_v23  ;;  %v1643_v43 = vmul.f32 1.442695, %v1340_v56  ;;  %v2048_v56 = vld [vmem:[%s11475_s3 + $0x18] sm:$0xff] }
 0x1df   :  { %11555 = vst [vmem:[#allocation10_spill] sm:$0xff] %v8865_v24  ;;  %v6788_v41 = vpop.eup %6787  ;;  %6807 = vpow2.f32 %v1479_v39  ;;  %v8870_v58 = vpop.xlane.xlu0 %864  ;;  %v1840_v53 = vadd.f32 1.0, %v6786_v62  ;;  %v1335_v39 = vsub.f32 0.0, %v1167_v6  ;;  %v2046_v6 = vld [vmem:[%s11475_s3 + $0x8] sm:$0xff]  ;;  %v2045_v62 = vld [vmem:[%s11475_s3] sm:$0xff]  ;;  %v1342_v24 = vsub.f32 0.0, %v1174_v61 }
 0x1e0   :  { %11556 = vst [vmem:[#allocation11_spill] sm:$0xff] %v8870_v58  ;;  %v6790_v27 = vpop.eup %6789  ;;  %6809 = vrcp.f32 %v1753_v14  ;;  %2983 = vperm.xlu1 %6256, %v6788_v41   ;;  %v1755_v14 = vadd.f32 1.0, %v8819_v2  ;;  %v1477_v41 = vmul.f32 1.442695, %v1257_v42  ;;  %v1483_v2 = vmul.f32 1.442695, %v1260_v26 }
 0x1e1   :  { %v8875_v23 = vpop.eup %6791  ;;  %6811 = vrcp.f32 %v1756_v57  ;;  %3018 = vperm.xlu0 %6255, %v6790_v27   ;;  %v1091_v57 = vadd.f32 %v923_v9, %v11557_v30  ;;  %v11558_v27 = vld [vmem:[#allocation13_spill] sm:$0xff]  ;;  %v1633_v30 = vmul.f32 1.442695, %v1335_v39  ;;  %v1169_v58 = vadd.f32 %v1001_v60, %v8587_v54 }
 0x1e2   :  { %v8881_v19 = vpop.eup %6793  ;;  %6813 = vpow2.f32 %v1629_v15  ;;  %v2389_v11 = vpop.permute.xlu1 %2388  ;;  %v2047_v15 = vld [vmem:[%s11475_s3 + $0x10] sm:$0xff]  ;;  %v1094_v9 = vadd.f32 %v926_v49, %v11558_v27  ;;  %v1008_v42 = vld [vmem:[%s11474_s2 + $0x458] sm:$0xff] }
 0x1e3   :  { %v8889_v22 = vpop.eup %6795  ;;  %6815 = vrcp.f32 %v1833_v29  ;;  %v3224_v31 = vmul.f32 %v2389_v11, %v2048_v56  ;;  %v1647_v56 = vmul.f32 1.442695, %v1342_v24 }
 0x1e4   :  { %v8902_v12 = vpop.eup %6797  ;;  %6817 = vpow2.f32 %v1643_v43  ;;  %2513 = vperm.xlu1 %6256, %v8616_v3   ;;  %v3223_v43 = vmul.f32 %v2389_v11, %v2047_v15  ;;  %v1758_v3 = vadd.f32 1.0, %v8851_v52  ;;  %v1262_v47 = vsub.f32 0.0, %v1094_v9 }
 0x1e5   :  { %v6800_v29 = vpop.eup %6799  ;;  %6819 = vrcp.f32 %v1840_v53  ;;  %2548 = vperm.xlu0 %6255, %v8687_v1   ;;  %v1259_v53 = vsub.f32 0.0, %v1091_v57  ;;  %v1337_v11 = vsub.f32 0.0, %v1169_v58 }
 0x1e6   :  { %v6802_v45 = vpop.eup %6801  ;;  %6821 = vrcp.f32 %v1755_v14  ;;  %v1835_v54 = vadd.f32 1.0, %v6800_v29  ;;  %v1176_v14 = vadd.f32 %v1008_v42, %v8634_v48  ;;  %v11559_v48 = vld [vmem:[#allocation14_spill] sm:$0xff]  ;;  %v1487_v58 = vmul.f32 1.442695, %v1262_v47 }
 0x1e7   :  { %v2384_v34 = vpop.permute.xlu0 %2383  ;;  %v6804_v27 = vpop.eup %6803  ;;  %6823 = vpow2.f32 %v1477_v41  ;;  %v1637_v29 = vmul.f32 1.442695, %v1337_v11  ;;  %v1760_v47 = vadd.f32 1.0, %v8881_v19  ;;  %v11562_v19 = vld [vmem:[#allocation16_spill] sm:$0xff]  ;;  %v1759_v11 = vadd.f32 1.0, %v8889_v22  ;;  %v2238_v22 = vld [vmem:[%s11475_s3 + $0x608] sm:$0xff] }
 0x1e8   :  { %v3222_v26 = vmul.f32 %v2384_v34, %v2046_v6  ;;  %v3221_v49 = vmul.f32 %v2384_v34, %v2045_v62  ;;  %v6806_v39 = vpop.eup %6805  ;;  %2993 = vperm.xlu1 %6256, %v6802_v45   ;;  %6825 = vpow2.f32 %v1483_v2  ;;  %v925_v34 = vld [vmem:[%s11474_s2 + $0x1c0] sm:$0xff]  ;;  %v1842_v57 = vadd.f32 1.0, %v6804_v27  ;;  %v1003_v6 = vld [vmem:[%s11474_s2 + $0x430] sm:$0xff] }
 0x1e9   :  { %v8912_v60 = vpop.eup %6807  ;;  %3028 = vperm.xlu0 %6255, %v6806_v39   ;;  %6827 = vpow2.f32 %v1633_v30  ;;  %v1757_v45 = vadd.f32 1.0, %v8856_v38  ;;  %v1481_v62 = vmul.f32 1.442695, %v1259_v53  ;;  %v1093_v15 = vadd.f32 %v925_v34, %v11559_v48  ;;  %v928_v38 = vld [vmem:[%s11474_s2 + $0x1d8] sm:$0xff]  ;;  %v930_v34 = vld [vmem:[%s11474_s2 + $0x1e8] sm:$0xff] }
 0x1ea   :  { %v3558_v1 = vpack.c.bf16 %v3224_v31, %v3222_v26  ;;  %v3557_v61 = vpack.c.bf16 %v3223_v43, %v3221_v49  ;;  %v8918_v52 = vpop.eup %6809  ;;  %6829 = vrcp.f32 %v1758_v3  ;;  %v1344_v2 = vsub.f32 0.0, %v1176_v14  ;;  %v11560_v30 = vld [vmem:[#allocation53_spill] sm:$0xff]  ;;  %v1010_v26 = vld [vmem:[%s11474_s2 + $0x468] sm:$0xff] }
 0x1eb   :  { %v8920_v31 = vpop.eup %6811  ;;  %6831 = vrcp.f32 %v1835_v54  ;;  %v1171_v42 = vadd.f32 %v1003_v6, %v11560_v30  ;;  %v1261_v49 = vsub.f32 0.0, %v1093_v15  ;;  %v11561_v3 = vld [vmem:[#allocation15_spill] sm:$0xff]  ;;  %v1178_v54 = vadd.f32 %v1010_v26, %v8644_v17  ;;  %v929_v17 = vld [vmem:[%s11474_s2 + $0x1e0] sm:$0xff]  ;;  %v8963_v48 = vpop.permute.xlu0 %2408 }
 0x1ec   :  { %4706 = vmatprep.subr.bf16.mxu1 %v3558_v1  ;;  %v6814_v24 = vpop.eup %6813  ;;  %2523 = vperm.xlu1 %6256, %v8648_v63   ;;  %6833 = vpow2.f32 %v1647_v56  ;;  %v8943_v53 = vadd.f32 %v928_v38, %v11561_v3  ;;  %v1651_v39 = vmul.f32 1.442695, %v1344_v2  ;;  %v2240_v38 = vld [vmem:[%s11475_s3 + $0x618] sm:$0xff]  ;;  %v11564_v26 = vld [vmem:[#allocation18_spill] sm:$0xff] }
 0x1ed   :  { %4707 = vmatpush1.bf16.msra.mxu1 %v3557_v61  ;;  %v6816_v41 = vpop.eup %6815  ;;  %2558 = vperm.xlu0 %6255, %v8716_v20   ;;  %6835 = vrcp.f32 %v1842_v57  ;;  %v927_v20 = vld [vmem:[%s11474_s2 + $0x1d0] sm:$0xff]  ;;  %v1837_v43 = vadd.f32 1.0, %v6814_v24  ;;  %v1339_v14 = vsub.f32 0.0, %v1171_v42  ;;  %v1485_v24 = vmul.f32 1.442695, %v1261_v49 }
 0x1ee   :  { %v6818_v9 = vpop.eup %6817  ;;  %6837 = vrcp.f32 %v1757_v45  ;;  %v8949_v61 = vadd.f32 %v927_v20, %v11562_v19  ;;  %v1762_v49 = vadd.f32 1.0, %v8912_v60 }
 0x1ef   :  { %v6820_v63 = vpop.eup %6819  ;;  %6839 = vpow2.f32 %v1481_v62  ;;  %v1844_v56 = vadd.f32 1.0, %v6818_v9  ;;  %v1005_v62 = vld [vmem:[%s11474_s2 + $0x440] sm:$0xff]  ;;  %v1346_v9 = vsub.f32 0.0, %v1178_v54 }
 0x1f0   :  { %3003 = vperm.xlu1 %6256, %v6816_v41   ;;  %v8940_v27 = vpop.eup %6821  ;;  %6841 = vpow2.f32 %v1487_v58  ;;  %v1264_v41 = vsub.f32 0.0, %v8943_v53  ;;  %v11563_v58 = vld [vmem:[#allocation17_spill] sm:$0xff]  ;;  %v1263_v42 = vsub.f32 0.0, %v8949_v61  ;;  %v1173_v3 = vadd.f32 %v1005_v62, %v8614_v18 }
 0x1f1   :  { %3038 = vperm.xlu0 %6255, %v6820_v63   ;;  %v8946_v1 = vpop.eup %6823  ;;  %6843 = vpow2.f32 %v1637_v29  ;;  %v1098_v2 = vadd.f32 %v930_v34, %v11563_v58  ;;  %v2239_v29 = vld [vmem:[%s11475_s3 + $0x610] sm:$0xff]  ;;  %v8985_v63 = vadd.f32 %v929_v17, %v11564_v26  ;;  %v1655_v58 = vmul.f32 1.442695, %v1346_v9  ;;  %v2050_v26 = vld [vmem:[%s11475_s3 + $0x28] sm:$0xff] }
 0x1f2   :  { %v8954_v57 = vpop.eup %6825  ;;  %6845 = vrcp.f32 %v1760_v47  ;;  %v1012_v47 = vld [vmem:[%s11474_s2 + $0x478] sm:$0xff] }
 0x1f3   :  { %v2864_v45 = vpop.permute.xlu1 %2863  ;;  %v6828_v6 = vpop.eup %6827  ;;  %6847 = vrcp.f32 %v1837_v43  ;;  %v1266_v17 = vsub.f32 0.0, %v1098_v2 }
 0x1f4   :  { %2533 = vperm.xlu1 %6256, %v8681_v55   ;;  %v8969_v15 = vpop.eup %6829  ;;  %6849 = vpow2.f32 %v1651_v39  ;;  %v2237_v55 = vld [vmem:[%s11475_s3 + $0x600] sm:$0xff]  ;;  %v1839_v43 = vadd.f32 1.0, %v6828_v6  ;;  %v3414_v19 = vmul.f32 %v2864_v45, %v2238_v22  ;;  %v1491_v22 = vmul.f32 1.442695, %v1264_v41 }
 0x1f5   :  { %2568 = vperm.xlu0 %6255, %v8752_v5   ;;  %v6832_v30 = vpop.eup %6831  ;;  %6851 = vrcp.f32 %v1844_v56  ;;  %v1641_v5 = vmul.f32 1.442695, %v1339_v14  ;;  %v3413_v34 = vmul.f32 %v2864_v45, %v2237_v55  ;;  %v1341_v45 = vsub.f32 0.0, %v1173_v3 }
 0x1f6   :  { %v6834_v20 = vpop.eup %6833  ;;  %6853 = vrcp.f32 %v1759_v11  ;;  %v1180_v11 = vadd.f32 %v1012_v47, %v8667_v7  ;;  %v2049_v7 = vld [vmem:[%s11475_s3 + $0x20] sm:$0xff]  ;;  %v1489_v41 = vmul.f32 1.442695, %v1263_v42  ;;  %v1265_v42 = vsub.f32 0.0, %v8985_v63 }
 0x1f7   :  { %v2869_v53 = vpop.permute.xlu1 %2868  ;;  %v6836_v39 = vpop.eup %6835  ;;  %6855 = vpow2.f32 %v1485_v24  ;;  %v1846_v18 = vadd.f32 1.0, %v6834_v20  ;;  %v1007_v24 = vld [vmem:[%s11474_s2 + $0x450] sm:$0xff]  ;;  %v1495_v20 = vmul.f32 1.442695, %v1266_v17 }
 0x1f8   :  { %3013 = vperm.xlu1 %6256, %v6832_v30   ;;  %v8992_v54 = vpop.permute.xlu0 %2888  ;;  %v3416_v61 = vmul.f32 %v2869_v53, %v2240_v38  ;;  %v3415_v56 = vmul.f32 %v2869_v53, %v2239_v29  ;;  %v8994_v14 = vpop.eup %6837  ;;  %6857 = vpow2.f32 %v1641_v5  ;;  %v1348_v29 = vsub.f32 0.0, %v1180_v11  ;;  %v2051_v5 = vld [vmem:[%s11475_s3 + $0x30] sm:$0xff] }
 0x1f9   :  { %11565 = vst [vmem:[#allocation12_spill] sm:$0xff] %v8994_v14  ;;  %3048 = vperm.xlu0 %6255, %v6836_v39   ;;  %v8997_v60 = vpop.eup %6839  ;;  %6859 = vrcp.f32 %v1762_v49  ;;  %v932_v49 = vld [vmem:[%s11474_s2 + $0x1f8] sm:$0xff]  ;;  %v1645_v39 = vmul.f32 1.442695, %v1341_v45  ;;  %v6259_v11 = vld [vmem:[%s11476_s4 + $0x4] ss:$44 sps:$4 sm:$0xff]  }
 0x1fa   :  { %v3654_v6 = vpack.c.bf16 %v3416_v61, %v3414_v19  ;;  %v3653_v62 = vpack.c.bf16 %v3415_v56, %v3413_v34  ;;  %v8999_v30 = vpop.eup %6841  ;;  %6861 = vrcp.f32 %v1839_v43  ;;  %v1014_v43 = vld [vmem:[%s11474_s2 + $0x488] sm:$0xff]  ;;  %v1175_v19 = vadd.f32 %v1007_v24, %v8636_v59  ;;  %v931_v45 = vld [vmem:[%s11474_s2 + $0x1f0] sm:$0xff]  ;;  %4738 = vmatprep.mubr.bf16.mxu1 %v6259_v11 }
 0x1fb   :  { %v2394_v38 = vpop.permute.xlu1 %2393  ;;  %v6844_v55 = vpop.eup %6843  ;;  %6863 = vpow2.f32 %v1655_v58  ;;  %v1659_v59 = vmul.f32 1.442695, %v1348_v29 }
 0x1fc   :  { %5225 = vmatprep.subr.bf16.mxu0 %v3654_v6  ;;  %2543 = vperm.xlu1 %6256, %v8706_v13   ;;  %v9008_v2 = vpop.permute.xlu0 %2418  ;;  %v9010_v9 = vpop.eup %6845  ;;  %v2052_v13 = vld [vmem:[%s11475_s3 + $0x38] sm:$0xff]  ;;  %6865 = vrcp.f32 %v1846_v18  ;;  %v1841_v53 = vadd.f32 1.0, %v6844_v55  ;;  %v3225_v34 = vmul.f32 %v2394_v38, %v2049_v7  ;;  %v3226_v56 = vmul.f32 %v2394_v38, %v2050_v26  ;;  %v11567_v6 = vld [vmem:[#allocation19_spill] sm:$0xff]  ;;  %v1009_v55 = vld [vmem:[%s11474_s2 + $0x460] sm:$0xff] }
 0x1fd   :  { %5226 = vmatpush1.bf16.msra.mxu0 %v3653_v62  ;;  %2578 = vperm.xlu0 %6255, %v8787_v37   ;;  %v6848_v47 = vpop.eup %6847  ;;  %6867 = vpow2.f32 %v1491_v22  ;;  %v9038_v62 = vadd.f32 %v932_v49, %v11567_v6  ;;  %v1182_v22 = vadd.f32 %v1014_v43, %v8677_v50  ;;  %v1761_v50 = vadd.f32 1.0, %v8946_v1  ;;  %v2244_v49 = vld [vmem:[%s11475_s3 + $0x638] sm:$0xff] }
 0x1fe   :  { %v6850_v3 = vpop.eup %6849  ;;  %6869 = vpow2.f32 %v1489_v41  ;;  %v6262_v41 = vld [vmem:[%s11476_s4 + $0x1c] ss:$44 sps:$4 sm:$0xff]   ;;  %v1343_v26 = vsub.f32 0.0, %v1175_v19  ;;  %v11568_v19 = vld [vmem:[#allocation20_spill] sm:$0xff]  ;;  %v1177_v11 = vadd.f32 %v1009_v55, %v8646_v0 }
 0x1ff   :  { %v2399_v37 = vpop.permute.xlu1 %2398  ;;  %v6852_v61 = vpop.eup %6851  ;;  %6871 = vpow2.f32 %v1495_v20  ;;  %v1848_v38 = vadd.f32 1.0, %v6850_v3  ;;  %v2243_v20 = vld [vmem:[%s11475_s3 + $0x630] sm:$0xff]  ;;  %5257 = vmatprep.mubr.bf16.mxu0 %v6262_v41  ;;  %v2056_v6 = vld [vmem:[%s11475_s3 + $0x58] sm:$0xff] }
 0x200   :  { %v3227_v63 = vmul.f32 %v2399_v37, %v2051_v5  ;;  %v3228_v17 = vmul.f32 %v2399_v37, %v2052_v13  ;;  %3023 = vperm.xlu1 %6256, %v6848_v47   ;;  %v9030_v58 = vpop.permute.xlu0 %2898  ;;  %v9035_v18 = vpop.eup %6853  ;;  %6873 = vpow2.f32 %v1645_v39  ;;  %v2241_v5 = vld [vmem:[%s11475_s3 + $0x620] sm:$0xff]  ;;  %v2242_v13 = vld [vmem:[%s11475_s3 + $0x628] sm:$0xff]  ;;  %v1764_v39 = vadd.f32 1.0, %v8954_v57  ;;  %v1016_v57 = vld [vmem:[%s11474_s2 + $0x498] sm:$0xff] }
 0x201   :  { %11566 = vst [vmem:[#allocation13_spill] sm:$0xff] %v9035_v18  ;;  %3058 = vperm.xlu0 %6255, %v6852_v61   ;;  %v9050_v29 = vpop.eup %6855  ;;  %6875 = vrcp.f32 %v1841_v53  ;;  %v9072_v37 = vadd.f32 %v931_v45, %v11568_v19  ;;  %v1350_v61 = vsub.f32 0.0, %v1182_v22  ;;  %v934_v53 = vld [vmem:[%s11474_s2 + $0x208] sm:$0xff]  ;;  %v1184_v19 = vadd.f32 %v1016_v57, %v8695_v44  ;;  %v2245_v57 = vld [vmem:[%s11475_s3 + $0x640] sm:$0xff] }
 0x202   :  { %v3560_v24 = vpack.c.bf16 %v3228_v17, %v3226_v56  ;;  %v3559_v7 = vpack.c.bf16 %v3227_v63, %v3225_v34  ;;  %v6858_v1 = vpop.eup %6857  ;;  %6877 = vpow2.f32 %v1659_v59  ;;  %v9075_v56 = vmul.f32 1.442695, %v1265_v42  ;;  %v2055_v63 = vld [vmem:[%s11475_s3 + $0x50] sm:$0xff]  ;;  %v2053_v59 = vld [vmem:[%s11475_s3 + $0x40] sm:$0xff]  ;;  %v2054_v22 = vld [vmem:[%s11475_s3 + $0x48] sm:$0xff] }
 0x203   :  { %v2874_v47 = vpop.permute.xlu1 %2873  ;;  %v9068_v3 = vpop.eup %6859  ;;  %6879 = vrcp.f32 %v1848_v38  ;;  %v1843_v42 = vadd.f32 1.0, %v6858_v1  ;;  %v1649_v17 = vmul.f32 1.442695, %v1343_v26  ;;  %v933_v38 = vld [vmem:[%s11474_s2 + $0x200] sm:$0xff]  ;;  %v1267_v26 = vsub.f32 0.0, %v9072_v37 }
 0x204   :  { %2553 = vperm.xlu1 %6256, %v8742_v36   ;;  %4708 = vmatprep.subr.bf16.mxu1 %v3560_v24  ;;  %v9066_v43 = vpop.permute.xlu0 %2428  ;;  %v6862_v34 = vpop.eup %6861  ;;  %v1268_v36 = vsub.f32 0.0, %v9038_v62  ;;  %6881 = vrcp.f32 %v1761_v50  ;;  %v3417_v24 = vmul.f32 %v2874_v47, %v2241_v5  ;;  %v3418_v0 = vmul.f32 %v2874_v47, %v2242_v13  ;;  %v1011_v5 = vld [vmem:[%s11474_s2 + $0x470] sm:$0xff] }
 0x205   :  { %4709 = vmatpush1.bf16.msra.mxu1 %v3559_v7  ;;  %2588 = vperm.xlu0 %6255, %v8826_v35   ;;  %v6864_v35 = vpop.eup %6863  ;;  %6883 = vrcp.f32 %v1764_v39  ;;  %v1663_v1 = vmul.f32 1.442695, %v1350_v61  ;;  %v2247_v13 = vld [vmem:[%s11475_s3 + $0x650] sm:$0xff]  ;;  %v11569_v39 = vld [vmem:[#allocation21_spill] sm:$0xff]  ;;  %v1345_v44 = vsub.f32 0.0, %v1177_v11  ;;  %v3231_v61 = vmul.f32 %v8963_v48, %v2055_v63 }
 0x206   :  { %v6866_v45 = vpop.eup %6865  ;;  %v1499_v18 = vmul.f32 1.442695, %v1268_v36  ;;  %v1850_v14 = vadd.f32 1.0, %v6864_v35  ;;  %v9115_v37 = vadd.f32 %v934_v53, %v11569_v39  ;;  %6885 = vpow2.f32 %v1649_v17  ;;  %v2246_v35 = vld [vmem:[%s11475_s3 + $0x648] sm:$0xff] }
 0x207   :  { %v2879_v62 = vpop.permute.xlu1 %2878  ;;  %v9102_v50 = vpop.eup %6867  ;;  %6887 = vrcp.f32 %v1843_v42  ;;  %v3232_v53 = vmul.f32 %v8963_v48, %v2056_v6  ;;  %v9138_v48 = vmul.f32 1.442695, %v1267_v26  ;;  %v3423_v26 = vmul.f32 %v8992_v54, %v2247_v13 }
 0x208   :  { %v3419_v55 = vmul.f32 %v2879_v62, %v2243_v20  ;;  %v3420_v7 = vmul.f32 %v2879_v62, %v2244_v49  ;;  %3033 = vperm.xlu1 %6256, %v6862_v34   ;;  %v9100_v41 = vpop.permute.xlu0 %2908  ;;  %v9112_v49 = vpop.eup %6869  ;;  %v2248_v34 = vld [vmem:[%s11475_s3 + $0x658] sm:$0xff]  ;;  %6889 = vpow2.f32 %v1663_v1  ;;  %v1270_v13 = vsub.f32 0.0, %v9115_v37 }
 0x209   :  { %3068 = vperm.xlu0 %6255, %v6866_v45   ;;  %v9127_v62 = vpop.eup %6871  ;;  %6891 = vrcp.f32 %v1850_v14  ;;  %v2060_v14 = vld [vmem:[%s11475_s3 + $0x78] sm:$0xff]  ;;  %v3424_v39 = vmul.f32 %v8992_v54, %v2248_v34  ;;  %v1013_v34 = vld [vmem:[%s11474_s2 + $0x480] sm:$0xff] }
 0x20a   :  { %v3656_v47 = vpack.c.bf16 %v3420_v7, %v3418_v0  ;;  %v3655_v20 = vpack.c.bf16 %v3419_v55, %v3417_v24  ;;  %v6874_v45 = vpop.eup %6873  ;;  %v1763_v24 = vadd.f32 1.0, %v8997_v60  ;;  %v11570_v0 = vld [vmem:[#allocation22_spill] sm:$0xff]  ;;  %v1352_v7 = vsub.f32 0.0, %v1184_v19  ;;  %v2059_v60 = vld [vmem:[%s11475_s3 + $0x70] sm:$0xff] }
 0x20b   :  { %v2404_v36 = vpop.permute.xlu1 %2403  ;;  %v9135_v55 = vadd.f32 %v933_v38, %v11570_v0  ;;  %v6876_v42 = vpop.eup %6875  ;;  %6893 = vpow2.f32 %v9075_v56  ;;  %v1653_v38 = vmul.f32 1.442695, %v1345_v44  ;;  %v2057_v19 = vld [vmem:[%s11475_s3 + $0x60] sm:$0xff] }
 0x20c   :  { %v3229_v17 = vmul.f32 %v2404_v36, %v2053_v59  ;;  %v3230_v63 = vmul.f32 %v2404_v36, %v2054_v22  ;;  %5227 = vmatprep.subr.bf16.mxu0 %v3656_v47  ;;  %2563 = vperm.xlu1 %6256, %v8778_v46   ;;  %v9131_v11 = vpop.permute.xlu0 %2438  ;;  %v1018_v46 = vld [vmem:[%s11474_s2 + $0x4a8] sm:$0xff]  ;;  %v6878_v22 = vpop.eup %6877  ;;  %6895 = vpow2.f32 %v1499_v18  ;;  %v1667_v44 = vmul.f32 1.442695, %v1352_v7  ;;  %v2251_v18 = vld [vmem:[%s11475_s3 + $0x670] sm:$0xff]  ;;  %v2249_v0 = vld [vmem:[%s11475_s3 + $0x660] sm:$0xff] }
 0x20d   :  { %5228 = vmatpush1.bf16.msra.mxu0 %v3655_v20  ;;  %2598 = vperm.xlu0 %6255, %v8861_v33   ;;  %v1179_v33 = vadd.f32 %v1011_v5, %v8669_v8  ;;  %v6880_v47 = vpop.eup %6879  ;;  %v1845_v20 = vadd.f32 1.0, %v6874_v45  ;;  %v1186_v36 = vadd.f32 %v1018_v46, %v8712_v4  ;;  %6897 = vrcp.f32 %v1763_v24  ;;  %v2252_v45 = vld [vmem:[%s11475_s3 + $0x678] sm:$0xff] }
 0x20e   :  { %v3562_v6 = vpack.c.bf16 %v3232_v53, %v3230_v63  ;;  %v3561_v59 = vpack.c.bf16 %v3231_v61, %v3229_v17  ;;  %v9158_v5 = vpop.eup %6881  ;;  %v2058_v53 = vld [vmem:[%s11475_s3 + $0x68] sm:$0xff]  ;;  %v1852_v54 = vadd.f32 1.0, %v6878_v22  ;;  %v1766_v4 = vadd.f32 1.0, %v8999_v30 }
 0x20f   :  { %v2884_v1 = vpop.permute.xlu1 %2883  ;;  %6899 = vpow2.f32 %v1653_v38  ;;  %v1347_v17 = vsub.f32 0.0, %v1179_v33  ;;  %v3235_v63 = vmul.f32 %v9008_v2, %v2059_v60  ;;  %v3236_v7 = vmul.f32 %v9008_v2, %v2060_v14  ;;  %v2250_v22 = vld [vmem:[%s11475_s3 + $0x668] sm:$0xff]  ;;  %v2063_v33 = vld [vmem:[%s11475_s3 + $0x90] sm:$0xff] }
 0x210   :  { %v3421_v61 = vmul.f32 %v2884_v1, %v2245_v57  ;;  %v3422_v56 = vmul.f32 %v2884_v1, %v2246_v35  ;;  %3043 = vperm.xlu1 %6256, %v6876_v42   ;;  %4710 = vmatprep.subr.bf16.mxu1 %v3562_v6  ;;  %v9156_v8 = vpop.permute.xlu0 %2918  ;;  %v9171_v35 = vpop.eup %6883  ;;  %6901 = vrcp.f32 %v1845_v20  ;;  %v1269_v6 = vsub.f32 0.0, %v9135_v55  ;;  %v1020_v55 = vld [vmem:[%s11474_s2 + $0x4b8] sm:$0xff] }
 0x211   :  { %4711 = vmatpush1.bf16.msra.mxu1 %v3561_v59  ;;  %3078 = vperm.xlu0 %6255, %v6880_v47   ;;  %v6886_v60 = vpop.eup %6885  ;;  %6903 = vpow2.f32 %v1667_v44  ;;  %v1354_v59 = vsub.f32 0.0, %v1186_v36  ;;  %v1503_v38 = vmul.f32 1.442695, %v1270_v13  ;;  %v3427_v47 = vmul.f32 %v9030_v58, %v2251_v18  ;;  %v2064_v20 = vld [vmem:[%s11475_s3 + $0x98] sm:$0xff] }
 0x212   :  { %v3658_v37 = vpack.c.bf16 %v3424_v39, %v3422_v56  ;;  %v3657_v57 = vpack.c.bf16 %v3423_v26, %v3421_v61  ;;  %v6888_v2 = vpop.eup %6887  ;;  %6905 = vrcp.f32 %v1852_v54  ;;  %v2061_v61 = vld [vmem:[%s11475_s3 + $0x80] sm:$0xff]  ;;  %v1847_v13 = vadd.f32 1.0, %v6886_v60 }
 0x213   :  { %v2414_v24 = vpop.permute.xlu1 %2413  ;;  %v6890_v1 = vpop.eup %6889  ;;  %6907 = vrcp.f32 %v1766_v4  ;;  %v3428_v44 = vmul.f32 %v9030_v58, %v2252_v45  ;;  %v2062_v58 = vld [vmem:[%s11475_s3 + $0x88] sm:$0xff]  ;;  %v935_v4 = vld [vmem:[%s11474_s2 + $0x210] sm:$0xff] }
 0x214   :  { %v3233_v42 = vmul.f32 %v2414_v24, %v2057_v19  ;;  %v3234_v46 = vmul.f32 %v2414_v24, %v2058_v53  ;;  %2573 = vperm.xlu1 %6256, %v8793_v28   ;;  %5229 = vmatprep.subr.bf16.mxu0 %v3658_v37  ;;  %v9183_v30 = vpop.permute.xlu0 %2448  ;;  %v936_v28 = vld [vmem:[%s11474_s2 + $0x218] sm:$0xff]  ;;  %v1181_v19 = vadd.f32 %v1013_v34, %v8679_v25  ;;  %v6892_v56 = vpop.eup %6891  ;;  %6909 = vpow2.f32 %v9138_v48  ;;  %v11571_v34 = vld [vmem:[#allocation23_spill] sm:$0xff]  ;;  %v1015_v48 = vld [vmem:[%s11474_s2 + $0x490] sm:$0xff] }
 0x215   :  { %5230 = vmatpush1.bf16.msra.mxu0 %v3657_v57  ;;  %2608 = vperm.xlu0 %6255, %v8902_v12   ;;  %v1657_v12 = vmul.f32 1.442695, %v1347_v17  ;;  %v9210_v54 = vpop.eup %6893  ;;  %v9214_v18 = vadd.f32 %v936_v28, %v11571_v34  ;;  %v1671_v37 = vmul.f32 1.442695, %v1354_v59  ;;  %v1188_v57 = vadd.f32 %v1020_v55, %v8734_v40  ;;  %v2255_v40 = vld [vmem:[%s11475_s3 + $0x690] sm:$0xff]  ;;  %v2253_v59 = vld [vmem:[%s11475_s3 + $0x680] sm:$0xff] }
 0x216   :  { %v3564_v26 = vpack.c.bf16 %v3236_v7, %v3234_v46  ;;  %v3563_v14 = vpack.c.bf16 %v3235_v63, %v3233_v42  ;;  %6911 = vpow2.f32 %v1503_v38  ;;  %v1854_v17 = vadd.f32 1.0, %v6890_v1  ;;  %v9229_v24 = vpop.eup %6895  ;;  %v2256_v46 = vld [vmem:[%s11475_s3 + $0x698] sm:$0xff]  ;;  %v2065_v34 = vld [vmem:[%s11475_s3 + $0xa0] sm:$0xff] }
 0x217   :  { %v2894_v39 = vpop.permute.xlu1 %2893  ;;  %6913 = vpow2.f32 %v1657_v12  ;;  %v1349_v7 = vsub.f32 0.0, %v1181_v19  ;;  %v3239_v42 = vmul.f32 %v9066_v43, %v2063_v33  ;;  %v1765_v33 = vadd.f32 1.0, %v9050_v29  ;;  %v1022_v29 = vld [vmem:[%s11474_s2 + $0x4c8] sm:$0xff]  ;;  %v2067_v19 = vld [vmem:[%s11475_s3 + $0xb0] sm:$0xff] }
 0x218   :  { %v3425_v36 = vmul.f32 %v2894_v39, %v2249_v0  ;;  %v3426_v53 = vmul.f32 %v2894_v39, %v2250_v22  ;;  %3053 = vperm.xlu1 %6256, %v6888_v2   ;;  %4712 = vmatprep.subr.bf16.mxu1 %v3564_v26  ;;  %v9208_v25 = vpop.permute.xlu0 %2928  ;;  %v1501_v0 = vmul.f32 1.442695, %v1269_v6  ;;  %v9238_v22 = vpop.eup %6897  ;;  %6915 = vrcp.f32 %v1847_v13  ;;  %v11572_v26 = vld [vmem:[#allocation24_spill] sm:$0xff]  ;;  %v11573_v13 = vld [vmem:[#allocation54_spill] sm:$0xff] }
 0x219   :  { %4713 = vmatpush1.bf16.msra.mxu1 %v3563_v14  ;;  %3088 = vperm.xlu0 %6255, %v6892_v56   ;;  %v3240_v2 = vmul.f32 %v9066_v43, %v2064_v20  ;;  %v6900_v55 = vpop.eup %6899  ;;  %v9246_v14 = vadd.f32 %v935_v4, %v11572_v26  ;;  %6917 = vpow2.f32 %v1671_v37  ;;  %v1356_v1 = vsub.f32 0.0, %v1188_v57  ;;  %v2254_v43 = vld [vmem:[%s11475_s3 + $0x688] sm:$0xff] }
 0x21a   :  { %v3660_v63 = vpack.c.bf16 %v3428_v44, %v3426_v53  ;;  %v3659_v45 = vpack.c.bf16 %v3427_v47, %v3425_v36  ;;  %v6902_v12 = vpop.eup %6901  ;;  %6919 = vrcp.f32 %v1854_v17  ;;  %v1661_v56 = vmul.f32 1.442695, %v1349_v7  ;;  %v2068_v36 = vld [vmem:[%s11475_s3 + $0xb8] sm:$0xff]  ;;  %v1017_v7 = vld [vmem:[%s11474_s2 + $0x4a0] sm:$0xff] }
 0x21b   :  { %v2424_v60 = vpop.permute.xlu1 %2423  ;;  %v6904_v39 = vpop.eup %6903  ;;  %v3431_v44 = vmul.f32 %v9100_v41, %v2255_v40  ;;  %v1849_v37 = vadd.f32 1.0, %v6900_v55  ;;  %v3432_v57 = vmul.f32 %v9100_v41, %v2256_v46  ;;  %6921 = vrcp.f32 %v1765_v33  ;;  %v2257_v55 = vld [vmem:[%s11475_s3 + $0x6a0] sm:$0xff] }
 0x21c   :  { %v3237_v38 = vmul.f32 %v2424_v60, %v2061_v61  ;;  %v3238_v6 = vmul.f32 %v2424_v60, %v2062_v58  ;;  %2583 = vperm.xlu1 %6256, %v8842_v32   ;;  %5231 = vmatprep.subr.bf16.mxu0 %v3660_v63  ;;  %v9242_v28 = vpop.permute.xlu0 %2458  ;;  %v1272_v32 = vsub.f32 0.0, %v9214_v18  ;;  %v1768_v61 = vadd.f32 1.0, %v9102_v50  ;;  %v6906_v18 = vpop.eup %6905 }
 0x21d   :  { %5232 = vmatpush1.bf16.msra.mxu0 %v3659_v45  ;;  %2618 = vperm.xlu0 %6255, %v8920_v31   ;;  %v1183_v31 = vadd.f32 %v1015_v48, %v11573_v13  ;;  %v9271_v17 = vpop.eup %6907  ;;  %v1271_v48 = vsub.f32 0.0, %v9246_v14  ;;  %v1675_v40 = vmul.f32 1.442695, %v1356_v1  ;;  %v1190_v63 = vadd.f32 %v1022_v29, %v8748_v10  ;;  %v2066_v45 = vld [vmem:[%s11475_s3 + $0xa8] sm:$0xff]  ;;  %v2075_v14 = vld [vmem:[%s11475_s3 + $0xf0] sm:$0xff] }
 0x21e   :  { %v3566_v47 = vpack.c.bf16 %v3240_v2, %v3238_v6  ;;  %v3565_v20 = vpack.c.bf16 %v3239_v42, %v3237_v38  ;;  %6923 = vpow2.f32 %v1501_v0  ;;  %v1856_v41 = vadd.f32 1.0, %v6904_v39  ;;  %v2259_v42 = vld [vmem:[%s11475_s3 + $0x6b0] sm:$0xff]  ;;  %v2260_v0 = vld [vmem:[%s11475_s3 + $0x6b8] sm:$0xff] }
 0x21f   :  { %v2904_v53 = vpop.permute.xlu1 %2903  ;;  %v1767_v10 = vadd.f32 1.0, %v9112_v49  ;;  %6925 = vpow2.f32 %v1661_v56  ;;  %v1351_v2 = vsub.f32 0.0, %v1183_v31  ;;  %v3243_v38 = vmul.f32 %v9131_v11, %v2067_v19  ;;  %v1024_v39 = vld [vmem:[%s11474_s2 + $0x4d8] sm:$0xff] }
 0x220   :  { %v3429_v58 = vmul.f32 %v2904_v53, %v2253_v59  ;;  %v3430_v50 = vmul.f32 %v2904_v53, %v2254_v43  ;;  %3063 = vperm.xlu1 %6256, %v6902_v12   ;;  %4714 = vmatprep.subr.bf16.mxu1 %v3566_v47  ;;  %v9269_v4 = vpop.permute.xlu0 %2938  ;;  %v9284_v59 = vpop.eup %6909  ;;  %6927 = vrcp.f32 %v1849_v37  ;;  %v3244_v26 = vmul.f32 %v9131_v11, %v2068_v36  ;;  %v2258_v47 = vld [vmem:[%s11475_s3 + $0x6a8] sm:$0xff]  ;;  %v2069_v37 = vld [vmem:[%s11475_s3 + $0xc0] sm:$0xff] }
 0x221   :  { %4715 = vmatpush1.bf16.msra.mxu1 %v3565_v20  ;;  %3098 = vperm.xlu0 %6255, %v6906_v18   ;;  %v9294_v33 = vpop.eup %6911  ;;  %v9300_v29 = vmul.f32 1.442695, %v1272_v32  ;;  %6929 = vpow2.f32 %v1675_v40  ;;  %v1358_v19 = vsub.f32 0.0, %v1190_v63  ;;  %v1770_v20 = vadd.f32 1.0, %v9127_v62  ;;  %v937_v32 = vld [vmem:[%s11474_s2 + $0x220] sm:$0xff] }
 0x222   :  { %v3662_v46 = vpack.c.bf16 %v3432_v57, %v3430_v50  ;;  %v3661_v60 = vpack.c.bf16 %v3431_v44, %v3429_v58  ;;  %v6914_v12 = vpop.eup %6913  ;;  %6931 = vrcp.f32 %v1856_v41  ;;  %v1665_v31 = vmul.f32 1.442695, %v1351_v2  ;;  %v11574_v44 = vld [vmem:[#allocation55_spill] sm:$0xff] }
 0x223   :  { %v2434_v6 = vpop.permute.xlu1 %2433  ;;  %v6916_v11 = vpop.eup %6915  ;;  %6933 = vrcp.f32 %v1768_v61  ;;  %v1185_v36 = vadd.f32 %v1017_v7, %v11574_v44  ;;  %v3435_v53 = vmul.f32 %v9156_v8, %v2259_v42  ;;  %v1851_v58 = vadd.f32 1.0, %v6914_v12  ;;  %v2261_v12 = vld [vmem:[%s11475_s3 + $0x6c0] sm:$0xff] }
 0x224   :  { %v3241_v1 = vmul.f32 %v2434_v6, %v2065_v34  ;;  %v3242_v49 = vmul.f32 %v2434_v6, %v2066_v45  ;;  %2593 = vperm.xlu1 %6256, %v8875_v23   ;;  %5233 = vmatprep.subr.bf16.mxu0 %v3662_v46  ;;  %v9298_v43 = vpop.permute.xlu0 %2468  ;;  %v938_v23 = vld [vmem:[%s11474_s2 + $0x228] sm:$0xff]  ;;  %v6918_v62 = vpop.eup %6917  ;;  %v2072_v34 = vld [vmem:[%s11475_s3 + $0xd8] sm:$0xff]  ;;  %v3436_v50 = vmul.f32 %v9156_v8, %v2260_v0  ;;  %6935 = vrcp.f32 %v1767_v10  ;;  %v2263_v10 = vld [vmem:[%s11475_s3 + $0x6d0] sm:$0xff] }
 0x225   :  { %5234 = vmatpush1.bf16.msra.mxu0 %v3661_v60  ;;  %2628 = vperm.xlu0 %6255, %v8969_v15   ;;  %v2071_v15 = vld [vmem:[%s11475_s3 + $0xd0] sm:$0xff]  ;;  %v6920_v57 = vpop.eup %6919  ;;  %v11575_v45 = vld [vmem:[#allocation25_spill] sm:$0xff]  ;;  %v1679_v7 = vmul.f32 1.442695, %v1358_v19  ;;  %v1192_v42 = vadd.f32 %v1024_v39, %v8771_v16  ;;  %v2070_v46 = vld [vmem:[%s11475_s3 + $0xc8] sm:$0xff]  ;;  %6937 = vrcp.f32 %v1770_v20  ;;  %v1858_v8 = vadd.f32 1.0, %v6918_v62 }
 0x226   :  { %v3568_v56 = vpack.c.bf16 %v3244_v26, %v3242_v49  ;;  %v3567_v13 = vpack.c.bf16 %v3243_v38, %v3241_v1  ;;  %v9331_v41 = vadd.f32 %v938_v23, %v11575_v45  ;;  %v1019_v60 = vld [vmem:[%s11474_s2 + $0x4b0] sm:$0xff]  ;;  %v9343_v0 = vpop.eup %6921  ;;  %v11576_v16 = vld [vmem:[#allocation26_spill] sm:$0xff]  ;;  %6939 = vpow2.f32 %v1665_v31  ;;  %v2264_v1 = vld [vmem:[%s11475_s3 + $0x6d8] sm:$0xff] }
 0x227   :  { %v2914_v18 = vpop.permute.xlu1 %2913  ;;  %v9346_v6 = vadd.f32 %v937_v32, %v11576_v16  ;;  %v3247_v26 = vmul.f32 %v9183_v30, %v2071_v15  ;;  %6941 = vrcp.f32 %v1851_v58  ;;  %v1505_v39 = vmul.f32 1.442695, %v1271_v48 }
 0x228   :  { %v3433_v40 = vmul.f32 %v2914_v18, %v2257_v55  ;;  %v3434_v61 = vmul.f32 %v2914_v18, %v2258_v47  ;;  %3073 = vperm.xlu1 %6256, %v6916_v11   ;;  %4716 = vmatprep.subr.bf16.mxu1 %v3568_v56  ;;  %v9328_v63 = vpop.permute.xlu0 %2948  ;;  %v1353_v55 = vsub.f32 0.0, %v1185_v36  ;;  %v9355_v19 = vpop.eup %6923  ;;  %v3248_v47 = vmul.f32 %v9183_v30, %v2072_v34  ;;  %v2262_v56 = vld [vmem:[%s11475_s3 + $0x6c8] sm:$0xff]  ;;  %v2076_v34 = vld [vmem:[%s11475_s3 + $0xf8] sm:$0xff] }
 0x229   :  { %4717 = vmatpush1.bf16.msra.mxu1 %v3567_v13  ;;  %3108 = vperm.xlu0 %6255, %v6920_v57   ;;  %v6926_v32 = vpop.eup %6925  ;;  %6943 = vpow2.f32 %v1679_v7  ;;  %v1360_v15 = vsub.f32 0.0, %v1192_v42  ;;  %v1274_v13 = vsub.f32 0.0, %v9331_v41  ;;  %v1273_v44 = vsub.f32 0.0, %v9346_v6  ;;  %v2268_v6 = vld [vmem:[%s11475_s3 + $0x6f8] sm:$0xff] }
 0x22a   :  { %v3664_v2 = vpack.c.bf16 %v3436_v50, %v3434_v61  ;;  %v3663_v38 = vpack.c.bf16 %v3435_v53, %v3433_v40  ;;  %v6928_v30 = vpop.eup %6927  ;;  %6945 = vrcp.f32 %v1858_v8  ;;  %v1669_v36 = vmul.f32 1.442695, %v1353_v55 }
 0x22b   :  { %v2444_v49 = vpop.permute.xlu1 %2443  ;;  %v6930_v31 = vpop.eup %6929  ;;  %v3439_v53 = vmul.f32 %v9208_v25, %v2263_v10  ;;  %v1853_v58 = vadd.f32 1.0, %v6926_v32  ;;  %v3440_v50 = vmul.f32 %v9208_v25, %v2264_v1  ;;  %v1769_v41 = vadd.f32 1.0, %v9210_v54  ;;  %v2074_v25 = vld [vmem:[%s11475_s3 + $0xe8] sm:$0xff]  ;;  %v1021_v54 = vld [vmem:[%s11474_s2 + $0x4c0] sm:$0xff] }
 0x22c   :  { %v3245_v11 = vmul.f32 %v2444_v49, %v2069_v37  ;;  %v3246_v20 = vmul.f32 %v2444_v49, %v2070_v46  ;;  %2603 = vperm.xlu1 %6256, %v8918_v52   ;;  %5235 = vmatprep.subr.bf16.mxu0 %v3664_v2  ;;  %v9359_v23 = vpop.permute.xlu0 %2478  ;;  %v1026_v52 = vld [vmem:[%s11474_s2 + $0x4e8] sm:$0xff]  ;;  %v2073_v37 = vld [vmem:[%s11475_s3 + $0xe0] sm:$0xff]  ;;  %v6932_v57 = vpop.eup %6931  ;;  %6947 = vpow2.f32 %v9300_v29  ;;  %v1683_v7 = vmul.f32 1.442695, %v1360_v15  ;;  %v940_v46 = vld [vmem:[%s11474_s2 + $0x238] sm:$0xff] }
 0x22d   :  { %5236 = vmatpush1.bf16.msra.mxu0 %v3663_v38  ;;  %2638 = vperm.xlu0 %6255, %v9010_v9   ;;  %v1187_v9 = vadd.f32 %v1019_v60, %v8736_v21  ;;  %v9386_v45 = vpop.eup %6933  ;;  %v1194_v42 = vadd.f32 %v1026_v52, %v8783_v51  ;;  %6949 = vpow2.f32 %v1505_v39  ;;  %v1860_v8 = vadd.f32 1.0, %v6930_v31  ;;  %v2267_v51 = vld [vmem:[%s11475_s3 + $0x6f0] sm:$0xff]  ;;  %v11577_v39 = vld [vmem:[#allocation27_spill] sm:$0xff]  ;;  %v11578_v31 = vld [vmem:[#allocation2_spill] sm:$0xff] }
 0x22e   :  { %v3570_v48 = vpack.c.bf16 %v3248_v47, %v3246_v20  ;;  %v3569_v62 = vpack.c.bf16 %v3247_v26, %v3245_v11  ;;  %v9403_v10 = vpop.eup %6935  ;;  %v1511_v2 = vmul.f32 1.442695, %v1274_v13  ;;  %6951 = vpow2.f32 %v1669_v36  ;;  %v2265_v26 = vld [vmem:[%s11475_s3 + $0x6e0] sm:$0xff] }
 0x22f   :  { %v2924_v18 = vpop.permute.xlu1 %2923  ;;  %v1355_v38 = vsub.f32 0.0, %v1187_v9  ;;  %v3251_v16 = vmul.f32 %v9242_v28, %v2075_v14  ;;  %v9412_v1 = vpop.eup %6937  ;;  %6953 = vrcp.f32 %v1853_v58  ;;  %v3252_v49 = vmul.f32 %v9242_v28, %v2076_v34 }
 0x230   :  { %v3437_v40 = vmul.f32 %v2924_v18, %v2261_v12  ;;  %v3438_v61 = vmul.f32 %v2924_v18, %v2262_v56  ;;  %3083 = vperm.xlu1 %6256, %v6928_v30   ;;  %4718 = vmatprep.subr.bf16.mxu1 %v3570_v48  ;;  %v9384_v21 = vpop.permute.xlu0 %2958  ;;  %v6940_v20 = vpop.eup %6939  ;;  %v1772_v32 = vadd.f32 1.0, %v9229_v24  ;;  %v1108_v15 = vadd.f32 %v940_v46, %v11577_v39  ;;  %v2266_v30 = vld [vmem:[%s11475_s3 + $0x6e8] sm:$0xff]  ;;  %v2079_v24 = vld [vmem:[%s11475_s3 + $0x110] sm:$0xff] }
 0x231   :  { %4719 = vmatpush1.bf16.msra.mxu1 %v3569_v62  ;;  %3118 = vperm.xlu0 %6255, %v6932_v57   ;;  %6955 = vpow2.f32 %v1683_v7  ;;  %v1362_v56 = vsub.f32 0.0, %v1194_v42  ;;  %v6942_v28 = vpop.eup %6941  ;;  %v9424_v13 = vmul.f32 1.442695, %v1273_v44  ;;  %v1673_v62 = vmul.f32 1.442695, %v1355_v38  ;;  %v2080_v44 = vld [vmem:[%s11475_s3 + $0x118] sm:$0xff] }
 0x232   :  { %v3666_v29 = vpack.c.bf16 %v3440_v50, %v3438_v61  ;;  %v3665_v60 = vpack.c.bf16 %v3439_v53, %v3437_v40  ;;  %6957 = vrcp.f32 %v1860_v8  ;;  %v1189_v36 = vadd.f32 %v1021_v54, %v11578_v31  ;;  %v2077_v53 = vld [vmem:[%s11475_s3 + $0x100] sm:$0xff]  ;;  %v939_v18 = vld [vmem:[%s11474_s2 + $0x230] sm:$0xff]  ;;  %v11579_v7 = vld [vmem:[#allocation5_spill] sm:$0xff] }
 0x233   :  { %v2454_v55 = vpop.permute.xlu1 %2453  ;;  %v6944_v48 = vpop.eup %6943  ;;  %6959 = vrcp.f32 %v1769_v41  ;;  %v3444_v57 = vmul.f32 %v9269_v4, %v2268_v6  ;;  %v1276_v61 = vsub.f32 0.0, %v1108_v15  ;;  %v1687_v41 = vmul.f32 1.442695, %v1362_v56  ;;  %v1023_v8 = vld [vmem:[%s11474_s2 + $0x4d0] sm:$0xff]  ;;  %v2272_v6 = vld [vmem:[%s11475_s3 + $0x718] sm:$0xff] }
 0x234   :  { %v3249_v12 = vmul.f32 %v2454_v55, %v2073_v37  ;;  %v3250_v47 = vmul.f32 %v2454_v55, %v2074_v25  ;;  %2613 = vperm.xlu1 %6256, %v8940_v27   ;;  %5237 = vmatprep.subr.bf16.mxu0 %v3666_v29  ;;  %v9416_v11 = vpop.permute.xlu0 %2488  ;;  %v1028_v27 = vld [vmem:[%s11474_s2 + $0x4f8] sm:$0xff]  ;;  %v6946_v34 = vpop.eup %6945  ;;  %v1855_v37 = vadd.f32 1.0, %v6940_v20  ;;  %6961 = vrcp.f32 %v1772_v32  ;;  %v2078_v25 = vld [vmem:[%s11475_s3 + $0x108] sm:$0xff]  ;;  %v2271_v54 = vld [vmem:[%s11475_s3 + $0x710] sm:$0xff] }
 0x235   :  { %5238 = vmatpush1.bf16.msra.mxu0 %v3665_v60  ;;  %2648 = vperm.xlu0 %6255, %v9068_v3   ;;  %v3443_v3 = vmul.f32 %v9269_v4, %v2267_v51  ;;  %v1196_v42 = vadd.f32 %v1028_v27, %v11579_v7  ;;  %6963 = vpow2.f32 %v1511_v2  ;;  %v942_v4 = vld [vmem:[%s11474_s2 + $0x248] sm:$0xff]  ;;  %v1862_v46 = vadd.f32 1.0, %v6944_v48  ;;  %v11580_v20 = vld [vmem:[#allocation12_spill] sm:$0xff] }
 0x236   :  { %v3572_v52 = vpack.c.bf16 %v3252_v49, %v3250_v47  ;;  %v3571_v14 = vpack.c.bf16 %v3251_v16, %v3249_v12  ;;  %v9459_v60 = vpop.eup %6947  ;;  %v1771_v38 = vadd.f32 1.0, %v9284_v59  ;;  %6965 = vpow2.f32 %v1673_v62  ;;  %v11581_v56 = vld [vmem:[#allocation28_spill] sm:$0xff]  ;;  %v2270_v27 = vld [vmem:[%s11475_s3 + $0x708] sm:$0xff] }
 0x237   :  { %v2934_v9 = vpop.permute.xlu1 %2933  ;;  %v1357_v2 = vsub.f32 0.0, %v1189_v36  ;;  %v3255_v16 = vmul.f32 %v9298_v43, %v2079_v24  ;;  %v9469_v49 = vpop.eup %6949  ;;  %6967 = vrcp.f32 %v1855_v37  ;;  %v3256_v12 = vmul.f32 %v9298_v43, %v2080_v44  ;;  %v11582_v24 = vld [vmem:[#allocation29_spill] sm:$0xff] }
 0x238   :  { %v3441_v58 = vmul.f32 %v2934_v9, %v2265_v26  ;;  %v3442_v50 = vmul.f32 %v2934_v9, %v2266_v30  ;;  %3093 = vperm.xlu1 %6256, %v6942_v28   ;;  %4720 = vmatprep.subr.bf16.mxu1 %v3572_v52  ;;  %v9444_v40 = vpop.permute.xlu0 %2968  ;;  %v2269_v26 = vld [vmem:[%s11475_s3 + $0x700] sm:$0xff]  ;;  %v6952_v39 = vpop.eup %6951  ;;  %v9475_v15 = vmul.f32 1.442695, %v1276_v61  ;;  %v1107_v30 = vadd.f32 %v939_v18, %v11581_v56 }
 0x239   :  { %4721 = vmatpush1.bf16.msra.mxu1 %v3571_v14  ;;  %3128 = vperm.xlu0 %6255, %v6946_v34   ;;  %6969 = vpow2.f32 %v1687_v41  ;;  %v1364_v28 = vsub.f32 0.0, %v1196_v42  ;;  %v6954_v43 = vpop.eup %6953  ;;  %v1110_v52 = vadd.f32 %v942_v4, %v11582_v24  ;;  %v2083_v14 = vld [vmem:[%s11475_s3 + $0x130] sm:$0xff]  ;;  %v1677_v36 = vmul.f32 1.442695, %v1357_v2  ;;  %v2081_v34 = vld [vmem:[%s11475_s3 + $0x120] sm:$0xff]  ;;  %v2082_v42 = vld [vmem:[%s11475_s3 + $0x128] sm:$0xff] }
 0x23a   :  { %v3668_v51 = vpack.c.bf16 %v3444_v57, %v3442_v50  ;;  %v3667_v29 = vpack.c.bf16 %v3443_v3, %v3441_v58  ;;  %6971 = vrcp.f32 %v1862_v46  ;;  %v11583_v3 = vld [vmem:[#allocation3_spill] sm:$0xff]  ;;  %v3447_v9 = vmul.f32 %v9328_v63, %v2271_v54  ;;  %v1025_v46 = vld [vmem:[%s11474_s2 + $0x4e0] sm:$0xff] }
 0x23b   :  { %v2464_v55 = vpop.permute.xlu1 %2463  ;;  %v6956_v31 = vpop.eup %6955  ;;  %6973 = vpow2.f32 %v9424_v13  ;;  %v1191_v44 = vadd.f32 %v1023_v8, %v11583_v3  ;;  %v1857_v37 = vadd.f32 1.0, %v6952_v39  ;;  %v3448_v57 = vmul.f32 %v9328_v63, %v2272_v6  ;;  %v941_v63 = vld [vmem:[%s11474_s2 + $0x240] sm:$0xff]  ;;  %v2275_v8 = vld [vmem:[%s11475_s3 + $0x730] sm:$0xff]  ;;  %v2276_v6 = vld [vmem:[%s11475_s3 + $0x738] sm:$0xff] }
 0x23c   :  { %v3253_v47 = vmul.f32 %v2464_v55, %v2077_v53  ;;  %v3254_v59 = vmul.f32 %v2464_v55, %v2078_v25  ;;  %2623 = vperm.xlu1 %6256, %v11580_v20   ;;  %5239 = vmatprep.subr.bf16.mxu0 %v3668_v51  ;;  %v9473_v32 = vpop.permute.xlu0 %2498  ;;  %v6958_v18 = vpop.eup %6957  ;;  %6975 = vrcp.f32 %v1771_v38  ;;  %v1275_v41 = vsub.f32 0.0, %v1107_v30  ;;  %v11584_v20 = vld [vmem:[#allocation13_spill] sm:$0xff] }
 0x23d   :  { %5240 = vmatpush1.bf16.msra.mxu0 %v3667_v29  ;;  %2658 = vperm.xlu0 %6255, %v9171_v35   ;;  %v2084_v35 = vld [vmem:[%s11475_s3 + $0x138] sm:$0xff]  ;;  %v9498_v61 = vpop.eup %6959  ;;  %v1691_v7 = vmul.f32 1.442695, %v1364_v28  ;;  %v1278_v25 = vsub.f32 0.0, %v1110_v52  ;;  %v1864_v4 = vadd.f32 1.0, %v6956_v31  ;;  %v1774_v38 = vadd.f32 1.0, %v9294_v33 }
 0x23e   :  { %v3574_v48 = vpack.c.bf16 %v3256_v12, %v3254_v59  ;;  %v3573_v62 = vpack.c.bf16 %v3255_v16, %v3253_v47  ;;  %v9512_v29 = vpop.eup %6961  ;;  %6977 = vpow2.f32 %v1677_v36  ;;  %v1359_v2 = vsub.f32 0.0, %v1191_v44  ;;  %v11585_v28 = vld [vmem:[#allocation30_spill] sm:$0xff]  ;;  %v944_v52 = vld [vmem:[%s11474_s2 + $0x258] sm:$0xff]  ;;  %v11586_v44 = vld [vmem:[#allocation4_spill] sm:$0xff] }
 0x23f   :  { %v2944_v53 = vpop.permute.xlu1 %2943  ;;  %v3259_v16 = vmul.f32 %v9359_v23, %v2083_v14  ;;  %v9522_v12 = vpop.eup %6963  ;;  %6979 = vrcp.f32 %v1857_v37  ;;  %v3260_v47 = vmul.f32 %v9359_v23, %v2084_v35  ;;  %v9528_v30 = vmul.f32 1.442695, %v1275_v41  ;;  %v943_v14 = vld [vmem:[%s11474_s2 + $0x250] sm:$0xff] }
 0x240   :  { %v3445_v58 = vmul.f32 %v2944_v53, %v2269_v26  ;;  %v3446_v13 = vmul.f32 %v2944_v53, %v2270_v27  ;;  %3103 = vperm.xlu1 %6256, %v6954_v43   ;;  %4722 = vmatprep.subr.bf16.mxu1 %v3574_v48  ;;  %v9496_v50 = vpop.permute.xlu0 %2978  ;;  %v2273_v26 = vld [vmem:[%s11475_s3 + $0x720] sm:$0xff]  ;;  %v6966_v56 = vpop.eup %6965  ;;  %v1109_v27 = vadd.f32 %v941_v63, %v11585_v28  ;;  %6981 = vpow2.f32 %v1691_v7  ;;  %v2274_v43 = vld [vmem:[%s11475_s3 + $0x728] sm:$0xff]  ;;  %v2087_v48 = vld [vmem:[%s11475_s3 + $0x150] sm:$0xff] }
 0x241   :  { %4723 = vmatpush1.bf16.msra.mxu1 %v3573_v62  ;;  %3138 = vperm.xlu0 %6255, %v6958_v18   ;;  %v6968_v23 = vpop.eup %6967  ;;  %v9535_v24 = vmul.f32 1.442695, %v1278_v25  ;;  %6983 = vrcp.f32 %v1864_v4  ;;  %v1681_v3 = vmul.f32 1.442695, %v1359_v2  ;;  %v3451_v35 = vmul.f32 %v9384_v21, %v2275_v8  ;;  %v2088_v53 = vld [vmem:[%s11475_s3 + $0x158] sm:$0xff]  ;;  %v2085_v18 = vld [vmem:[%s11475_s3 + $0x140] sm:$0xff] }
 0x242   :  { %v3670_v54 = vpack.c.bf16 %v3448_v57, %v3446_v13  ;;  %v3669_v51 = vpack.c.bf16 %v3447_v9, %v3445_v58  ;;  %v1193_v9 = vadd.f32 %v1025_v46, %v11586_v44  ;;  %6985 = vrcp.f32 %v1774_v38  ;;  %v2086_v25 = vld [vmem:[%s11475_s3 + $0x148] sm:$0xff]  ;;  %v1027_v46 = vld [vmem:[%s11474_s2 + $0x4f0] sm:$0xff]  ;;  %v2089_v44 = vld [vmem:[%s11475_s3 + $0x160] sm:$0xff] }
 0x243   :  { %v2474_v55 = vpop.permute.xlu1 %2473  ;;  %v6970_v36 = vpop.eup %6969  ;;  %v3452_v57 = vmul.f32 %v9384_v21, %v2276_v6  ;;  %6987 = vpow2.f32 %v9475_v15  ;;  %v1277_v7 = vsub.f32 0.0, %v1109_v27  ;;  %v11587_v63 = vld [vmem:[#allocation31_spill] sm:$0xff]  ;;  %v2279_v8 = vld [vmem:[%s11475_s3 + $0x750] sm:$0xff]  ;;  %v3263_v6 = vmul.f32 %v9416_v11, %v2087_v48 }
 0x244   :  { %v3257_v59 = vmul.f32 %v2474_v55, %v2081_v34  ;;  %v3258_v33 = vmul.f32 %v2474_v55, %v2082_v42  ;;  %2633 = vperm.xlu1 %6256, %v11584_v20   ;;  %5241 = vmatprep.subr.bf16.mxu0 %v3670_v54  ;;  %v9526_v39 = vpop.permute.xlu0 %2508  ;;  %v6972_v37 = vpop.eup %6971  ;;  %v1859_v42 = vadd.f32 1.0, %v6966_v56  ;;  %v1112_v21 = vadd.f32 %v944_v52, %v11587_v63  ;;  %v11588_v38 = vld [vmem:[#allocation32_spill] sm:$0xff]  ;;  %v2280_v55 = vld [vmem:[%s11475_s3 + $0x758] sm:$0xff] }
 0x245   :  { %5242 = vmatpush1.bf16.msra.mxu0 %v3669_v51  ;;  %2668 = vperm.xlu0 %6255, %v9271_v17   ;;  %v1773_v17 = vadd.f32 1.0, %v9355_v19  ;;  %v9558_v41 = vpop.eup %6973  ;;  %v1866_v4 = vadd.f32 1.0, %v6970_v36  ;;  %v9574_v2 = vadd.f32 %v943_v14, %v11588_v38  ;;  %v1517_v27 = vmul.f32 1.442695, %v1277_v7 }
 0x246   :  { %v3576_v62 = vpack.c.bf16 %v3260_v47, %v3258_v33  ;;  %v3575_v31 = vpack.c.bf16 %v3259_v16, %v3257_v59  ;;  %v9571_v51 = vpop.eup %6975  ;;  %v1361_v16 = vsub.f32 0.0, %v1193_v9  ;;  %v2277_v47 = vld [vmem:[%s11475_s3 + $0x740] sm:$0xff]  ;;  %v3264_v59 = vmul.f32 %v9416_v11, %v2088_v53 }
 0x247   :  { %v2954_v34 = vpop.permute.xlu1 %2953  ;;  %6989 = vrcp.f32 %v1773_v17  ;;  %v1280_v52 = vsub.f32 0.0, %v1112_v21  ;;  %v3455_v17 = vmul.f32 %v9444_v40, %v2279_v8  ;;  %v3456_v53 = vmul.f32 %v9444_v40, %v2280_v55  ;;  %v2090_v40 = vld [vmem:[%s11475_s3 + $0x168] sm:$0xff] }
 0x248   :  { %v3449_v58 = vmul.f32 %v2954_v34, %v2273_v26  ;;  %v3450_v19 = vmul.f32 %v2954_v34, %v2274_v43  ;;  %3113 = vperm.xlu1 %6256, %v6968_v23   ;;  %4724 = vmatprep.subr.bf16.mxu1 %v3576_v62  ;;  %v9556_v13 = vpop.permute.xlu0 %2988  ;;  %6991 = vpow2.f32 %v1681_v3  ;;  %v6978_v28 = vpop.eup %6977  ;;  %v2278_v43 = vld [vmem:[%s11475_s3 + $0x748] sm:$0xff]  ;;  %v1685_v62 = vmul.f32 1.442695, %v1361_v16 }
 0x249   :  { %4725 = vmatpush1.bf16.msra.mxu1 %v3575_v31  ;;  %3148 = vperm.xlu0 %6255, %v6972_v37   ;;  %6993 = vrcp.f32 %v1859_v42  ;;  %v6980_v23 = vpop.eup %6979  ;;  %v11589_v31 = vld [vmem:[#allocation6_spill] sm:$0xff]  ;;  %v1776_v37 = vadd.f32 1.0, %v9459_v60  ;;  %v9617_v7 = vmul.f32 1.442695, %v1280_v52  ;;  %v946_v60 = vld [vmem:[%s11474_s2 + $0x268] sm:$0xff] }
 0x24a   :  { %v3672_v15 = vpack.c.bf16 %v3452_v57, %v3450_v19  ;;  %v3671_v54 = vpack.c.bf16 %v3451_v35, %v3449_v58  ;;  %6995 = vrcp.f32 %v1866_v4  ;;  %v6982_v48 = vpop.eup %6981  ;;  %v1195_v36 = vadd.f32 %v1027_v46, %v11589_v31  ;;  %v945_v57 = vld [vmem:[%s11474_s2 + $0x260] sm:$0xff] }
 0x24b   :  { %v2484_v26 = vpop.permute.xlu1 %2483  ;;  %6997 = vpow2.f32 %v9528_v30  ;;  %v6984_v9 = vpop.eup %6983  ;;  %v1279_v35 = vsub.f32 0.0, %v9574_v2  ;;  %v1861_v58 = vadd.f32 1.0, %v6978_v28  ;;  %v1868_v42 = vadd.f32 1.0, %v6982_v48  ;;  %v2281_v2 = vld [vmem:[%s11475_s3 + $0x760] sm:$0xff] }
 0x24c   :  { %v3261_v33 = vmul.f32 %v2484_v26, %v2085_v18  ;;  %v3262_v20 = vmul.f32 %v2484_v26, %v2086_v25  ;;  %2643 = vperm.xlu1 %6256, %v9158_v5   ;;  %5243 = vmatprep.subr.bf16.mxu0 %v3672_v15  ;;  %v9585_v56 = vpop.permute.xlu0 %2518  ;;  %v2091_v5 = vld [vmem:[%s11475_s3 + $0x170] sm:$0xff]  ;;  %6999 = vpow2.f32 %v9535_v24  ;;  %v9615_v19 = vpop.eup %6985  ;;  %v948_v24 = vld [vmem:[%s11474_s2 + $0x278] sm:$0xff]  ;;  %v1775_v46 = vadd.f32 1.0, %v9469_v49  ;;  %v11591_v28 = vld [vmem:[#allocation34_spill] sm:$0xff] }
 0x24d   :  { %5244 = vmatpush1.bf16.msra.mxu0 %v3671_v54  ;;  %2678 = vperm.xlu0 %6255, %v9386_v45   ;;  %v2092_v45 = vld [vmem:[%s11475_s3 + $0x178] sm:$0xff]  ;;  %v2283_v25 = vld [vmem:[%s11475_s3 + $0x770] sm:$0xff]  ;;  %v9628_v4 = vpop.eup %6987  ;;  %7001 = vpow2.f32 %v1517_v27  ;;  %v1363_v8 = vsub.f32 0.0, %v1195_v36  ;;  %v3267_v15 = vmul.f32 %v9473_v32, %v2091_v5  ;;  %v2093_v36 = vld [vmem:[%s11475_s3 + $0x180] sm:$0xff] }
 0x24e   :  { %v3578_v11 = vpack.c.bf16 %v3264_v59, %v3262_v20  ;;  %v3577_v14 = vpack.c.bf16 %v3263_v6, %v3261_v33  ;;  %v2284_v54 = vld [vmem:[%s11475_s3 + $0x778] sm:$0xff]  ;;  %7003 = vpow2.f32 %v1685_v62  ;;  %v3268_v16 = vmul.f32 %v9473_v32, %v2092_v45  ;;  %v2282_v20 = vld [vmem:[%s11475_s3 + $0x768] sm:$0xff]  ;;  %v947_v27 = vld [vmem:[%s11474_s2 + $0x270] sm:$0xff] }
 0x24f   :  { %v2964_v3 = vpop.permute.xlu1 %2963  ;;  %v11590_v59 = vld [vmem:[#allocation33_spill] sm:$0xff]  ;;  %7005 = vrcp.f32 %v1861_v58  ;;  %v1689_v48 = vmul.f32 1.442695, %v1363_v8  ;;  %v1778_v45 = vadd.f32 1.0, %v9522_v12  ;;  %v950_v58 = vld [vmem:[%s11474_s2 + $0x288] sm:$0xff] }
 0x250   :  { %v3453_v30 = vmul.f32 %v2964_v3, %v2277_v47  ;;  %v3454_v34 = vmul.f32 %v2964_v3, %v2278_v43  ;;  %3123 = vperm.xlu1 %6256, %v6980_v23   ;;  %4726 = vmatprep.subr.bf16.mxu1 %v3578_v11  ;;  %v9605_v18 = vpop.permute.xlu0 %2998  ;;  %v9644_v47 = vmul.f32 1.442695, %v1279_v35  ;;  %v1114_v33 = vadd.f32 %v946_v60, %v11590_v59  ;;  %v2095_v43 = vld [vmem:[%s11475_s3 + $0x190] sm:$0xff]  ;;  %v11592_v11 = vld [vmem:[#allocation35_spill] sm:$0xff]  ;;  %v2096_v62 = vld [vmem:[%s11475_s3 + $0x198] sm:$0xff] }
 0x251   :  { %4727 = vmatpush1.bf16.msra.mxu1 %v3577_v14  ;;  %3158 = vperm.xlu0 %6255, %v6984_v9   ;;  %v9642_v26 = vpop.eup %6989  ;;  %7007 = vrcp.f32 %v1868_v42  ;;  %v1116_v14 = vadd.f32 %v948_v24, %v11592_v11  ;;  %v3460_v3 = vmul.f32 %v9496_v50, %v2284_v54  ;;  %v2287_v60 = vld [vmem:[%s11475_s3 + $0x790] sm:$0xff]  ;;  %v2288_v8 = vld [vmem:[%s11475_s3 + $0x798] sm:$0xff]  ;;  %v2285_v54 = vld [vmem:[%s11475_s3 + $0x780] sm:$0xff] }
 0x252   :  { %v3674_v63 = vpack.c.bf16 %v3456_v53, %v3454_v34  ;;  %v3673_v21 = vpack.c.bf16 %v3455_v17, %v3453_v30  ;;  %v6992_v32 = vpop.eup %6991  ;;  %7009 = vrcp.f32 %v1776_v37  ;;  %v1282_v30 = vsub.f32 0.0, %v1114_v33  ;;  %v2094_v37 = vld [vmem:[%s11475_s3 + $0x188] sm:$0xff] }
 0x253   :  { %v2494_v38 = vpop.permute.xlu1 %2493  ;;  %v6994_v5 = vpop.eup %6993  ;;  %7011 = vrcp.f32 %v1775_v46  ;;  %v1863_v34 = vadd.f32 1.0, %v6992_v32  ;;  %v3271_v46 = vmul.f32 %v9526_v39, %v2095_v43  ;;  %v2286_v33 = vld [vmem:[%s11475_s3 + $0x788] sm:$0xff]  ;;  %v2099_v32 = vld [vmem:[%s11475_s3 + $0x1b0] sm:$0xff] }
 0x254   :  { %v3265_v6 = vmul.f32 %v2494_v38, %v2089_v44  ;;  %v3266_v55 = vmul.f32 %v2494_v38, %v2090_v40  ;;  %2653 = vperm.xlu1 %6256, %v9238_v22   ;;  %5245 = vmatprep.subr.bf16.mxu0 %v3674_v63  ;;  %v9640_v49 = vpop.permute.xlu0 %2528  ;;  %v1113_v22 = vadd.f32 %v945_v57, %v11591_v28  ;;  %v6996_v17 = vpop.eup %6995  ;;  %v11593_v57 = vld [vmem:[#allocation36_spill] sm:$0xff]  ;;  %v952_v40 = vld [vmem:[%s11474_s2 + $0x298] sm:$0xff]  ;;  %v1777_v63 = vadd.f32 1.0, %v9558_v41 }
 0x255   :  { %5246 = vmatpush1.bf16.msra.mxu0 %v3673_v21  ;;  %2688 = vperm.xlu0 %6255, %v9412_v1   ;;  %v3459_v1 = vmul.f32 %v9496_v50, %v2283_v25  ;;  %v9670_v53 = vpop.eup %6997  ;;  %v1115_v50 = vadd.f32 %v947_v27, %v11593_v57  ;;  %7013 = vpow2.f32 %v9617_v7  ;;  %v1284_v21 = vsub.f32 0.0, %v1116_v14  ;;  %v2097_v14 = vld [vmem:[%s11475_s3 + $0x1a0] sm:$0xff] }
 0x256   :  { %v3580_v23 = vpack.c.bf16 %v3268_v16, %v3266_v55  ;;  %v3579_v52 = vpack.c.bf16 %v3267_v15, %v3265_v6  ;;  %v1281_v12 = vsub.f32 0.0, %v1113_v22  ;;  %v9685_v25 = vpop.eup %6999  ;;  %7015 = vpow2.f32 %v1689_v48  ;;  %v11594_v55 = vld [vmem:[#allocation37_spill] sm:$0xff] }
 0x257   :  { %v2974_v31 = vpop.permute.xlu1 %2973  ;;  %v3272_v38 = vmul.f32 %v9526_v39, %v2096_v62  ;;  %v9700_v7 = vpop.eup %7001  ;;  %v1527_v6 = vmul.f32 1.442695, %v1282_v30  ;;  %v1118_v59 = vadd.f32 %v950_v58, %v11594_v55  ;;  %7017 = vrcp.f32 %v1863_v34  ;;  %v2291_v30 = vld [vmem:[%s11475_s3 + $0x7b0] sm:$0xff]  ;;  %v2292_v58 = vld [vmem:[%s11475_s3 + $0x7b8] sm:$0xff] }
 0x258   :  { %v3457_v44 = vmul.f32 %v2974_v31, %v2281_v2  ;;  %v3458_v9 = vmul.f32 %v2974_v31, %v2282_v20  ;;  %3133 = vperm.xlu1 %6256, %v6994_v5   ;;  %4728 = vmatprep.subr.bf16.mxu1 %v3580_v23  ;;  %v9668_v35 = vpop.permute.xlu0 %3008  ;;  %v7004_v39 = vpop.eup %7003  ;;  %v9707_v20 = vmul.f32 1.442695, %v1281_v12  ;;  %7019 = vpow2.f32 %v9644_v47  ;;  %v11595_v23 = vld [vmem:[#allocation39_spill] sm:$0xff] }
 0x259   :  { %4729 = vmatpush1.bf16.msra.mxu1 %v3579_v52  ;;  %3168 = vperm.xlu0 %6255, %v6996_v17   ;;  %v7006_v27 = vpop.eup %7005  ;;  %v1531_v43 = vmul.f32 1.442695, %v1284_v21  ;;  %v1120_v52 = vadd.f32 %v952_v40, %v11595_v23  ;;  %v3463_v5 = vmul.f32 %v9556_v13, %v2287_v60  ;;  %7021 = vrcp.f32 %v1778_v45  ;;  %v2289_v60 = vld [vmem:[%s11475_s3 + $0x7a0] sm:$0xff] }
 0x25a   :  { %v3676_v24 = vpack.c.bf16 %v3460_v3, %v3458_v9  ;;  %v3675_v42 = vpack.c.bf16 %v3459_v1, %v3457_v44  ;;  %v3464_v1 = vmul.f32 %v9556_v13, %v2288_v8  ;;  %7023 = vpow2.f32 %v1527_v6  ;;  %v2098_v44 = vld [vmem:[%s11475_s3 + $0x1a8] sm:$0xff]  ;;  %v11596_v8 = vld [vmem:[#allocation41_spill] sm:$0xff] }
 0x25b   :  { %v2504_v15 = vpop.permute.xlu1 %2503  ;;  %v7008_v48 = vpop.eup %7007  ;;  %v1286_v17 = vsub.f32 0.0, %v1118_v59  ;;  %v1865_v3 = vadd.f32 1.0, %v7004_v39  ;;  %v1780_v45 = vadd.f32 1.0, %v9628_v4  ;;  %v954_v9 = vld [vmem:[%s11474_s2 + $0x2a8] sm:$0xff]  ;;  %7025 = vrcp.f32 %v1777_v63 }
 0x25c   :  { %v3269_v2 = vmul.f32 %v2504_v15, %v2093_v36  ;;  %v3270_v16 = vmul.f32 %v2504_v15, %v2094_v37  ;;  %2663 = vperm.xlu1 %6256, %v9343_v0   ;;  %5247 = vmatprep.subr.bf16.mxu0 %v3676_v24  ;;  %v9698_v41 = vpop.permute.xlu0 %2538  ;;  %v1283_v0 = vsub.f32 0.0, %v1115_v50  ;;  %v9724_v36 = vpop.eup %7009  ;;  %v1779_v57 = vadd.f32 1.0, %v9670_v53 }
 0x25d   :  { %5248 = vmatpush1.bf16.msra.mxu0 %v3675_v42  ;;  %2698 = vperm.xlu0 %6255, %v9512_v29   ;;  %v2100_v29 = vld [vmem:[%s11475_s3 + $0x1b8] sm:$0xff]  ;;  %v9738_v12 = vpop.eup %7011  ;;  %v1288_v50 = vsub.f32 0.0, %v1120_v52  ;;  %v3275_v4 = vmul.f32 %v9585_v56, %v2099_v32  ;;  %7027 = vpow2.f32 %v1531_v43  ;;  %v1122_v15 = vadd.f32 %v954_v9, %v11596_v8  ;;  %v11597_v52 = vld [vmem:[#allocation43_spill] sm:$0xff] }
 0x25e   :  { %v3582_v28 = vpack.c.bf16 %v3272_v38, %v3270_v16  ;;  %v3581_v22 = vpack.c.bf16 %v3271_v46, %v3269_v2  ;;  %v9730_v13 = vmul.f32 1.442695, %v1283_v0  ;;  %v3276_v24 = vmul.f32 %v9585_v56, %v2100_v29  ;;  %v951_v2 = vld [vmem:[%s11474_s2 + $0x290] sm:$0xff]  ;;  %v956_v16 = vld [vmem:[%s11474_s2 + $0x2b8] sm:$0xff] }
 0x25f   :  { %v2984_v11 = vpop.permute.xlu1 %2983  ;;  %v7014_v63 = vpop.eup %7013  ;;  %v1535_v46 = vmul.f32 1.442695, %v1286_v17  ;;  %7029 = vrcp.f32 %v1865_v3  ;;  %v1782_v38 = vadd.f32 1.0, %v9685_v25  ;;  %v1781_v25 = vadd.f32 1.0, %v9700_v7  ;;  %v2104_v0 = vld [vmem:[%s11475_s3 + $0x1d8] sm:$0xff]  ;;  %v11598_v17 = vld [vmem:[#allocation38_spill] sm:$0xff] }
 0x260   :  { %v3461_v62 = vmul.f32 %v2984_v11, %v2285_v54  ;;  %v3462_v47 = vmul.f32 %v2984_v11, %v2286_v33  ;;  %3143 = vperm.xlu1 %6256, %v7006_v27   ;;  %4730 = vmatprep.subr.bf16.mxu1 %v3582_v28  ;;  %v9722_v31 = vpop.permute.xlu0 %3018  ;;  %v2290_v54 = vld [vmem:[%s11475_s3 + $0x7a8] sm:$0xff]  ;;  %v7016_v56 = vpop.eup %7015  ;;  %7031 = vrcp.f32 %v1780_v45  ;;  %v1539_v33 = vmul.f32 1.442695, %v1288_v50  ;;  %v2101_v28 = vld [vmem:[%s11475_s3 + $0x1c0] sm:$0xff] }
 0x261   :  { %4731 = vmatpush1.bf16.msra.mxu1 %v3581_v22  ;;  %3178 = vperm.xlu0 %6255, %v7008_v48   ;;  %v7018_v59 = vpop.eup %7017  ;;  %7033 = vpow2.f32 %v9707_v20  ;;  %v3467_v39 = vmul.f32 %v9605_v18, %v2291_v30  ;;  %v3468_v22 = vmul.f32 %v9605_v18, %v2292_v58  ;;  %v1290_v23 = vsub.f32 0.0, %v1122_v15  ;;  %v2102_v11 = vld [vmem:[%s11475_s3 + $0x1c8] sm:$0xff] }
 0x262   :  { %v3678_v34 = vpack.c.bf16 %v3464_v1, %v3462_v47  ;;  %v3677_v37 = vpack.c.bf16 %v3463_v5, %v3461_v62  ;;  %7035 = vrcp.f32 %v1779_v57  ;;  %v9782_v20 = vpop.eup %7019  ;;  %v1124_v5 = vadd.f32 %v956_v16, %v11597_v52  ;;  %v958_v48 = vld [vmem:[%s11474_s2 + $0x2c8] sm:$0xff]  ;;  %v960_v52 = vld [vmem:[%s11474_s2 + $0x2d8] sm:$0xff] }
 0x263   :  { %v2514_v40 = vpop.permute.xlu1 %2513  ;;  %7037 = vpow2.f32 %v1535_v46  ;;  %v1867_v29 = vadd.f32 1.0, %v7016_v56  ;;  %v7022_v18 = vpop.eup %7021  ;;  %v1543_v58 = vmul.f32 1.442695, %v1290_v23  ;;  %v1030_v46 = vld [vmem:[%s11474_s2 + $0x508] sm:$0xff] }
 0x264   :  { %v3273_v42 = vmul.f32 %v2514_v40, %v2097_v14  ;;  %v3274_v21 = vmul.f32 %v2514_v40, %v2098_v44  ;;  %2673 = vperm.xlu1 %6256, %v9403_v10   ;;  %5249 = vmatprep.subr.bf16.mxu0 %v3678_v34  ;;  %v9750_v53 = vpop.permute.xlu0 %2548  ;;  %v949_v10 = vld [vmem:[%s11474_s2 + $0x280] sm:$0xff]  ;;  %7039 = vrcp.f32 %v1782_v38  ;;  %v1784_v14 = vadd.f32 1.0, %v7014_v63  ;;  %v7024_v47 = vpop.eup %7023  ;;  %v11599_v44 = vld [vmem:[#allocation40_spill] sm:$0xff] }
 0x265   :  { %5250 = vmatpush1.bf16.msra.mxu0 %v3677_v37  ;;  %2708 = vperm.xlu0 %6255, %v9615_v19   ;;  %v2103_v19 = vld [vmem:[%s11475_s3 + $0x1d0] sm:$0xff]  ;;  %7041 = vrcp.f32 %v1781_v25  ;;  %v1117_v3 = vadd.f32 %v949_v10, %v11598_v17  ;;  %v9794_v45 = vadd.f32 %v951_v2, %v11599_v44  ;;  %v1292_v40 = vsub.f32 0.0, %v1124_v5 }
 0x266   :  { %v3584_v6 = vpack.c.bf16 %v3276_v24, %v3274_v21  ;;  %v3583_v55 = vpack.c.bf16 %v3275_v4, %v3273_v42  ;;  %v3279_v9 = vmul.f32 %v9640_v49, %v2103_v19  ;;  %7043 = vpow2.f32 %v1539_v33  ;;  %v2295_v34 = vld [vmem:[%s11475_s3 + $0x7d0] sm:$0xff]  ;;  %v9804_v4 = vpop.eup %7025  ;;  %v2293_v42 = vld [vmem:[%s11475_s3 + $0x7c0] sm:$0xff] }
 0x267   :  { %v2994_v32 = vpop.permute.xlu1 %2993  ;;  %7045 = vrcp.f32 %v1867_v29  ;;  %v7028_v21 = vpop.eup %7027  ;;  %v1786_v63 = vadd.f32 1.0, %v7024_v47  ;;  %v1285_v56 = vsub.f32 0.0, %v1117_v3  ;;  %v3471_v38 = vmul.f32 %v9668_v35, %v2295_v34  ;;  %v953_v19 = vld [vmem:[%s11474_s2 + $0x2a0] sm:$0xff] }
 0x268   :  { %v3465_v27 = vmul.f32 %v2994_v32, %v2289_v60  ;;  %v3466_v43 = vmul.f32 %v2994_v32, %v2290_v54  ;;  %3153 = vperm.xlu1 %6256, %v7018_v59   ;;  %4732 = vmatprep.subr.bf16.mxu1 %v3584_v6  ;;  %v9780_v7 = vpop.permute.xlu0 %3028  ;;  %v11600_v60 = vld [vmem:[#allocation45_spill] sm:$0xff]  ;;  %7047 = vrcp.f32 %v1784_v14  ;;  %v1287_v16 = vsub.f32 0.0, %v9794_v45  ;;  %v11601_v32 = vld [vmem:[#allocation7_spill] sm:$0xff]  ;;  %v2299_v45 = vld [vmem:[%s11475_s3 + $0x7f0] sm:$0xff] }
 0x269   :  { %4733 = vmatpush1.bf16.msra.mxu1 %v3583_v55  ;;  %2718 = vperm.xlu0 %6255, %v9724_v36   ;;  %v3280_v36 = vmul.f32 %v9640_v49, %v2104_v0  ;;  %v1126_v24 = vadd.f32 %v958_v48, %v11600_v60  ;;  %v2296_v49 = vld [vmem:[%s11475_s3 + $0x7d8] sm:$0xff]  ;;  %v7030_v54 = vpop.eup %7029  ;;  %7049 = vpow2.f32 %v9730_v13  ;;  %v2107_v55 = vld [vmem:[%s11475_s3 + $0x1f0] sm:$0xff]  ;;  %v1788_v23 = vadd.f32 1.0, %v7028_v21  ;;  %v11602_v48 = vld [vmem:[#allocation42_spill] sm:$0xff] }
 0x26a   :  { %v3680_v1 = vpack.c.bf16 %v3468_v22, %v3466_v43  ;;  %v3679_v62 = vpack.c.bf16 %v3467_v39, %v3465_v27  ;;  %v7032_v2 = vpop.eup %7031  ;;  %v3472_v6 = vmul.f32 %v9668_v35, %v2296_v49  ;;  %7051 = vpow2.f32 %v1543_v58  ;;  %v2108_v35 = vld [vmem:[%s11475_s3 + $0x1f8] sm:$0xff]  ;;  %v2105_v22 = vld [vmem:[%s11475_s3 + $0x1e0] sm:$0xff]  ;;  %v2106_v27 = vld [vmem:[%s11475_s3 + $0x1e8] sm:$0xff] }
 0x26b   :  { %v2524_v30 = vpop.permute.xlu1 %2523  ;;  %v7034_v33 = vpop.eup %7033  ;;  %v1547_v39 = vmul.f32 1.442695, %v1292_v40  ;;  %v1294_v0 = vsub.f32 0.0, %v1126_v24  ;;  %7053 = vrcp.f32 %v1786_v63  ;;  %v1533_v14 = vmul.f32 1.442695, %v1285_v56  ;;  %v2297_v40 = vld [vmem:[%s11475_s3 + $0x7e0] sm:$0xff] }
 0x26c   :  { %v3277_v37 = vmul.f32 %v2524_v30, %v2101_v28  ;;  %v3278_v57 = vmul.f32 %v2524_v30, %v2102_v11  ;;  %2683 = vperm.xlu1 %6256, %v9498_v61   ;;  %5251 = vmatprep.subr.bf16.mxu0 %v3680_v1  ;;  %v9802_v50 = vpop.permute.xlu0 %2558  ;;  %v2294_v61 = vld [vmem:[%s11475_s3 + $0x7c8] sm:$0xff]  ;;  %v1198_v28 = vadd.f32 %v1030_v46, %v11601_v32  ;;  %v9841_v43 = vpop.eup %7035  ;;  %v9849_v3 = vmul.f32 1.442695, %v1287_v16  ;;  %v1032_v49 = vld [vmem:[%s11474_s2 + $0x518] sm:$0xff]  ;;  %v955_v56 = vld [vmem:[%s11474_s2 + $0x2b0] sm:$0xff] }
 0x26d   :  { %5252 = vmatpush1.bf16.msra.mxu0 %v3679_v62  ;;  %2728 = vperm.xlu0 %6255, %v7022_v18   ;;  %v7038_v11 = vpop.eup %7037  ;;  %v1783_v18 = vadd.f32 1.0, %v9782_v20  ;;  %v1121_v1 = vadd.f32 %v953_v19, %v11602_v48  ;;  %v3283_v62 = vmul.f32 %v9698_v41, %v2107_v55  ;;  %v3284_v44 = vmul.f32 %v9698_v41, %v2108_v35  ;;  %v2300_v41 = vld [vmem:[%s11475_s3 + $0x7f8] sm:$0xff] }
 0x26e   :  { %v3586_v8 = vpack.c.bf16 %v3280_v36, %v3278_v57  ;;  %v3585_v15 = vpack.c.bf16 %v3279_v9, %v3277_v37  ;;  %v7040_v17 = vpop.eup %7039  ;;  %7055 = vpow2.f32 %v1547_v39  ;;  %v1551_v34 = vmul.f32 1.442695, %v1294_v0  ;;  %v11603_v37 = vld [vmem:[#allocation47_spill] sm:$0xff]  ;;  %v2109_v39 = vld [vmem:[%s11475_s3 + $0x200] sm:$0xff] }
 0x26f   :  { %v3004_v10 = vpop.permute.xlu1 %3003  ;;  %v9858_v36 = vpop.eup %7041  ;;  %v1128_v57 = vadd.f32 %v960_v52, %v11603_v37  ;;  %v1366_v58 = vsub.f32 0.0, %v1198_v28  ;;  %7057 = vrcp.f32 %v1788_v23  ;;  %v1790_v24 = vadd.f32 1.0, %v7038_v11  ;;  %v2110_v0 = vld [vmem:[%s11475_s3 + $0x208] sm:$0xff]  ;;  %v2301_v37 = vld [vmem:[%s11475_s3 + $0x800] sm:$0xff] }
 0x270   :  { %v3469_v59 = vmul.f32 %v3004_v10, %v2293_v42  ;;  %v3470_v25 = vmul.f32 %v3004_v10, %v2294_v61  ;;  %3163 = vperm.xlu1 %6256, %v7030_v54   ;;  %4734 = vmatprep.subr.bf16.mxu1 %v3586_v8  ;;  %v9829_v13 = vpop.permute.xlu0 %3038  ;;  %v7044_v60 = vpop.eup %7043  ;;  %7059 = vrcp.f32 %v1783_v18  ;;  %v1785_v63 = vadd.f32 1.0, %v7034_v33  ;;  %v2111_v10 = vld [vmem:[%s11475_s3 + $0x210] sm:$0xff]  ;;  %v962_v28 = vld [vmem:[%s11474_s2 + $0x2e8] sm:$0xff] }
 0x271   :  { %4735 = vmatpush1.bf16.msra.mxu1 %v3585_v15  ;;  %2738 = vperm.xlu0 %6255, %v7032_v2   ;;  %v7046_v21 = vpop.eup %7045  ;;  %v1289_v46 = vsub.f32 0.0, %v1121_v1  ;;  %v3475_v8 = vmul.f32 %v9722_v31, %v2299_v45  ;;  %7061 = vpow2.f32 %v1533_v14  ;;  %v1296_v55 = vsub.f32 0.0, %v1128_v57  ;;  %v6263_v14 = vld [vmem:[%s11476_s4 + $0x5c] ss:$44 sps:$4 sm:$0xff]   ;;  %v957_v1 = vld [vmem:[%s11474_s2 + $0x2c0] sm:$0xff] }
 0x272   :  { %v3682_v5 = vpack.c.bf16 %v3472_v6, %v3470_v25  ;;  %v3681_v29 = vpack.c.bf16 %v3471_v38, %v3469_v59  ;;  %v7048_v54 = vpop.eup %7047  ;;  %v3476_v38 = vmul.f32 %v9722_v31, %v2300_v41  ;;  %7063 = vpow2.f32 %v1551_v34  ;;  %v11604_v25 = vld [vmem:[#allocation9_spill] sm:$0xff] }
 0x273   :  { %v2534_v47 = vpop.permute.xlu1 %2533  ;;  %v7050_v6 = vpop.eup %7049  ;;  %v1695_v59 = vmul.f32 1.442695, %v1366_v58  ;;  %v9884_v33 = vadd.f32 %v1032_v49, %v11604_v25  ;;  %v2112_v31 = vld [vmem:[%s11475_s3 + $0x218] sm:$0xff]  ;;  %7065 = vrcp.f32 %v1790_v24  ;;  %v1792_v32 = vadd.f32 1.0, %v7044_v60  ;;  %v1034_v58 = vld [vmem:[%s11474_s2 + $0x528] sm:$0xff] }
 0x274   :  { %v3281_v9 = vmul.f32 %v2534_v47, %v2105_v22  ;;  %v3282_v30 = vmul.f32 %v2534_v47, %v2106_v27  ;;  %2693 = vperm.xlu1 %6256, %v9571_v51   ;;  %5253 = vmatprep.subr.bf16.mxu0 %v3682_v5  ;;  %v9856_v20 = vpop.permute.xlu0 %2568  ;;  %v2298_v51 = vld [vmem:[%s11475_s3 + $0x7e8] sm:$0xff]  ;;  %v7052_v23 = vpop.eup %7051  ;;  %7067 = vrcp.f32 %v1785_v63  ;;  %v1541_v52 = vmul.f32 1.442695, %v1289_v46  ;;  %v11605_v5 = vld [vmem:[#allocation44_spill] sm:$0xff] }
 0x275   :  { %5254 = vmatpush1.bf16.msra.mxu0 %v3681_v29  ;;  %2748 = vperm.xlu0 %6255, %v7040_v17   ;;  %v6257_v27 = vld [vmem:[%s11476_s4] ss:$44 sps:$4 sm:$0xff]   ;;  %v9902_v29 = vadd.f32 %v955_v56, %v11605_v5  ;;  %v3287_v11 = vmul.f32 %v9750_v53, %v2111_v10  ;;  %v7054_v48 = vpop.eup %7053  ;;  %7069 = vpow2.f32 %v9849_v3  ;;  %v2303_v47 = vld [vmem:[%s11475_s3 + $0x810] sm:$0xff]  ;;  %v1368_v34 = vsub.f32 0.0, %v9884_v33 }
 0x276   :  { %v3588_v42 = vpack.c.bf16 %v3284_v44, %v3282_v30  ;;  %v3587_v61 = vpack.c.bf16 %v3283_v62, %v3281_v9  ;;  %v3288_v62 = vmul.f32 %v9750_v53, %v2112_v31  ;;  %v1555_v9 = vmul.f32 1.442695, %v1296_v55  ;;  %v11606_v30 = vld [vmem:[#allocation49_spill] sm:$0xff]  ;;  %v6266_v46 = vld [vmem:[%s11476_s4 + $0x74] ss:$44 sps:$4 sm:$0xff]   ;;  %v2114_v33 = vld [vmem:[%s11475_s3 + $0x228] sm:$0xff] }
 0x277   :  { %v3014_v15 = vpop.permute.xlu1 %3013  ;;  %v9920_v3 = vadd.f32 %v962_v28, %v11606_v30  ;;  %7071 = vpow2.f32 %v1695_v59  ;;  %v2304_v53 = vld [vmem:[%s11475_s3 + $0x818] sm:$0xff]  ;;  %v1794_v57 = vadd.f32 1.0, %v7052_v23  ;;  %v1787_v24 = vadd.f32 1.0, %v7050_v6  ;;  %v2115_v56 = vld [vmem:[%s11475_s3 + $0x230] sm:$0xff] }
 0x278   :  { %v3473_v2 = vmul.f32 %v3014_v15, %v2297_v40  ;;  %v3474_v16 = vmul.f32 %v3014_v15, %v2298_v51  ;;  %3173 = vperm.xlu1 %6256, %v7046_v21   ;;  %4736 = vmatprep.subr.bf16.mxu1 %v3588_v42  ;;  %v9881_v19 = vpop.permute.xlu0 %3048  ;;  %7073 = vrcp.f32 %v1792_v32  ;;  %v6260_v51 = vld [vmem:[%s11476_s4 + $0x18] ss:$44 sps:$4 sm:$0xff]   ;;  %v7056_v60 = vpop.eup %7055  ;;  %v1291_v49 = vsub.f32 0.0, %v9902_v29  ;;  %v959_v15 = vld [vmem:[%s11474_s2 + $0x2d0] sm:$0xff] }
 0x279   :  { %4737 = vmatpush1.bf16.msra.mxu1 %v3587_v61  ;;  %2758 = vperm.xlu0 %6255, %v7048_v54   ;;  %v11607_v42 = vld [vmem:[#allocation46_spill] sm:$0xff]  ;;  %v3479_v21 = vmul.f32 %v9780_v7, %v2303_v47  ;;  %7075 = vpow2.f32 %v1541_v52  ;;  %v3480_v54 = vmul.f32 %v9780_v7, %v2304_v53  ;;  %v1298_v6 = vsub.f32 0.0, %v9920_v3  ;;  %v11608_v59 = vld [vmem:[#allocation57_spill] sm:$0xff]  ;;  %v11609_v23 = vld [vmem:[#allocation48_spill] sm:$0xff] }
 0x27a   :  { %v3684_v35 = vpack.c.bf16 %v3476_v38, %v3474_v16  ;;  %v3683_v22 = vpack.c.bf16 %v3475_v8, %v3473_v2  ;;  %v9940_v61 = vadd.f32 %v957_v1, %v11607_v42  ;;  %v7058_v8 = vpop.eup %7057  ;;  %7077 = vpow2.f32 %v1555_v9  ;;  %v2116_v7 = vld [vmem:[%s11475_s3 + $0x238] sm:$0xff]  ;;  %v11610_v3 = vld [vmem:[#allocation51_spill] sm:$0xff]  ;;  %v11611_v42 = vld [vmem:[#allocation8_spill] sm:$0xff] }
 0x27b   :  { %v2544_v18 = vpop.permute.xlu1 %2543  ;;  %v9956_v16 = vpop.eup %7059  ;;  %v1699_v55 = vmul.f32 1.442695, %v1368_v34  ;;  %v9960_v25 = vadd.f32 %v1034_v58, %v11608_v59  ;;  %7079 = vrcp.f32 %v1794_v57  ;;  %v9978_v52 = vadd.f32 %v959_v15, %v11609_v23  ;;  %v2308_v53 = vld [vmem:[%s11475_s3 + $0x838] sm:$0xff]  ;;  %v11612_v59 = vld [vmem:[#allocation10_spill] sm:$0xff] }
 0x27c   :  { %v3285_v17 = vmul.f32 %v2544_v18, %v2109_v39  ;;  %v3286_v44 = vmul.f32 %v2544_v18, %v2110_v0  ;;  %2703 = vperm.xlu1 %6256, %v9642_v26   ;;  %5255 = vmatprep.subr.bf16.mxu0 %v3684_v35  ;;  %v9917_v45 = vpop.permute.xlu0 %2578  ;;  %v2302_v26 = vld [vmem:[%s11475_s3 + $0x808] sm:$0xff]  ;;  %v7062_v31 = vpop.eup %7061  ;;  %v1796_v39 = vadd.f32 1.0, %v7056_v60  ;;  %v964_v0 = vld [vmem:[%s11474_s2 + $0x2f8] sm:$0xff]  ;;  %7081 = vrcp.f32 %v1787_v24 }
 0x27d   :  { %5256 = vmatpush1.bf16.msra.mxu0 %v3683_v22  ;;  %2768 = vperm.xlu0 %6255, %v7054_v48   ;;  %v6265_v35 = vld [vmem:[%s11476_s4 + $0x58] ss:$44 sps:$4 sm:$0xff]   ;;  %v7064_v22 = vpop.eup %7063  ;;  %v3291_v5 = vmul.f32 %v9802_v50, %v2115_v56  ;;  %v3292_v1 = vmul.f32 %v9802_v50, %v2116_v7  ;;  %v1559_v30 = vmul.f32 1.442695, %v1298_v6  ;;  %v9998_v34 = vadd.f32 %v964_v0, %v11610_v3  ;;  %v6271_v0 = vld [vmem:[%s11476_s4 + $0xb0] ss:$44 sps:$4 sm:$0xff]  }
 0x27e   :  { %v3589_v41 = vpack.c.bf16 %v3287_v11, %v3285_v17  ;;  %v3590_v40 = vpack.c.bf16 %v3288_v62, %v3286_v44  ;;  %4739 = vmatmul.mubr.bf16.vlgmr.msra.gmra.mrb[0].mxu1 %v6257_v27  ;;  %v1545_v27 = vmul.f32 1.442695, %v1291_v49  ;;  %v6269_v11 = vld [vmem:[%s11476_s4 + $0xb4] ss:$44 sps:$4 sm:$0xff]   ;;  %v7066_v18 = vpop.eup %7065  ;;  %7083 = vpow2.f32 %v1699_v55  ;;  %v1036_v58 = vld [vmem:[%s11474_s2 + $0x538] sm:$0xff] }
 0x27f   :  { %v3024_v63 = vpop.permute.xlu1 %3023  ;;  %4748 = vmatprep.mubr.bf16.mxu1 %v6263_v14  ;;  %v1293_v14 = vsub.f32 0.0, %v9940_v61  ;;  %v1029_v48 = vld [vmem:[%s11474_s2 + $0x500] sm:$0xff]  ;;  %v2307_v62 = vld [vmem:[%s11475_s3 + $0x830] sm:$0xff]  ;;  %v9995_v9 = vpop.eup %7067  ;;  %v1370_v50 = vsub.f32 0.0, %v9960_v25  ;;  %7085 = vrcp.f32 %v1796_v39  ;;  %v1798_v57 = vadd.f32 1.0, %v7064_v22 }
 0x280   :  { %v3477_v38 = vmul.f32 %v3024_v63, %v2301_v37  ;;  %v3478_v10 = vmul.f32 %v3024_v63, %v2302_v26  ;;  %2713 = vperm.xlu1 %6256, %v9738_v12   ;;  %4879 = vmatprep.subr.bf16.mxu1 %v3590_v40  ;;  %v9954_v2 = vpop.permute.xlu0 %3058  ;;  %v2113_v12 = vld [vmem:[%s11475_s3 + $0x220] sm:$0xff]  ;;  %v2306_v37 = vld [vmem:[%s11475_s3 + $0x828] sm:$0xff]  ;;  %v10010_v26 = vpop.eup %7069  ;;  %v1789_v24 = vadd.f32 1.0, %v7062_v31  ;;  %v1295_v49 = vsub.f32 0.0, %v9978_v52 }
 0x281   :  { %4880 = vmatpush1.bf16.msra.mxu1 %v3589_v41  ;;  %2778 = vperm.xlu0 %6255, %v7058_v8   ;;  %v7072_v60 = vpop.eup %7071  ;;  %v10020_v61 = vadd.f32 %v1029_v48, %v11611_v42  ;;  %7087 = vpow2.f32 %v1545_v27  ;;  %v3484_v15 = vmul.f32 %v9829_v13, %v2308_v53  ;;  %v1300_v6 = vsub.f32 0.0, %v9998_v34  ;;  %v2117_v7 = vld [vmem:[%s11475_s3 + $0x240] sm:$0xff]  ;;  %v6275_v23 = vld [vmem:[%s11476_s4 + $0x10c] ss:$44 sps:$4 sm:$0xff]   ;;  %v6274_v53 = vld [vmem:[%s11476_s4 + $0xc8] ss:$44 sps:$4 sm:$0xff]  }
 0x282   :  { %v3685_v32 = vpack.c.bf16 %v3479_v21, %v3477_v38  ;;  %v3686_v28 = vpack.c.bf16 %v3480_v54, %v3478_v10  ;;  %5258 = vmatmul.mubr.bf16.vlgmr.msra.gmra.mrb[0].mxu0 %v6260_v51  ;;  %v6268_v51 = vld [vmem:[%s11476_s4 + $0x70] ss:$44 sps:$4 sm:$0xff]   ;;  %v3483_v21 = vmul.f32 %v9829_v13, %v2307_v62  ;;  %v7074_v8 = vpop.eup %7073  ;;  %7089 = vpow2.f32 %v1559_v30  ;;  %v2309_v30 = vld [vmem:[%s11475_s3 + $0x840] sm:$0xff] }
 0x283   :  { %v2554_v29 = vpop.permute.xlu1 %2553  ;;  %5267 = vmatprep.mubr.bf16.mxu0 %v6266_v46  ;;  %v6272_v46 = vld [vmem:[%s11476_s4 + $0xcc] ss:$44 sps:$4 sm:$0xff]   ;;  %v2119_v54 = vld [vmem:[%s11475_s3 + $0x250] sm:$0xff]  ;;  %v1703_v55 = vmul.f32 1.442695, %v1370_v50  ;;  %v10035_v25 = vadd.f32 %v1036_v58, %v11612_v59  ;;  %7091 = vrcp.f32 %v1798_v57  ;;  %v11614_v59 = vld [vmem:[#allocation50_spill] sm:$0xff] }
 0x284   :  { %v3289_v47 = vmul.f32 %v2554_v29, %v2113_v12  ;;  %v3290_v17 = vmul.f32 %v2554_v29, %v2114_v33  ;;  %2723 = vperm.xlu1 %6256, %v9804_v4   ;;  %5398 = vmatprep.subr.bf16.mxu0 %v3686_v28  ;;  %v9993_v44 = vpop.permute.xlu0 %2588  ;;  %v2305_v4 = vld [vmem:[%s11475_s3 + $0x820] sm:$0xff]  ;;  %v2120_v13 = vld [vmem:[%s11475_s3 + $0x258] sm:$0xff]  ;;  %v10046_v12 = vpop.eup %7075  ;;  %v1870_v33 = vadd.f32 1.0, %v7072_v60  ;;  %7093 = vrcp.f32 %v1789_v24  ;;  %v1031_v29 = vld [vmem:[%s11474_s2 + $0x510] sm:$0xff] }
 0x285   :  { %5399 = vmatpush1.bf16.msra.mxu0 %v3685_v32  ;;  %2788 = vperm.xlu0 %6255, %v7066_v18   ;;  %v7078_v32 = vpop.eup %7077  ;;  %v1549_v28 = vmul.f32 1.442695, %v1293_v14  ;;  %v3295_v22 = vmul.f32 %v9856_v20, %v2119_v54  ;;  %v2311_v18 = vld [vmem:[%s11475_s3 + $0x850] sm:$0xff]  ;;  %7095 = vpow2.f32 %v1703_v55  ;;  %v961_v24 = vld [vmem:[%s11474_s2 + $0x2e0] sm:$0xff] }
 0x286   :  { %v3591_v41 = vpack.c.bf16 %v3291_v5, %v3289_v47  ;;  %v3592_v40 = vpack.c.bf16 %v3292_v1, %v3290_v17  ;;  %4749 = vmatmul.mubr.bf16.gmra.mrb[4].mxu1 %v6265_v35  ;;  %v10051_v35 = vmul.f32 1.442695, %v1295_v49  ;;  %v7080_v52 = vpop.eup %7079  ;;  %v1365_v5 = vsub.f32 0.0, %v10020_v61  ;;  %v11613_v57 = vld [vmem:[#allocation56_spill] sm:$0xff] }
 0x287   :  { %v3034_v63 = vpop.permute.xlu1 %3033  ;;  %4758 = vmatprep.mubr.bf16.mxu1 %v6269_v11  ;;  %v3296_v11 = vmul.f32 %v9856_v20, %v2120_v13  ;;  %v10068_v62 = vpop.eup %7081  ;;  %v1563_v47 = vmul.f32 1.442695, %v1300_v6  ;;  %v1372_v17 = vsub.f32 0.0, %v10035_v25  ;;  %v2312_v20 = vld [vmem:[%s11475_s3 + $0x858] sm:$0xff]  ;;  %v1800_v3 = vadd.f32 1.0, %v7078_v32  ;;  %v2123_v42 = vld [vmem:[%s11475_s3 + $0x270] sm:$0xff] }
 0x288   :  { %v3481_v56 = vmul.f32 %v3034_v63, %v2305_v4  ;;  %v3482_v38 = vmul.f32 %v3034_v63, %v2306_v37  ;;  %2733 = vperm.xlu1 %6256, %v9841_v43   ;;  %4881 = vmatprep.subr.bf16.mxu1 %v3592_v40  ;;  %v10031_v10 = vpop.permute.xlu0 %3068  ;;  %v2118_v43 = vld [vmem:[%s11475_s3 + $0x248] sm:$0xff]  ;;  %7097 = vrcp.f32 %v1870_v33  ;;  %v7084_v4 = vpop.eup %7083  ;;  %v1791_v37 = vadd.f32 1.0, %v10010_v26  ;;  %v6281_v33 = vld [vmem:[%s11476_s4 + $0x164] ss:$44 sps:$4 sm:$0xff]  }
 0x289   :  { %4882 = vmatpush1.bf16.msra.mxu1 %v3591_v41  ;;  %2798 = vperm.xlu0 %6255, %v7074_v8   ;;  %7099 = vpow2.f32 %v1549_v28  ;;  %v10085_v58 = vadd.f32 %v1031_v29, %v11613_v57  ;;  %v3487_v41 = vmul.f32 %v9881_v19, %v2311_v18  ;;  %v7086_v60 = vpop.eup %7085  ;;  %v1693_v49 = vmul.f32 1.442695, %v1365_v5  ;;  %v2124_v8 = vld [vmem:[%s11475_s3 + $0x278] sm:$0xff]  ;;  %v6277_v6 = vld [vmem:[%s11476_s4 + $0x108] ss:$44 sps:$4 sm:$0xff]  }
 0x28a   :  { %v3687_v31 = vpack.c.bf16 %v3483_v21, %v3481_v56  ;;  %v3688_v39 = vpack.c.bf16 %v3484_v15, %v3482_v38  ;;  %5268 = vmatmul.mubr.bf16.gmra.mrb[4].mxu0 %v6268_v51  ;;  %v6278_v51 = vld [vmem:[%s11476_s4 + $0x124] ss:$44 sps:$4 sm:$0xff]   ;;  %v3488_v26 = vmul.f32 %v9881_v19, %v2312_v20  ;;  %7101 = vpow2.f32 %v1563_v47  ;;  %v2122_v15 = vld [vmem:[%s11475_s3 + $0x268] sm:$0xff]  ;;  %v2316_v5 = vld [vmem:[%s11475_s3 + $0x878] sm:$0xff] }
 0x28b   :  { %v2564_v27 = vpop.permute.xlu1 %2563  ;;  %5277 = vmatprep.mubr.bf16.mxu0 %v6272_v46  ;;  %v1707_v46 = vmul.f32 1.442695, %v1372_v17  ;;  %v2121_v19 = vld [vmem:[%s11475_s3 + $0x260] sm:$0xff]  ;;  %7103 = vrcp.f32 %v1800_v3  ;;  %v1872_v54 = vadd.f32 1.0, %v7084_v4  ;;  %v10114_v25 = vadd.f32 %v961_v24, %v11614_v59  ;;  %v2315_v32 = vld [vmem:[%s11475_s3 + $0x870] sm:$0xff] }
 0x28c   :  { %v3293_v14 = vmul.f32 %v2564_v27, %v2117_v7  ;;  %v3294_v48 = vmul.f32 %v2564_v27, %v2118_v43  ;;  %2743 = vperm.xlu1 %6256, %v9858_v36   ;;  %5400 = vmatprep.subr.bf16.mxu0 %v3688_v39  ;;  %v10066_v1 = vpop.permute.xlu0 %2598  ;;  %v2310_v36 = vld [vmem:[%s11475_s3 + $0x848] sm:$0xff]  ;;  %7105 = vrcp.f32 %v1791_v37  ;;  %v1367_v13 = vsub.f32 0.0, %v10085_v58  ;;  %v1033_v39 = vld [vmem:[%s11474_s2 + $0x520] sm:$0xff] }
 0x28d   :  { %5401 = vmatpush1.bf16.msra.mxu0 %v3687_v31  ;;  %2808 = vperm.xlu0 %6255, %v7080_v52   ;;  %v3299_v7 = vmul.f32 %v9917_v45, %v2123_v42  ;;  %7107 = vpow2.f32 %v1693_v49  ;;  %v1793_v52 = vadd.f32 1.0, %v10046_v12  ;;  %v6280_v12 = vld [vmem:[%s11476_s4 + $0x120] ss:$44 sps:$4 sm:$0xff]   ;;  %v3491_v20 = vmul.f32 %v9954_v2, %v2315_v32  ;;  %v6286_v32 = vld [vmem:[%s11476_s4 + $0x178] ss:$44 sps:$4 sm:$0xff]  }
 0x28e   :  { %v3593_v34 = vpack.c.bf16 %v3295_v22, %v3293_v14  ;;  %v3594_v50 = vpack.c.bf16 %v3296_v11, %v3294_v48  ;;  %4759 = vmatmul.mubr.bf16.gmra.mrb[8].mxu1 %v6271_v0  ;;  %v3300_v0 = vmul.f32 %v9917_v45, %v2124_v8  ;;  %7109 = vpow2.f32 %v1707_v46  ;;  %v2313_v45 = vld [vmem:[%s11475_s3 + $0x860] sm:$0xff] }
 0x28f   :  { %v3044_v40 = vpop.permute.xlu1 %3043  ;;  %4768 = vmatprep.mubr.bf16.mxu1 %v6275_v23  ;;  %7111 = vrcp.f32 %v1872_v54  ;;  %v1297_v48 = vsub.f32 0.0, %v10114_v25  ;;  %v11615_v47 = vld [vmem:[#allocation58_spill] sm:$0xff]  ;;  %v1035_v54 = vld [vmem:[%s11474_s2 + $0x530] sm:$0xff] }
 0x290   :  { %v3485_v61 = vmul.f32 %v3044_v40, %v2309_v30  ;;  %v3486_v21 = vmul.f32 %v3044_v40, %v2310_v36  ;;  %2753 = vperm.xlu1 %6256, %v9956_v16   ;;  %4883 = vmatprep.subr.bf16.mxu1 %v3594_v50  ;;  %v10099_v63 = vpop.permute.xlu0 %3078  ;;  %v7088_v16 = vpop.eup %7087  ;;  %7113 = vpow2.f32 %v10051_v35  ;;  %v10147_v17 = vadd.f32 %v1033_v39, %v11615_v47  ;;  %v6284_v36 = vld [vmem:[%s11476_s4 + $0x17c] ss:$44 sps:$4 sm:$0xff]   ;;  %v6283_v49 = vld [vmem:[%s11476_s4 + $0x160] ss:$44 sps:$4 sm:$0xff]  }
 0x291   :  { %4884 = vmatpush1.bf16.msra.mxu1 %v3593_v34  ;;  %2818 = vperm.xlu0 %6255, %v7086_v60   ;;  %v7090_v55 = vpop.eup %7089  ;;  %v963_v34 = vld [vmem:[%s11474_s2 + $0x2f0] sm:$0xff]  ;;  %v1697_v50 = vmul.f32 1.442695, %v1367_v13  ;;  %v3492_v35 = vmul.f32 %v9954_v2, %v2316_v5  ;;  %7115 = vrcp.f32 %v1793_v52  ;;  %v2128_v40 = vld [vmem:[%s11475_s3 + $0x298] sm:$0xff]  ;;  %v2125_v2 = vld [vmem:[%s11475_s3 + $0x280] sm:$0xff] }
 0x292   :  { %v3689_v56 = vpack.c.bf16 %v3487_v41, %v3485_v61  ;;  %v3690_v38 = vpack.c.bf16 %v3488_v26, %v3486_v21  ;;  %5278 = vmatmul.mubr.bf16.gmra.mrb[8].mxu0 %v6274_v53  ;;  %v7092_v31 = vpop.eup %7091  ;;  %v1802_v29 = vadd.f32 1.0, %v7090_v55  ;;  %v2127_v53 = vld [vmem:[%s11475_s3 + $0x290] sm:$0xff]  ;;  %v1795_v41 = vadd.f32 1.0, %v7088_v16 }
 0x293   :  { %v2574_v43 = vpop.permute.xlu1 %2573  ;;  %5287 = vmatprep.mubr.bf16.mxu0 %v6278_v51  ;;  %v7094_v23 = vpop.eup %7093  ;;  %v2126_v51 = vld [vmem:[%s11475_s3 + $0x288] sm:$0xff]  ;;  %v1557_v42 = vmul.f32 1.442695, %v1297_v48  ;;  %v11616_v61 = vld [vmem:[#allocation52_spill] sm:$0xff]  ;;  %v1369_v46 = vsub.f32 0.0, %v10147_v17  ;;  %v3303_v8 = vmul.f32 %v9993_v44, %v2127_v53 }
 0x294   :  { %v3297_v28 = vmul.f32 %v2574_v43, %v2121_v19  ;;  %v3298_v22 = vmul.f32 %v2574_v43, %v2122_v15  ;;  %2763 = vperm.xlu1 %6256, %v9995_v9   ;;  %5402 = vmatprep.subr.bf16.mxu0 %v3690_v38  ;;  %v10129_v27 = vpop.permute.xlu0 %2608  ;;  %v2314_v9 = vld [vmem:[%s11475_s3 + $0x868] sm:$0xff]  ;;  %v7096_v14 = vpop.eup %7095  ;;  %7117 = vrcp.f32 %v1802_v29  ;;  %v10176_v21 = vadd.f32 %v963_v34, %v11616_v61  ;;  %v2319_v38 = vld [vmem:[%s11475_s3 + $0x890] sm:$0xff] }
 0x295   :  { %5403 = vmatpush1.bf16.msra.mxu0 %v3689_v56  ;;  %2828 = vperm.xlu0 %6255, %v7092_v31   ;;  %v7098_v3 = vpop.eup %7097  ;;  %v6287_v15 = vld [vmem:[%s11476_s4 + $0x1bc] ss:$44 sps:$4 sm:$0xff]   ;;  %7119 = vpow2.f32 %v1697_v50  ;;  %v3304_v56 = vmul.f32 %v9993_v44, %v2128_v40  ;;  %v2317_v44 = vld [vmem:[%s11475_s3 + $0x880] sm:$0xff]  ;;  %v3495_v5 = vmul.f32 %v10031_v10, %v2319_v38 }
 0x296   :  { %v3595_v11 = vpack.c.bf16 %v3299_v7, %v3297_v28  ;;  %v3596_v18 = vpack.c.bf16 %v3300_v0, %v3298_v22  ;;  %4769 = vmatmul.mubr.bf16.gmra.mrb[12].mxu1 %v6277_v6  ;;  %v7100_v58 = vpop.eup %7099  ;;  %7121 = vrcp.f32 %v1795_v41  ;;  %v2320_v7 = vld [vmem:[%s11475_s3 + $0x898] sm:$0xff]  ;;  %v2318_v43 = vld [vmem:[%s11475_s3 + $0x888] sm:$0xff]  ;;  %v1299_v22 = vsub.f32 0.0, %v10176_v21  ;;  %v6293_v40 = vld [vmem:[%s11476_s4 + $0x214] ss:$44 sps:$4 sm:$0xff]  }
 0x297   :  { %v3054_v30 = vpop.permute.xlu1 %3053  ;;  %4778 = vmatprep.mubr.bf16.mxu1 %v6281_v33  ;;  %v7102_v26 = vpop.eup %7101  ;;  %v1797_v13 = vadd.f32 1.0, %v7100_v58  ;;  %v2322_v61 = vld [vmem:[%s11475_s3 + $0x8a8] sm:$0xff] }
 0x298   :  { %v3489_v4 = vmul.f32 %v3054_v30, %v2313_v45  ;;  %v3490_v37 = vmul.f32 %v3054_v30, %v2314_v9  ;;  %2773 = vperm.xlu1 %6256, %v10068_v62   ;;  %4885 = vmatprep.subr.bf16.mxu1 %v3596_v18  ;;  %v10161_v57 = vpop.permute.xlu0 %3088  ;;  %v1874_v62 = vadd.f32 1.0, %v7096_v14  ;;  %v7104_v16 = vpop.eup %7103  ;;  %v1804_v31 = vadd.f32 1.0, %v7102_v26  ;;  %v6290_v9 = vld [vmem:[%s11476_s4 + $0x1d4] ss:$44 sps:$4 sm:$0xff]   ;;  %v2132_v30 = vld [vmem:[%s11475_s3 + $0x2b8] sm:$0xff] }
 0x299   :  { %4886 = vmatpush1.bf16.msra.mxu1 %v3595_v11  ;;  %3188 = vperm.xlu0 %6255, %v7098_v3   ;;  %v7106_v25 = vpop.eup %7105  ;;  %v1701_v11 = vmul.f32 1.442695, %v1369_v46  ;;  %v3496_v18 = vmul.f32 %v10031_v10, %v2320_v7  ;;  %v2129_v10 = vld [vmem:[%s11475_s3 + $0x2a0] sm:$0xff] }
 0x29a   :  { %v3691_v60 = vpack.c.bf16 %v3491_v20, %v3489_v4  ;;  %v3692_v24 = vpack.c.bf16 %v3492_v35, %v3490_v37  ;;  %5288 = vmatmul.mubr.bf16.gmra.mrb[12].mxu0 %v6280_v12  ;;  %v7108_v33 = vpop.eup %7107  ;;  %7123 = vrcp.f32 %v1874_v62  ;;  %v2131_v12 = vld [vmem:[%s11475_s3 + $0x2b0] sm:$0xff]  ;;  %v6289_v35 = vld [vmem:[%s11476_s4 + $0x1b8] ss:$44 sps:$4 sm:$0xff]   ;;  %v1561_v4 = vmul.f32 1.442695, %v1299_v22 }
 0x29b   :  { %v2584_v19 = vpop.permute.xlu1 %2583  ;;  %5297 = vmatprep.mubr.bf16.mxu0 %v6284_v36  ;;  %v7110_v28 = vpop.eup %7109  ;;  %7125 = vpow2.f32 %v1557_v42  ;;  %v1869_v20 = vadd.f32 1.0, %v7108_v33  ;;  %v2130_v36 = vld [vmem:[%s11475_s3 + $0x2a8] sm:$0xff]  ;;  %v3307_v58 = vmul.f32 %v10066_v1, %v2131_v12  ;;  %v2323_v62 = vld [vmem:[%s11475_s3 + $0x8b0] sm:$0xff]  ;;  %v2324_v42 = vld [vmem:[%s11475_s3 + $0x8b8] sm:$0xff] }
 0x29c   :  { %v3301_v6 = vmul.f32 %v2584_v19, %v2125_v2  ;;  %v3302_v55 = vmul.f32 %v2584_v19, %v2126_v51  ;;  %2783 = vperm.xlu1 %6256, %v7094_v23   ;;  %5404 = vmatprep.subr.bf16.mxu0 %v3692_v24  ;;  %v10190_v59 = vpop.permute.xlu0 %2618  ;;  %v11617_v23 = vld [vmem:[#allocation11_spill] sm:$0xff]  ;;  %v7112_v29 = vpop.eup %7111  ;;  %7127 = vrcp.f32 %v1797_v13  ;;  %v1876_v3 = vadd.f32 1.0, %v7110_v28  ;;  %v6292_v19 = vld [vmem:[%s11476_s4 + $0x1d0] ss:$44 sps:$4 sm:$0xff]  }
 0x29d   :  { %5405 = vmatpush1.bf16.msra.mxu0 %v3691_v60  ;;  %2838 = vperm.xlu0 %6255, %v7104_v16   ;;  %v10206_v52 = vadd.f32 %v1035_v54, %v11617_v23  ;;  %v7114_v17 = vpop.eup %7113  ;;  %7129 = vrcp.f32 %v1804_v31  ;;  %v3308_v51 = vmul.f32 %v10066_v1, %v2132_v30  ;;  %v2321_v1 = vld [vmem:[%s11475_s3 + $0x8a0] sm:$0xff]  ;;  %v3499_v16 = vmul.f32 %v10099_v63, %v2323_v62  ;;  %v2136_v31 = vld [vmem:[%s11475_s3 + $0x2d8] sm:$0xff] }
 0x29e   :  { %v3597_v39 = vpack.c.bf16 %v3303_v8, %v3301_v6  ;;  %v3598_v0 = vpack.c.bf16 %v3304_v56, %v3302_v55  ;;  %4779 = vmatmul.mubr.bf16.gmra.mrb[16].mxu1 %v6283_v49  ;;  %v7116_v53 = vpop.eup %7115  ;;  %7131 = vpow2.f32 %v1701_v11  ;;  %v1799_v26 = vadd.f32 1.0, %v7114_v17  ;;  %v6296_v56 = vld [vmem:[%s11476_s4 + $0x22c] ss:$44 sps:$4 sm:$0xff]   ;;  %v6295_v28 = vld [vmem:[%s11476_s4 + $0x210] ss:$44 sps:$4 sm:$0xff]  }
 0x29f   :  { %v3064_v45 = vpop.permute.xlu1 %3063  ;;  %4788 = vmatprep.mubr.bf16.mxu1 %v6287_v15  ;;  %v1371_v37 = vsub.f32 0.0, %v10206_v52  ;;  %v7118_v2 = vpop.eup %7117  ;;  %7133 = vrcp.f32 %v1869_v20  ;;  %v3500_v55 = vmul.f32 %v10099_v63, %v2324_v42  ;;  %v2133_v63 = vld [vmem:[%s11475_s3 + $0x2c0] sm:$0xff]  ;;  %v2326_v17 = vld [vmem:[%s11475_s3 + $0x8c8] sm:$0xff]  ;;  %v2140_v62 = vld [vmem:[%s11475_s3 + $0x2f8] sm:$0xff] }
 0x2a0   :  { %v3493_v14 = vmul.f32 %v3064_v45, %v2317_v44  ;;  %v3494_v48 = vmul.f32 %v3064_v45, %v2318_v43  ;;  %2793 = vperm.xlu1 %6256, %v7106_v25   ;;  %4887 = vmatprep.subr.bf16.mxu1 %v3598_v0  ;;  %v10216_v47 = vpop.permute.xlu0 %3098  ;;  %v7120_v21 = vpop.eup %7119  ;;  %7135 = vrcp.f32 %v1876_v3  ;;  %v2135_v25 = vld [vmem:[%s11475_s3 + $0x2d0] sm:$0xff] }
 0x2a1   :  { %4888 = vmatpush1.bf16.msra.mxu1 %v3597_v39  ;;  %3198 = vperm.xlu0 %6255, %v7112_v29   ;;  %v7122_v15 = vpop.eup %7121  ;;  %7137 = vpow2.f32 %v1561_v4  ;;  %v1705_v6 = vmul.f32 1.442695, %v1371_v37  ;;  %v1871_v33 = vadd.f32 1.0, %v7120_v21  ;;  %v2134_v39 = vld [vmem:[%s11475_s3 + $0x2c8] sm:$0xff]  ;;  %v3311_v23 = vmul.f32 %v10129_v27, %v2135_v25  ;;  %v2327_v29 = vld [vmem:[%s11475_s3 + $0x8d0] sm:$0xff] }
 0x2a2   :  { %v3693_v34 = vpack.c.bf16 %v3495_v5, %v3493_v14  ;;  %v3694_v50 = vpack.c.bf16 %v3496_v18, %v3494_v48  ;;  %5298 = vmatmul.mubr.bf16.gmra.mrb[16].mxu0 %v6286_v32  ;;  %7139 = vrcp.f32 %v1799_v26  ;;  %v6299_v5 = vld [vmem:[%s11476_s4 + $0x26c] ss:$44 sps:$4 sm:$0xff]   ;;  %v2139_v37 = vld [vmem:[%s11475_s3 + $0x2f0] sm:$0xff] }
 0x2a3   :  { %v2594_v41 = vpop.permute.xlu1 %2593  ;;  %5307 = vmatprep.mubr.bf16.mxu0 %v6290_v9  ;;  %7141 = vpow2.f32 %v1705_v6  ;;  %v3312_v9 = vmul.f32 %v10129_v27, %v2136_v31  ;;  %v2328_v48 = vld [vmem:[%s11475_s3 + $0x8d8] sm:$0xff]  ;;  %v2325_v27 = vld [vmem:[%s11475_s3 + $0x8c0] sm:$0xff]  ;;  %v6301_v42 = vld [vmem:[%s11476_s4 + $0x268] ss:$44 sps:$4 sm:$0xff]  }
 0x2a4   :  { %v3305_v60 = vmul.f32 %v2594_v41, %v2129_v10  ;;  %v3306_v24 = vmul.f32 %v2594_v41, %v2130_v36  ;;  %2803 = vperm.xlu1 %6256, %v7116_v53   ;;  %5406 = vmatprep.subr.bf16.mxu0 %v3694_v50  ;;  %v10239_v49 = vpop.permute.xlu0 %2628  ;;  %v7124_v38 = vpop.eup %7123  ;;  %7143 = vrcp.f32 %v1871_v33  ;;  %v6298_v36 = vld [vmem:[%s11476_s4 + $0x228] ss:$44 sps:$4 sm:$0xff]   ;;  %v3504_v4 = vmul.f32 %v10161_v57, %v2328_v48 }
 0x2a5   :  { %5407 = vmatpush1.bf16.msra.mxu0 %v3693_v34  ;;  %2848 = vperm.xlu0 %6255, %v7118_v2   ;;  %v7126_v43 = vpop.eup %7125  ;;  %v3503_v34 = vmul.f32 %v10161_v57, %v2327_v29  ;;  %v2137_v57 = vld [vmem:[%s11475_s3 + $0x2e0] sm:$0xff]  ;;  %v2330_v6 = vld [vmem:[%s11475_s3 + $0x8e8] sm:$0xff] }
 0x2a6   :  { %v3599_v46 = vpack.c.bf16 %v3307_v58, %v3305_v60  ;;  %v3600_v8 = vpack.c.bf16 %v3308_v51, %v3306_v24  ;;  %4789 = vmatmul.mubr.bf16.gmra.mrb[20].mxu1 %v6289_v35  ;;  %v7128_v22 = vpop.eup %7127  ;;  %v1801_v14 = vadd.f32 1.0, %v7126_v43  ;;  %v6302_v35 = vld [vmem:[%s11476_s4 + $0x284] ss:$44 sps:$4 sm:$0xff]   ;;  %v2138_v60 = vld [vmem:[%s11475_s3 + $0x2e8] sm:$0xff] }
 0x2a7   :  { %v3074_v54 = vpop.permute.xlu1 %3073  ;;  %4798 = vmatprep.mubr.bf16.mxu1 %v6293_v40  ;;  %v7130_v45 = vpop.eup %7129  ;;  %v6307_v29 = vld [vmem:[%s11476_s4 + $0x2c0] ss:$44 sps:$4 sm:$0xff]   ;;  %v6311_v48 = vld [vmem:[%s11476_s4 + $0x31c] ss:$44 sps:$4 sm:$0xff]  }
 0x2a8   :  { %v3497_v13 = vmul.f32 %v3074_v54, %v2321_v1  ;;  %v3498_v7 = vmul.f32 %v3074_v54, %v2322_v61  ;;  %2813 = vperm.xlu1 %6256, %v7122_v15   ;;  %4889 = vmatprep.subr.bf16.mxu1 %v3600_v8  ;;  %v10261_v44 = vpop.permute.xlu0 %3108  ;;  %v7132_v20 = vpop.eup %7131  ;;  %7145 = vrcp.f32 %v1801_v14  ;;  %v3315_v61 = vmul.f32 %v10190_v59, %v2139_v37 }
 0x2a9   :  { %4890 = vmatpush1.bf16.msra.mxu1 %v3599_v46  ;;  %3208 = vperm.xlu0 %6255, %v7124_v38   ;;  %v7134_v3 = vpop.eup %7133  ;;  %v1873_v51 = vadd.f32 1.0, %v7132_v20  ;;  %v6305_v46 = vld [vmem:[%s11476_s4 + $0x2c4] ss:$44 sps:$4 sm:$0xff]   ;;  %v3316_v8 = vmul.f32 %v10190_v59, %v2140_v62  ;;  %v2332_v38 = vld [vmem:[%s11475_s3 + $0x8f8] sm:$0xff] }
 0x2aa   :  { %v3695_v0 = vpack.c.bf16 %v3499_v16, %v3497_v13  ;;  %v3696_v32 = vpack.c.bf16 %v3500_v55, %v3498_v7  ;;  %5308 = vmatmul.mubr.bf16.gmra.mrb[20].mxu0 %v6292_v19  ;;  %v7136_v53 = vpop.eup %7135  ;;  %v2331_v19 = vld [vmem:[%s11475_s3 + $0x8f0] sm:$0xff]  ;;  %v2329_v59 = vld [vmem:[%s11475_s3 + $0x8e0] sm:$0xff] }
 0x2ab   :  { %v2604_v52 = vpop.permute.xlu1 %2603  ;;  %5317 = vmatprep.mubr.bf16.mxu0 %v6296_v56  ;;  %v7138_v2 = vpop.eup %7137  ;;  %7147 = vrcp.f32 %v1873_v51  ;;  %v6304_v7 = vld [vmem:[%s11476_s4 + $0x280] ss:$44 sps:$4 sm:$0xff]   ;;  %v3507_v33 = vmul.f32 %v10216_v47, %v2331_v19 }
 0x2ac   :  { %v3309_v11 = vmul.f32 %v2604_v52, %v2133_v63  ;;  %v3310_v18 = vmul.f32 %v2604_v52, %v2134_v39  ;;  %2823 = vperm.xlu1 %6256, %v7128_v22   ;;  %5408 = vmatprep.subr.bf16.mxu0 %v3696_v32  ;;  %v10283_v12 = vpop.permute.xlu0 %2638  ;;  %v7140_v1 = vpop.eup %7139  ;;  %v1803_v56 = vadd.f32 1.0, %v7138_v2  ;;  %v6308_v63 = vld [vmem:[%s11476_s4 + $0x2dc] ss:$44 sps:$4 sm:$0xff]   ;;  %v3508_v39 = vmul.f32 %v10216_v47, %v2332_v38  ;;  %v2141_v47 = vld [vmem:[%s11475_s3 + $0x300] sm:$0xff]  ;;  %v2147_v2 = vld [vmem:[%s11475_s3 + $0x330] sm:$0xff] }
 0x2ad   :  { %5409 = vmatpush1.bf16.msra.mxu0 %v3695_v0  ;;  %2858 = vperm.xlu0 %6255, %v7130_v45   ;;  %v7142_v55 = vpop.eup %7141  ;;  %v2143_v0 = vld [vmem:[%s11475_s3 + $0x310] sm:$0xff]  ;;  %v2144_v52 = vld [vmem:[%s11475_s3 + $0x318] sm:$0xff] }
 0x2ae   :  { %v3601_v30 = vpack.c.bf16 %v3311_v23, %v3309_v11  ;;  %v3602_v10 = vpack.c.bf16 %v3312_v9, %v3310_v18  ;;  %4799 = vmatmul.mubr.bf16.gmra.mrb[24].mxu1 %v6295_v28  ;;  %v7144_v43 = vpop.eup %7143  ;;  %7149 = vrcp.f32 %v1803_v56  ;;  %v1875_v23 = vadd.f32 1.0, %v7142_v55 }
 0x2af   :  { %v3084_v50 = vpop.permute.xlu1 %3083  ;;  %4808 = vmatprep.mubr.bf16.mxu1 %v6299_v5  ;;  %v2142_v5 = vld [vmem:[%s11475_s3 + $0x308] sm:$0xff]  ;;  %v3319_v18 = vmul.f32 %v10239_v49, %v2143_v0 }
 0x2b0   :  { %v3501_v58 = vmul.f32 %v3084_v50, %v2325_v27  ;;  %v3502_v41 = vmul.f32 %v3084_v50, %v2326_v17  ;;  %3183 = vperm.xlu1 %6256, %v7134_v3   ;;  %4891 = vmatprep.subr.bf16.mxu1 %v3602_v10  ;;  %v10305_v40 = vpop.permute.xlu0 %3118  ;;  %v3320_v27 = vmul.f32 %v10239_v49, %v2144_v52  ;;  %v2335_v17 = vld [vmem:[%s11475_s3 + $0x910] sm:$0xff]  ;;  %7151 = vrcp.f32 %v1875_v23  ;;  %v2333_v49 = vld [vmem:[%s11475_s3 + $0x900] sm:$0xff]  ;;  %v2334_v3 = vld [vmem:[%s11475_s3 + $0x908] sm:$0xff] }
 0x2b1   :  { %4892 = vmatpush1.bf16.msra.mxu1 %v3601_v30  ;;  %3218 = vperm.xlu0 %6255, %v7136_v53   ;;  %v2152_v23 = vld [vmem:[%s11475_s3 + $0x358] sm:$0xff]  ;;  %v2149_v52 = vld [vmem:[%s11475_s3 + $0x340] sm:$0xff] }
 0x2b2   :  { %v3697_v24 = vpack.c.bf16 %v3503_v34, %v3501_v58  ;;  %v3698_v26 = vpack.c.bf16 %v3504_v4, %v3502_v41  ;;  %5318 = vmatmul.mubr.bf16.gmra.mrb[24].mxu0 %v6298_v36  ;;  %v7146_v11 = vpop.eup %7145  ;;  %v2336_v36 = vld [vmem:[%s11475_s3 + $0x918] sm:$0xff]  ;;  %v3511_v4 = vmul.f32 %v10261_v44, %v2335_v17  ;;  %v6314_v58 = vld [vmem:[%s11476_s4 + $0x334] ss:$44 sps:$4 sm:$0xff]  }
 0x2b3   :  { %v2614_v21 = vpop.permute.xlu1 %2613  ;;  %5327 = vmatprep.mubr.bf16.mxu0 %v6302_v35  ;;  %v6310_v35 = vld [vmem:[%s11476_s4 + $0x2d8] ss:$44 sps:$4 sm:$0xff]   ;;  %v3512_v41 = vmul.f32 %v10261_v44, %v2336_v36  ;;  %v2146_v44 = vld [vmem:[%s11475_s3 + $0x328] sm:$0xff] }
 0x2b4   :  { %v3313_v15 = vmul.f32 %v2614_v21, %v2137_v57  ;;  %v3314_v16 = vmul.f32 %v2614_v21, %v2138_v60  ;;  %2833 = vperm.xlu1 %6256, %v7140_v1   ;;  %5410 = vmatprep.subr.bf16.mxu0 %v3698_v26  ;;  %v10327_v54 = vpop.permute.xlu0 %2648  ;;  %v2148_v60 = vld [vmem:[%s11475_s3 + $0x338] sm:$0xff]  ;;  %v3323_v21 = vmul.f32 %v10283_v12, %v2147_v2 }
 0x2b5   :  { %5411 = vmatpush1.bf16.msra.mxu0 %v3697_v24  ;;  %v7148_v53 = vpop.eup %7147  ;;  %v2145_v24 = vld [vmem:[%s11475_s3 + $0x320] sm:$0xff]  ;;  %v3324_v19 = vmul.f32 %v10283_v12, %v2148_v60  ;;  %v2338_v12 = vld [vmem:[%s11475_s3 + $0x928] sm:$0xff]  ;;  %v2156_v2 = vld [vmem:[%s11475_s3 + $0x378] sm:$0xff] }
 0x2b6   :  { %v3603_v25 = vpack.c.bf16 %v3315_v61, %v3313_v15  ;;  %v3604_v13 = vpack.c.bf16 %v3316_v8, %v3314_v16  ;;  %4809 = vmatmul.mubr.bf16.gmra.mrb[28].mxu1 %v6301_v42  ;;  %v6313_v1 = vld [vmem:[%s11476_s4 + $0x318] ss:$44 sps:$4 sm:$0xff]   ;;  %v6317_v8 = vld [vmem:[%s11476_s4 + $0x374] ss:$44 sps:$4 sm:$0xff]  }
 0x2b7   :  { %v3094_v31 = vpop.permute.xlu1 %3093  ;;  %4818 = vmatprep.mubr.bf16.mxu1 %v6305_v46  ;;  %v2339_v15 = vld [vmem:[%s11475_s3 + $0x930] sm:$0xff] }
 0x2b8   :  { %v3505_v32 = vmul.f32 %v3094_v31, %v2329_v59  ;;  %v3506_v28 = vmul.f32 %v3094_v31, %v2330_v6  ;;  %3193 = vperm.xlu1 %6256, %v7144_v43   ;;  %4893 = vmatprep.subr.bf16.mxu1 %v3604_v13  ;;  %v10349_v22 = vpop.permute.xlu0 %3128  ;;  %v7150_v61 = vpop.eup %7149  ;;  %v2340_v59 = vld [vmem:[%s11475_s3 + $0x938] sm:$0xff]  ;;  %v2337_v6 = vld [vmem:[%s11475_s3 + $0x920] sm:$0xff]  ;;  %v3515_v43 = vmul.f32 %v10305_v40, %v2339_v15 }
 0x2b9   :  { %4894 = vmatpush1.bf16.msra.mxu1 %v3603_v25  ;;  %v6316_v13 = vld [vmem:[%s11476_s4 + $0x330] ss:$44 sps:$4 sm:$0xff]   ;;  %v6320_v31 = vld [vmem:[%s11476_s4 + $0x38c] ss:$44 sps:$4 sm:$0xff]   ;;  %v2345_v15 = vld [vmem:[%s11475_s3 + $0x960] sm:$0xff] }
 0x2ba   :  { %v3699_v45 = vpack.c.bf16 %v3507_v33, %v3505_v32  ;;  %v3700_v9 = vpack.c.bf16 %v3508_v39, %v3506_v28  ;;  %5328 = vmatmul.mubr.bf16.gmra.mrb[28].mxu0 %v6304_v7  ;;  %v7152_v7 = vpop.eup %7151  ;;  %v2151_v39 = vld [vmem:[%s11475_s3 + $0x350] sm:$0xff] }
 0x2bb   :  { %v2624_v14 = vpop.permute.xlu1 %2623  ;;  %5337 = vmatprep.mubr.bf16.mxu0 %v6308_v63  ;;  %v3516_v63 = vmul.f32 %v10305_v40, %v2340_v59  ;;  %v2150_v40 = vld [vmem:[%s11475_s3 + $0x348] sm:$0xff] }
 0x2bc   :  { %v3317_v20 = vmul.f32 %v2624_v14, %v2141_v47  ;;  %v3318_v30 = vmul.f32 %v2624_v14, %v2142_v5  ;;  %2843 = vperm.xlu1 %6256, %v7146_v11   ;;  %5412 = vmatprep.subr.bf16.mxu0 %v3700_v9  ;;  %v10371_v10 = vpop.permute.xlu0 %2658  ;;  %v3327_v11 = vmul.f32 %v10327_v54, %v2151_v39  ;;  %v2343_v14 = vld [vmem:[%s11475_s3 + $0x950] sm:$0xff]  ;;  %v6328_v59 = vld [vmem:[%s11476_s4 + $0x3e0] ss:$44 sps:$4 sm:$0xff]  }
 0x2bd   :  { %5413 = vmatpush1.bf16.msra.mxu0 %v3699_v45  ;;  %v6319_v45 = vld [vmem:[%s11476_s4 + $0x370] ss:$44 sps:$4 sm:$0xff]  }
 0x2be   :  { %v3605_v34 = vpack.c.bf16 %v3319_v18, %v3317_v20  ;;  %v3606_v50 = vpack.c.bf16 %v3320_v27, %v3318_v30  ;;  %4819 = vmatmul.mubr.bf16.gmra.mrb[32].mxu1 %v6307_v29  ;;  %v6323_v29 = vld [vmem:[%s11476_s4 + $0x3cc] ss:$44 sps:$4 sm:$0xff]   ;;  %v3328_v18 = vmul.f32 %v10327_v54, %v2152_v23  ;;  %v2341_v30 = vld [vmem:[%s11475_s3 + $0x940] sm:$0xff] }
 0x2bf   :  { %v3104_v37 = vpop.permute.xlu1 %3103  ;;  %4828 = vmatprep.mubr.bf16.mxu1 %v6311_v48  ;;  %v2344_v20 = vld [vmem:[%s11475_s3 + $0x958] sm:$0xff]  ;;  %v2342_v54 = vld [vmem:[%s11475_s3 + $0x948] sm:$0xff] }
 0x2c0   :  { %v3509_v51 = vmul.f32 %v3104_v37, %v2333_v49  ;;  %v3510_v62 = vmul.f32 %v3104_v37, %v2334_v3  ;;  %3203 = vperm.xlu1 %6256, %v7148_v53   ;;  %4895 = vmatprep.subr.bf16.mxu1 %v3606_v50  ;;  %v10393_v57 = vpop.permute.xlu0 %3138  ;;  %v6322_v3 = vld [vmem:[%s11476_s4 + $0x388] ss:$44 sps:$4 sm:$0xff]   ;;  %v6326_v50 = vld [vmem:[%s11476_s4 + $0x3e4] ss:$44 sps:$4 sm:$0xff]   ;;  %v3520_v53 = vmul.f32 %v10349_v22, %v2344_v20 }
 0x2c1   :  { %4896 = vmatpush1.bf16.msra.mxu1 %v3605_v34 }
 0x2c2   :  { %v3701_v26 = vpack.c.bf16 %v3511_v4, %v3509_v51  ;;  %v3702_v42 = vpack.c.bf16 %v3512_v41, %v3510_v62  ;;  %5338 = vmatmul.mubr.bf16.gmra.mrb[32].mxu0 %v6310_v35  ;;  %v3519_v35 = vmul.f32 %v10349_v22, %v2343_v14  ;;  %v2155_v4 = vld [vmem:[%s11475_s3 + $0x370] sm:$0xff]  ;;  %v2153_v51 = vld [vmem:[%s11475_s3 + $0x360] sm:$0xff]  ;;  %v2154_v22 = vld [vmem:[%s11475_s3 + $0x368] sm:$0xff] }
 0x2c3   :  { %v2634_v46 = vpop.permute.xlu1 %2633  ;;  %5347 = vmatprep.mubr.bf16.mxu0 %v6314_v58 }
 0x2c4   :  { %v3321_v16 = vmul.f32 %v2634_v46, %v2145_v24  ;;  %v3322_v56 = vmul.f32 %v2634_v46, %v2146_v44  ;;  %2853 = vperm.xlu1 %6256, %v7150_v61   ;;  %5414 = vmatprep.subr.bf16.mxu0 %v3702_v42  ;;  %v10415_v38 = vpop.permute.xlu0 %2668  ;;  %v6325_v24 = vld [vmem:[%s11476_s4 + $0x3c8] ss:$44 sps:$4 sm:$0xff]   ;;  %v3331_v42 = vmul.f32 %v10371_v10, %v2155_v4 }
 0x2c5   :  { %5415 = vmatpush1.bf16.msra.mxu0 %v3701_v26  ;;  %v6329_v26 = vld [vmem:[%s11476_s4 + $0x424] ss:$44 sps:$4 sm:$0xff]  }
 0x2c6   :  { %v3607_v55 = vpack.c.bf16 %v3323_v21, %v3321_v16  ;;  %v3608_v25 = vpack.c.bf16 %v3324_v19, %v3322_v56  ;;  %4829 = vmatmul.mubr.bf16.gmra.mrb[36].mxu1 %v6313_v1  ;;  %v3332_v1 = vmul.f32 %v10371_v10, %v2156_v2  ;;  %v2347_v61 = vld [vmem:[%s11475_s3 + $0x970] sm:$0xff]  ;;  %v2348_v19 = vld [vmem:[%s11475_s3 + $0x978] sm:$0xff]  ;;  %v2346_v10 = vld [vmem:[%s11475_s3 + $0x968] sm:$0xff] }
 0x2c7   :  { %v3114_v33 = vpop.permute.xlu1 %3113  ;;  %4838 = vmatprep.mubr.bf16.mxu1 %v6317_v8 }
 0x2c8   :  { %v3513_v0 = vmul.f32 %v3114_v33, %v2337_v6  ;;  %v3514_v32 = vmul.f32 %v3114_v33, %v2338_v12  ;;  %3213 = vperm.xlu1 %6256, %v7152_v7   ;;  %4897 = vmatprep.subr.bf16.mxu1 %v3608_v25  ;;  %v10437_v28 = vpop.permute.xlu0 %3148  ;;  %v6332_v12 = vld [vmem:[%s11476_s4 + $0x43c] ss:$44 sps:$4 sm:$0xff]   ;;  %v3524_v25 = vmul.f32 %v10393_v57, %v2348_v19 }
 0x2c9   :  { %4898 = vmatpush1.bf16.msra.mxu1 %v3607_v55  ;;  %v3523_v55 = vmul.f32 %v10393_v57, %v2347_v61  ;;  %v2158_v57 = vld [vmem:[%s11475_s3 + $0x388] sm:$0xff] }
 0x2ca   :  { %v3703_v47 = vpack.c.bf16 %v3515_v43, %v3513_v0  ;;  %v3704_v5 = vpack.c.bf16 %v3516_v63, %v3514_v32  ;;  %5348 = vmatmul.mubr.bf16.gmra.mrb[36].mxu0 %v6316_v13  ;;  %v2159_v13 = vld [vmem:[%s11475_s3 + $0x390] sm:$0xff]  ;;  %v2157_v63 = vld [vmem:[%s11475_s3 + $0x380] sm:$0xff] }
 0x2cb   :  { %v2644_v9 = vpop.permute.xlu1 %2643  ;;  %5357 = vmatprep.mubr.bf16.mxu0 %v6320_v31  ;;  %v2160_v31 = vld [vmem:[%s11475_s3 + $0x398] sm:$0xff]  ;;  %v6331_v32 = vld [vmem:[%s11476_s4 + $0x420] ss:$44 sps:$4 sm:$0xff]  }
 0x2cc   :  { %v3325_v48 = vmul.f32 %v2644_v9, %v2149_v52  ;;  %v3326_v27 = vmul.f32 %v2644_v9, %v2150_v40  ;;  %5416 = vmatprep.subr.bf16.mxu0 %v3704_v5  ;;  %v10459_v17 = vpop.permute.xlu0 %2678  ;;  %v6335_v52 = vld [vmem:[%s11476_s4 + $0x47c] ss:$44 sps:$4 sm:$0xff]   ;;  %v3335_v40 = vmul.f32 %v10415_v38, %v2159_v13  ;;  %v2351_v5 = vld [vmem:[%s11475_s3 + $0x990] sm:$0xff] }
 0x2cd   :  { %5417 = vmatpush1.bf16.msra.mxu0 %v3703_v47  ;;  %v3336_v47 = vmul.f32 %v10415_v38, %v2160_v31  ;;  %v2350_v38 = vld [vmem:[%s11475_s3 + $0x988] sm:$0xff] }
 0x2ce   :  { %v3609_v36 = vpack.c.bf16 %v3327_v11, %v3325_v48  ;;  %v3610_v49 = vpack.c.bf16 %v3328_v18, %v3326_v27  ;;  %4839 = vmatmul.mubr.bf16.gmra.mrb[40].mxu1 %v6319_v45  ;;  %v2352_v11 = vld [vmem:[%s11475_s3 + $0x998] sm:$0xff]  ;;  %v2349_v18 = vld [vmem:[%s11475_s3 + $0x980] sm:$0xff] }
 0x2cf   :  { %v3124_v34 = vpop.permute.xlu1 %3123  ;;  %4848 = vmatprep.mubr.bf16.mxu1 %v6323_v29  ;;  %v6334_v27 = vld [vmem:[%s11476_s4 + $0x438] ss:$44 sps:$4 sm:$0xff]  }
 0x2d0   :  { %v3517_v37 = vmul.f32 %v3124_v34, %v2341_v30  ;;  %v3518_v58 = vmul.f32 %v3124_v34, %v2342_v54  ;;  %4899 = vmatprep.subr.bf16.mxu1 %v3610_v49  ;;  %v10481_v41 = vpop.permute.xlu0 %3158  ;;  %v6338_v30 = vld [vmem:[%s11476_s4 + $0x494] ss:$44 sps:$4 sm:$0xff]   ;;  %v3527_v54 = vmul.f32 %v10437_v28, %v2351_v5 }
 0x2d1   :  { %4900 = vmatpush1.bf16.msra.mxu1 %v3609_v36  ;;  %v3528_v36 = vmul.f32 %v10437_v28, %v2352_v11  ;;  %v2163_v49 = vld [vmem:[%s11475_s3 + $0x3b0] sm:$0xff]  ;;  %v2162_v28 = vld [vmem:[%s11475_s3 + $0x3a8] sm:$0xff] }
 0x2d2   :  { %v3705_v62 = vpack.c.bf16 %v3519_v35, %v3517_v37  ;;  %v3706_v60 = vpack.c.bf16 %v3520_v53, %v3518_v58  ;;  %5358 = vmatmul.mubr.bf16.gmra.mrb[40].mxu0 %v6322_v3  ;;  %v2164_v35 = vld [vmem:[%s11475_s3 + $0x3b8] sm:$0xff]  ;;  %v2161_v53 = vld [vmem:[%s11475_s3 + $0x3a0] sm:$0xff]  ;;  %v2171_v11 = vld [vmem:[%s11475_s3 + $0x3f0] sm:$0xff] }
 0x2d3   :  { %v2654_v44 = vpop.permute.xlu1 %2653  ;;  %5367 = vmatprep.mubr.bf16.mxu0 %v6326_v50  ;;  %v6337_v58 = vld [vmem:[%s11476_s4 + $0x478] ss:$44 sps:$4 sm:$0xff]  }
 0x2d4   :  { %v3329_v21 = vmul.f32 %v2654_v44, %v2153_v51  ;;  %v3330_v46 = vmul.f32 %v2654_v44, %v2154_v22  ;;  %5418 = vmatprep.subr.bf16.mxu0 %v3706_v60  ;;  %v10503_v8 = vpop.permute.xlu0 %2688  ;;  %v6343_v51 = vld [vmem:[%s11476_s4 + $0xc] ss:$44 sps:$4 sm:$0xff]   ;;  %v3339_v22 = vmul.f32 %v10459_v17, %v2163_v49  ;;  %v2355_v60 = vld [vmem:[%s11475_s3 + $0x9b0] sm:$0xff] }
 0x2d5   :  { %5419 = vmatpush1.bf16.msra.mxu0 %v3705_v62  ;;  %v3340_v62 = vmul.f32 %v10459_v17, %v2164_v35  ;;  %v2354_v17 = vld [vmem:[%s11475_s3 + $0x9a8] sm:$0xff] }
 0x2d6   :  { %v3611_v16 = vpack.c.bf16 %v3331_v42, %v3329_v21  ;;  %v3612_v56 = vpack.c.bf16 %v3332_v1, %v3330_v46  ;;  %4849 = vmatmul.mubr.bf16.gmra.mrb[44].mxu1 %v6325_v24  ;;  %v2356_v42 = vld [vmem:[%s11475_s3 + $0x9b8] sm:$0xff]  ;;  %v2353_v1 = vld [vmem:[%s11475_s3 + $0x9a0] sm:$0xff] }
 0x2d7   :  { %v3134_v6 = vpop.permute.xlu1 %3133  ;;  %4858 = vmatprep.mubr.bf16.mxu1 %v6329_v26  ;;  %v6340_v46 = vld [vmem:[%s11476_s4 + $0x490] ss:$44 sps:$4 sm:$0xff]  }
 0x2d8   :  { %v3521_v7 = vmul.f32 %v3134_v6, %v2345_v15  ;;  %v3522_v43 = vmul.f32 %v3134_v6, %v2346_v10  ;;  %4901 = vmatprep.subr.bf16.mxu1 %v3612_v56  ;;  %v10525_v33 = vpop.permute.xlu0 %3168  ;;  %v6346_v15 = vld [vmem:[%s11476_s4 + $0x24] ss:$44 sps:$4 sm:$0xff]   ;;  %v3531_v10 = vmul.f32 %v10481_v41, %v2355_v60  ;;  %v2176_v60 = vld [vmem:[%s11475_s3 + $0x418] sm:$0xff] }
 0x2d9   :  { %4902 = vmatpush1.bf16.msra.mxu1 %v3611_v16  ;;  %v3532_v16 = vmul.f32 %v10481_v41, %v2356_v42  ;;  %v2167_v56 = vld [vmem:[%s11475_s3 + $0x3d0] sm:$0xff]  ;;  %v2166_v41 = vld [vmem:[%s11475_s3 + $0x3c8] sm:$0xff] }
 0x2da   :  { %v3707_v39 = vpack.c.bf16 %v3523_v55, %v3521_v7  ;;  %v3708_v0 = vpack.c.bf16 %v3524_v25, %v3522_v43  ;;  %5368 = vmatmul.mubr.bf16.gmra.mrb[44].mxu0 %v6328_v59  ;;  %v2168_v55 = vld [vmem:[%s11475_s3 + $0x3d8] sm:$0xff]  ;;  %v2165_v25 = vld [vmem:[%s11475_s3 + $0x3c0] sm:$0xff]  ;;  %v3343_v31 = vmul.f32 %v10503_v8, %v2167_v56  ;;  %v6341_v42 = vld [vmem:[%s11476_s4 + $0x8] ss:$44 sps:$4 sm:$0xff]  }
 0x2db   :  { %v2664_v23 = vpop.permute.xlu1 %2663  ;;  %5377 = vmatprep.mubr.bf16.mxu0 %v6332_v12  ;;  %v2180_v56 = vld [vmem:[%s11475_s3 + $0x438] sm:$0xff] }
 0x2dc   :  { %v3333_v45 = vmul.f32 %v2664_v23, %v2157_v63  ;;  %v3334_v9 = vmul.f32 %v2664_v23, %v2158_v57  ;;  %5420 = vmatprep.subr.bf16.mxu0 %v3708_v0  ;;  %v10547_v29 = vpop.permute.xlu0 %2698  ;;  %v3344_v63 = vmul.f32 %v10503_v8, %v2168_v55  ;;  %v2359_v57 = vld [vmem:[%s11475_s3 + $0x9d0] sm:$0xff]  ;;  %v2360_v23 = vld [vmem:[%s11475_s3 + $0x9d8] sm:$0xff]  ;;  %v2358_v8 = vld [vmem:[%s11475_s3 + $0x9c8] sm:$0xff] }
 0x2dd   :  { %5421 = vmatpush1.bf16.msra.mxu0 %v3707_v39  ;;  %v6344_v55 = vld [vmem:[%s11476_s4 + $0x20] ss:$44 sps:$4 sm:$0xff]  }
 0x2de   :  { %v3613_v14 = vpack.c.bf16 %v3335_v40, %v3333_v45  ;;  %v3614_v48 = vpack.c.bf16 %v3336_v47, %v3334_v9  ;;  %4859 = vmatmul.mubr.bf16.gmra.mrb[48].mxu1 %v6331_v32  ;;  %v3535_v45 = vmul.f32 %v10525_v33, %v2359_v57  ;;  %v3536_v9 = vmul.f32 %v10525_v33, %v2360_v23  ;;  %v2170_v33 = vld [vmem:[%s11475_s3 + $0x3e8] sm:$0xff] }
 0x2df   :  { %v3144_v20 = vpop.permute.xlu1 %3143  ;;  %4868 = vmatprep.mubr.bf16.mxu1 %v6335_v52  ;;  %v2357_v52 = vld [vmem:[%s11475_s3 + $0x9c0] sm:$0xff] }
 0x2e0   :  { %v3525_v3 = vmul.f32 %v3144_v20, %v2349_v18  ;;  %v3526_v34 = vmul.f32 %v3144_v20, %v2350_v38  ;;  %4903 = vmatprep.subr.bf16.mxu1 %v3614_v48  ;;  %v10569_v50 = vpop.permute.xlu0 %3178  ;;  %v2172_v48 = vld [vmem:[%s11475_s3 + $0x3f8] sm:$0xff] }
 0x2e1   :  { %4904 = vmatpush1.bf16.msra.mxu1 %v3613_v14  ;;  %v3348_v49 = vmul.f32 %v10547_v29, %v2172_v48  ;;  %v2187_v48 = vld [vmem:[%s11475_s3 + $0x470] sm:$0xff] }
 0x2e2   :  { %v3709_v4 = vpack.c.bf16 %v3527_v54, %v3525_v3  ;;  %v3710_v37 = vpack.c.bf16 %v3528_v36, %v3526_v34  ;;  %5378 = vmatmul.mubr.bf16.gmra.mrb[48].mxu0 %v6334_v27  ;;  %v2169_v27 = vld [vmem:[%s11475_s3 + $0x3e0] sm:$0xff]  ;;  %v3347_v36 = vmul.f32 %v10547_v29, %v2171_v11  ;;  %v2363_v3 = vld [vmem:[%s11475_s3 + $0x9f0] sm:$0xff]  ;;  %v2362_v29 = vld [vmem:[%s11475_s3 + $0x9e8] sm:$0xff] }
 0x2e3   :  { %v2674_v2 = vpop.permute.xlu1 %2673  ;;  %5387 = vmatprep.mubr.bf16.mxu0 %v6338_v30 }
 0x2e4   :  { %v3337_v24 = vmul.f32 %v2674_v2, %v2161_v53  ;;  %v3338_v44 = vmul.f32 %v2674_v2, %v2162_v28  ;;  %5422 = vmatprep.subr.bf16.mxu0 %v3710_v37  ;;  %v10591_v26 = vpop.permute.xlu0 %2708  ;;  %v2364_v28 = vld [vmem:[%s11475_s3 + $0x9f8] sm:$0xff] }
 0x2e5   :  { %5423 = vmatpush1.bf16.msra.mxu0 %v3709_v4  ;;  %v2361_v4 = vld [vmem:[%s11475_s3 + $0x9e0] sm:$0xff] }
 0x2e6   :  { %v3615_v61 = vpack.c.bf16 %v3339_v22, %v3337_v24  ;;  %v3616_v21 = vpack.c.bf16 %v3340_v62, %v3338_v44  ;;  %4869 = vmatmul.mubr.bf16.gmra.mrb[52].mxu1 %v6337_v58  ;;  %v3540_v22 = vmul.f32 %v10569_v50, %v2364_v28  ;;  %v2175_v62 = vld [vmem:[%s11475_s3 + $0x410] sm:$0xff] }
 0x2e7   :  { %v3154_v19 = vpop.permute.xlu1 %3153  ;;  %4911 = vmatprep.mubr.bf16.mxu1 %v6343_v51  ;;  %v3539_v51 = vmul.f32 %v10569_v50, %v2363_v3  ;;  %v2173_v50 = vld [vmem:[%s11475_s3 + $0x400] sm:$0xff] }
 0x2e8   :  { %v3529_v59 = vmul.f32 %v3154_v19, %v2353_v1  ;;  %v3530_v6 = vmul.f32 %v3154_v19, %v2354_v17  ;;  %4905 = vmatprep.subr.bf16.mxu1 %v3616_v21  ;;  %v10613_v12 = vpop.permute.xlu0 %2718  ;;  %v2174_v17 = vld [vmem:[%s11475_s3 + $0x408] sm:$0xff]  ;;  %v3351_v19 = vmul.f32 %v10591_v26, %v2175_v62 }
 0x2e9   :  { %4906 = vmatpush1.bf16.msra.mxu1 %v3615_v61  ;;  %v6347_v61 = vld [vmem:[%s11476_s4 + $0x64] ss:$44 sps:$4 sm:$0xff]   ;;  %v3356_v57 = vmul.f32 %v10613_v12, %v2180_v56  ;;  %v2190_v62 = vld [vmem:[%s11475_s3 + $0x488] sm:$0xff] }
 0x2ea   :  { %v3711_v13 = vpack.c.bf16 %v3531_v10, %v3529_v59  ;;  %v3712_v7 = vpack.c.bf16 %v3532_v16, %v3530_v6  ;;  %5388 = vmatmul.mubr.bf16.gmra.mrb[52].mxu0 %v6340_v46  ;;  %v3352_v10 = vmul.f32 %v10591_v26, %v2176_v60  ;;  %v2179_v16 = vld [vmem:[%s11475_s3 + $0x430] sm:$0xff]  ;;  %v2177_v26 = vld [vmem:[%s11475_s3 + $0x420] sm:$0xff] }
 0x2eb   :  { %v2684_v43 = vpop.permute.xlu1 %2683  ;;  %5430 = vmatprep.mubr.bf16.mxu0 %v6346_v15  ;;  %v6359_v60 = vld [vmem:[%s11476_s4 + $0x114] ss:$44 sps:$4 sm:$0xff]  }
 0x2ec   :  { %v3341_v39 = vmul.f32 %v2684_v43, %v2165_v25  ;;  %v3342_v0 = vmul.f32 %v2684_v43, %v2166_v41  ;;  %5424 = vmatprep.subr.bf16.mxu0 %v3712_v7  ;;  %v10629_v32 = vpop.permute.xlu0 %2728  ;;  %v2178_v41 = vld [vmem:[%s11475_s3 + $0x428] sm:$0xff] }
 0x2ed   :  { %5425 = vmatpush1.bf16.msra.mxu0 %v3711_v13  ;;  %v6350_v13 = vld [vmem:[%s11476_s4 + $0x7c] ss:$44 sps:$4 sm:$0xff]  }
 0x2ee   :  { %v3617_v40 = vpack.c.bf16 %v3343_v31, %v3341_v39  ;;  %v3618_v47 = vpack.c.bf16 %v3344_v63, %v3342_v0  ;;  %v3355_v31 = vmul.f32 %v10613_v12, %v2179_v16  ;;  %v2183_v39 = vld [vmem:[%s11475_s3 + $0x450] sm:$0xff]  ;;  %v2184_v0 = vld [vmem:[%s11475_s3 + $0x458] sm:$0xff]  ;;  %v2181_v12 = vld [vmem:[%s11475_s3 + $0x440] sm:$0xff] }
 0x2ef   :  { %v3164_v5 = vpop.permute.xlu1 %3163  ;;  %v3359_v11 = vmul.f32 %v10629_v32, %v2183_v39  ;;  %v6362_v16 = vld [vmem:[%s11476_s4 + $0x12c] ss:$44 sps:$4 sm:$0xff]  }
 0x2f0   :  { %v3533_v18 = vmul.f32 %v3164_v5, %v2357_v52  ;;  %v3534_v38 = vmul.f32 %v3164_v5, %v2358_v8  ;;  %4907 = vmatprep.subr.bf16.mxu1 %v3618_v47  ;;  %v10645_v14 = vpop.permute.xlu0 %2738  ;;  %v2182_v47 = vld [vmem:[%s11475_s3 + $0x448] sm:$0xff] }
 0x2f1   :  { %4908 = vmatpush1.bf16.msra.mxu1 %v3617_v40  ;;  %v6349_v40 = vld [vmem:[%s11476_s4 + $0x60] ss:$44 sps:$4 sm:$0xff]   ;;  %v6353_v5 = vld [vmem:[%s11476_s4 + $0xbc] ss:$44 sps:$4 sm:$0xff]  }
 0x2f2   :  { %v3713_v20 = vpack.c.bf16 %v3535_v45, %v3533_v18  ;;  %v3714_v30 = vpack.c.bf16 %v3536_v9, %v3534_v38  ;;  %v3360_v38 = vmul.f32 %v10629_v32, %v2184_v0  ;;  %v2185_v32 = vld [vmem:[%s11475_s3 + $0x460] sm:$0xff]  ;;  %v6365_v39 = vld [vmem:[%s11476_s4 + $0x16c] ss:$44 sps:$4 sm:$0xff]  }
 0x2f3   :  { %v2694_v54 = vpop.permute.xlu1 %2693 }
 0x2f4   :  { %v3345_v34 = vmul.f32 %v2694_v54, %v2169_v27  ;;  %v3346_v35 = vmul.f32 %v2694_v54, %v2170_v33  ;;  %5426 = vmatprep.subr.bf16.mxu0 %v3714_v30  ;;  %v10661_v53 = vpop.permute.xlu0 %2748  ;;  %v2188_v27 = vld [vmem:[%s11475_s3 + $0x478] sm:$0xff] }
 0x2f5   :  { %5427 = vmatpush1.bf16.msra.mxu0 %v3713_v20  ;;  %v6352_v54 = vld [vmem:[%s11476_s4 + $0x78] ss:$44 sps:$4 sm:$0xff]  }
 0x2f6   :  { %v3619_v37 = vpack.c.bf16 %v3347_v36, %v3345_v34  ;;  %v3620_v58 = vpack.c.bf16 %v3348_v49, %v3346_v35  ;;  %v2186_v36 = vld [vmem:[%s11475_s3 + $0x468] sm:$0xff]  ;;  %v6356_v49 = vld [vmem:[%s11476_s4 + $0xd4] ss:$44 sps:$4 sm:$0xff]   ;;  %v3363_v35 = vmul.f32 %v10645_v14, %v2187_v48  ;;  %v6368_v48 = vld [vmem:[%s11476_s4 + $0x184] ss:$44 sps:$4 sm:$0xff]  }
 0x2f7   :  { %v3174_v2 = vpop.permute.xlu1 %3173 }
 0x2f8   :  { %v3537_v24 = vmul.f32 %v3174_v2, %v2361_v4  ;;  %v3538_v44 = vmul.f32 %v3174_v2, %v2362_v29  ;;  %4909 = vmatprep.subr.bf16.mxu1 %v3620_v58  ;;  %v10683_v1 = vpop.permute.xlu0 %2758  ;;  %v3364_v4 = vmul.f32 %v10645_v14, %v2188_v27  ;;  %v2191_v29 = vld [vmem:[%s11475_s3 + $0x490] sm:$0xff]  ;;  %v2189_v14 = vld [vmem:[%s11475_s3 + $0x480] sm:$0xff] }
 0x2f9   :  { %4910 = vmatpush1.bf16.msra.mxu1 %v3619_v37  ;;  %v2192_v37 = vld [vmem:[%s11475_s3 + $0x498] sm:$0xff] }
 0x2fa   :  { %v3715_v21 = vpack.c.bf16 %v3539_v51, %v3537_v24  ;;  %v3716_v46 = vpack.c.bf16 %v3540_v22, %v3538_v44  ;;  %v6355_v22 = vld [vmem:[%s11476_s4 + $0xb8] ss:$44 sps:$4 sm:$0xff]  }
 0x2fb   :  { %v2704_v15 = vpop.permute.xlu1 %2703 }
 0x2fc   :  { %v3349_v59 = vmul.f32 %v2704_v15, %v2173_v50  ;;  %v3350_v6 = vmul.f32 %v2704_v15, %v2174_v17  ;;  %4912 = vmatmul.mubr.bf16.vlgmr.msra.gmra.mrb[0].mxu1 %v6341_v42  ;;  %5428 = vmatprep.subr.bf16.mxu0 %v3716_v46  ;;  %v10705_v25 = vpop.permute.xlu0 %2768  ;;  %v3367_v42 = vmul.f32 %v10661_v53, %v2191_v29  ;;  %v6358_v15 = vld [vmem:[%s11476_s4 + $0xd0] ss:$44 sps:$4 sm:$0xff]  }
 0x2fd   :  { %5429 = vmatpush1.bf16.msra.mxu0 %v3715_v21  ;;  %4921 = vmatprep.mubr.bf16.mxu1 %v6347_v61  ;;  %v3368_v17 = vmul.f32 %v10661_v53, %v2192_v37  ;;  %v2195_v61 = vld [vmem:[%s11475_s3 + $0x4b0] sm:$0xff]  ;;  %v2196_v21 = vld [vmem:[%s11475_s3 + $0x4b8] sm:$0xff]  ;;  %v2193_v53 = vld [vmem:[%s11475_s3 + $0x4a0] sm:$0xff] }
 0x2fe   :  { %v3621_v7 = vpack.c.bf16 %v3351_v19, %v3349_v59  ;;  %v3622_v43 = vpack.c.bf16 %v3352_v10, %v3350_v6  ;;  %v2194_v10 = vld [vmem:[%s11475_s3 + $0x4a8] sm:$0xff] }
 0x2ff   :  { %v2714_v63 = vpop.permute.xlu1 %2713 }
 0x300   :  { %v3353_v23 = vmul.f32 %v2714_v63, %v2177_v26  ;;  %v3354_v52 = vmul.f32 %v2714_v63, %v2178_v41  ;;  %5052 = vmatprep.subr.bf16.mxu1 %v3622_v43  ;;  %5431 = vmatmul.mubr.bf16.vlgmr.msra.gmra.mrb[0].mxu0 %v6344_v55  ;;  %v10724_v8 = vpop.permute.xlu0 %2778  ;;  %v3371_v55 = vmul.f32 %v10683_v1, %v2195_v61  ;;  %v6361_v63 = vld [vmem:[%s11476_s4 + $0x110] ss:$44 sps:$4 sm:$0xff]  }
 0x301   :  { %5053 = vmatpush1.bf16.msra.mxu1 %v3621_v7  ;;  %5440 = vmatprep.mubr.bf16.mxu0 %v6350_v13  ;;  %v3372_v41 = vmul.f32 %v10683_v1, %v2196_v21  ;;  %v2199_v13 = vld [vmem:[%s11475_s3 + $0x4d0] sm:$0xff]  ;;  %v2200_v7 = vld [vmem:[%s11475_s3 + $0x4d8] sm:$0xff]  ;;  %v2197_v1 = vld [vmem:[%s11475_s3 + $0x4c0] sm:$0xff] }
 0x302   :  { %v3623_v45 = vpack.c.bf16 %v3355_v31, %v3353_v23  ;;  %v3624_v9 = vpack.c.bf16 %v3356_v57, %v3354_v52  ;;  %v2198_v57 = vld [vmem:[%s11475_s3 + $0x4c8] sm:$0xff]  ;;  %v3375_v52 = vmul.f32 %v10705_v25, %v2199_v13 }
 0x303   :  { %v2724_v18 = vpop.permute.xlu1 %2723 }
 0x304   :  { %v3357_v33 = vmul.f32 %v2724_v18, %v2181_v12  ;;  %v3358_v20 = vmul.f32 %v2724_v18, %v2182_v47  ;;  %4922 = vmatmul.mubr.bf16.gmra.mrb[4].mxu1 %v6349_v40  ;;  %5054 = vmatprep.subr.bf16.mxu1 %v3624_v9  ;;  %v10746_v30 = vpop.permute.xlu0 %2788  ;;  %v3376_v12 = vmul.f32 %v10705_v25, %v2200_v7  ;;  %v2203_v47 = vld [vmem:[%s11475_s3 + $0x4f0] sm:$0xff]  ;;  %v2201_v25 = vld [vmem:[%s11475_s3 + $0x4e0] sm:$0xff] }
 0x305   :  { %5055 = vmatpush1.bf16.msra.mxu1 %v3623_v45  ;;  %4931 = vmatprep.mubr.bf16.mxu1 %v6353_v5  ;;  %v2204_v5 = vld [vmem:[%s11475_s3 + $0x4f8] sm:$0xff]  ;;  %v6364_v18 = vld [vmem:[%s11476_s4 + $0x128] ss:$44 sps:$4 sm:$0xff]  }
 0x306   :  { %v3625_v3 = vpack.c.bf16 %v3359_v11, %v3357_v33  ;;  %v3626_v34 = vpack.c.bf16 %v3360_v38, %v3358_v20  ;;  %v2202_v38 = vld [vmem:[%s11475_s3 + $0x4e8] sm:$0xff]  ;;  %v3379_v20 = vmul.f32 %v10724_v8, %v2203_v47 }
 0x307   :  { %v2734_v28 = vpop.permute.xlu1 %2733 }
 0x308   :  { %v3361_v58 = vmul.f32 %v2734_v28, %v2185_v32  ;;  %v3362_v2 = vmul.f32 %v2734_v28, %v2186_v36  ;;  %5056 = vmatprep.subr.bf16.mxu1 %v3626_v34  ;;  %5441 = vmatmul.mubr.bf16.gmra.mrb[4].mxu0 %v6352_v54  ;;  %v10768_v51 = vpop.permute.xlu0 %2798  ;;  %v3380_v32 = vmul.f32 %v10724_v8, %v2204_v5  ;;  %v2207_v36 = vld [vmem:[%s11475_s3 + $0x510] sm:$0xff]  ;;  %v2205_v8 = vld [vmem:[%s11475_s3 + $0x500] sm:$0xff]  ;;  %v2206_v28 = vld [vmem:[%s11475_s3 + $0x508] sm:$0xff] }
 0x309   :  { %5057 = vmatpush1.bf16.msra.mxu1 %v3625_v3  ;;  %5450 = vmatprep.mubr.bf16.mxu0 %v6356_v49  ;;  %v2208_v49 = vld [vmem:[%s11475_s3 + $0x518] sm:$0xff] }
 0x30a   :  { %v3627_v24 = vpack.c.bf16 %v3363_v35, %v3361_v58  ;;  %v3628_v44 = vpack.c.bf16 %v3364_v4, %v3362_v2  ;;  %v6367_v35 = vld [vmem:[%s11476_s4 + $0x168] ss:$44 sps:$4 sm:$0xff]   ;;  %v6371_v4 = vld [vmem:[%s11476_s4 + $0x1c4] ss:$44 sps:$4 sm:$0xff]   ;;  %v3383_v2 = vmul.f32 %v10746_v30, %v2207_v36 }
 0x30b   :  { %v2744_v50 = vpop.permute.xlu1 %2743 }
 0x30c   :  { %v3365_v46 = vmul.f32 %v2744_v50, %v2189_v14  ;;  %v3366_v19 = vmul.f32 %v2744_v50, %v2190_v62  ;;  %4932 = vmatmul.mubr.bf16.gmra.mrb[8].mxu1 %v6355_v22  ;;  %5058 = vmatprep.subr.bf16.mxu1 %v3628_v44  ;;  %v10802_v6 = vpop.permute.xlu0 %2808  ;;  %v3384_v14 = vmul.f32 %v10746_v30, %v2208_v49  ;;  %v2211_v62 = vld [vmem:[%s11475_s3 + $0x530] sm:$0xff]  ;;  %v2209_v30 = vld [vmem:[%s11475_s3 + $0x520] sm:$0xff]  ;;  %v2210_v50 = vld [vmem:[%s11475_s3 + $0x528] sm:$0xff] }
 0x30d   :  { %5059 = vmatpush1.bf16.msra.mxu1 %v3627_v24  ;;  %4941 = vmatprep.mubr.bf16.mxu1 %v6359_v60  ;;  %v2212_v60 = vld [vmem:[%s11475_s3 + $0x538] sm:$0xff] }
 0x30e   :  { %v3629_v56 = vpack.c.bf16 %v3367_v42, %v3365_v46  ;;  %v3630_v59 = vpack.c.bf16 %v3368_v17, %v3366_v19  ;;  %v6370_v42 = vld [vmem:[%s11476_s4 + $0x180] ss:$44 sps:$4 sm:$0xff]   ;;  %v6374_v17 = vld [vmem:[%s11476_s4 + $0x1dc] ss:$44 sps:$4 sm:$0xff]   ;;  %v3387_v46 = vmul.f32 %v10768_v51, %v2211_v62 }
 0x30f   :  { %v2754_v26 = vpop.permute.xlu1 %2753 }
 0x310   :  { %v3369_v43 = vmul.f32 %v2754_v26, %v2193_v53  ;;  %v3370_v31 = vmul.f32 %v2754_v26, %v2194_v10  ;;  %5060 = vmatprep.subr.bf16.mxu1 %v3630_v59  ;;  %5451 = vmatmul.mubr.bf16.gmra.mrb[8].mxu0 %v6358_v15  ;;  %v10832_v11 = vpop.permute.xlu0 %2818  ;;  %v3388_v15 = vmul.f32 %v10768_v51, %v2212_v60  ;;  %v2215_v53 = vld [vmem:[%s11475_s3 + $0x550] sm:$0xff]  ;;  %v2216_v10 = vld [vmem:[%s11475_s3 + $0x558] sm:$0xff]  ;;  %v2213_v51 = vld [vmem:[%s11475_s3 + $0x540] sm:$0xff] }
 0x311   :  { %5061 = vmatpush1.bf16.msra.mxu1 %v3629_v56  ;;  %5460 = vmatprep.mubr.bf16.mxu0 %v6362_v16  ;;  %v2214_v26 = vld [vmem:[%s11475_s3 + $0x548] sm:$0xff] }
 0x312   :  { %v3631_v0 = vpack.c.bf16 %v3371_v55, %v3369_v43  ;;  %v3632_v23 = vpack.c.bf16 %v3372_v41, %v3370_v31  ;;  %v6373_v55 = vld [vmem:[%s11476_s4 + $0x1c0] ss:$44 sps:$4 sm:$0xff]   ;;  %v6377_v41 = vld [vmem:[%s11476_s4 + $0x21c] ss:$44 sps:$4 sm:$0xff]   ;;  %v3391_v43 = vmul.f32 %v10802_v6, %v2215_v53 }
 0x313   :  { %v2764_v40 = vpop.permute.xlu1 %2763 }
 0x314   :  { %v3373_v45 = vmul.f32 %v2764_v40, %v2197_v1  ;;  %v3374_v9 = vmul.f32 %v2764_v40, %v2198_v57  ;;  %4942 = vmatmul.mubr.bf16.gmra.mrb[12].mxu1 %v6361_v63  ;;  %5062 = vmatprep.subr.bf16.mxu1 %v3632_v23  ;;  %v10866_v58 = vpop.permute.xlu0 %2828  ;;  %v3392_v63 = vmul.f32 %v10802_v6, %v2216_v10  ;;  %v2219_v1 = vld [vmem:[%s11475_s3 + $0x570] sm:$0xff]  ;;  %v2220_v57 = vld [vmem:[%s11475_s3 + $0x578] sm:$0xff]  ;;  %v2217_v6 = vld [vmem:[%s11475_s3 + $0x560] sm:$0xff] }
 0x315   :  { %5063 = vmatpush1.bf16.msra.mxu1 %v3631_v0  ;;  %4951 = vmatprep.mubr.bf16.mxu1 %v6365_v39  ;;  %v6376_v23 = vld [vmem:[%s11476_s4 + $0x1d8] ss:$44 sps:$4 sm:$0xff]   ;;  %v6380_v40 = vld [vmem:[%s11476_s4 + $0x234] ss:$44 sps:$4 sm:$0xff]  }
 0x316   :  { %v3633_v27 = vpack.c.bf16 %v3375_v52, %v3373_v45  ;;  %v3634_v33 = vpack.c.bf16 %v3376_v12, %v3374_v9  ;;  %v2218_v52 = vld [vmem:[%s11475_s3 + $0x568] sm:$0xff]  ;;  %v3395_v45 = vmul.f32 %v10832_v11, %v2219_v1 }
 0x317   :  { %v2774_v54 = vpop.permute.xlu1 %2773 }
 0x318   :  { %v3377_v3 = vmul.f32 %v2774_v54, %v2201_v25  ;;  %v3378_v34 = vmul.f32 %v2774_v54, %v2202_v38  ;;  %5064 = vmatprep.subr.bf16.mxu1 %v3634_v33  ;;  %5461 = vmatmul.mubr.bf16.gmra.mrb[12].mxu0 %v6364_v18  ;;  %v10896_v16 = vpop.permute.xlu0 %3188  ;;  %v3396_v18 = vmul.f32 %v10832_v11, %v2220_v57  ;;  %v2223_v25 = vld [vmem:[%s11475_s3 + $0x590] sm:$0xff]  ;;  %v2224_v38 = vld [vmem:[%s11475_s3 + $0x598] sm:$0xff]  ;;  %v2221_v11 = vld [vmem:[%s11475_s3 + $0x580] sm:$0xff] }
 0x319   :  { %5065 = vmatpush1.bf16.msra.mxu1 %v3633_v27  ;;  %5470 = vmatprep.mubr.bf16.mxu0 %v6368_v48  ;;  %v6379_v33 = vld [vmem:[%s11476_s4 + $0x218] ss:$44 sps:$4 sm:$0xff]   ;;  %v6383_v54 = vld [vmem:[%s11476_s4 + $0x274] ss:$44 sps:$4 sm:$0xff]   ;;  %v3399_v49 = vmul.f32 %v10866_v58, %v2223_v25 }
 0x31a   :  { %v3635_v29 = vpack.c.bf16 %v3379_v20, %v3377_v3  ;;  %v3636_v37 = vpack.c.bf16 %v3380_v32, %v3378_v34  ;;  %v2222_v20 = vld [vmem:[%s11475_s3 + $0x588] sm:$0xff]  ;;  %v3400_v34 = vmul.f32 %v10866_v58, %v2224_v38  ;;  %v2365_v58 = vld [vmem:[%s11475_s3 + $0xa00] sm:$0xff] }
 0x31b   :  { %v2784_v22 = vpop.permute.xlu1 %2783 }
 0x31c   :  { %v3381_v24 = vmul.f32 %v2784_v22, %v2205_v8  ;;  %v3382_v44 = vmul.f32 %v2784_v22, %v2206_v28  ;;  %4952 = vmatmul.mubr.bf16.gmra.mrb[16].mxu1 %v6367_v35  ;;  %5066 = vmatprep.subr.bf16.mxu1 %v3636_v37  ;;  %v2839_v12 = vpop.permute.xlu0 %2838  ;;  %v2367_v35 = vld [vmem:[%s11475_s3 + $0xa10] sm:$0xff]  ;;  %v2368_v8 = vld [vmem:[%s11475_s3 + $0xa18] sm:$0xff] }
 0x31d   :  { %5067 = vmatpush1.bf16.msra.mxu1 %v3635_v29  ;;  %4961 = vmatprep.mubr.bf16.mxu1 %v6371_v4  ;;  %v6382_v37 = vld [vmem:[%s11476_s4 + $0x230] ss:$44 sps:$4 sm:$0xff]   ;;  %v6386_v22 = vld [vmem:[%s11476_s4 + $0x28c] ss:$44 sps:$4 sm:$0xff]   ;;  %v3543_v60 = vmul.f32 %v10896_v16, %v2367_v35 }
 0x31e   :  { %v3637_v61 = vpack.c.bf16 %v3383_v2, %v3381_v24  ;;  %v3638_v21 = vpack.c.bf16 %v3384_v14, %v3382_v44  ;;  %v2366_v2 = vld [vmem:[%s11475_s3 + $0xa08] sm:$0xff]  ;;  %v3544_v44 = vmul.f32 %v10896_v16, %v2368_v8 }
 0x31f   :  { %v2794_v19 = vpop.permute.xlu1 %2793 }
 0x320   :  { %v3385_v56 = vmul.f32 %v2794_v19, %v2209_v30  ;;  %v3386_v59 = vmul.f32 %v2794_v19, %v2210_v50  ;;  %5068 = vmatprep.subr.bf16.mxu1 %v3638_v21  ;;  %5471 = vmatmul.mubr.bf16.gmra.mrb[16].mxu0 %v6370_v42  ;;  %v3199_v28 = vpop.permute.xlu0 %3198  ;;  %v2227_v42 = vld [vmem:[%s11475_s3 + $0x5b0] sm:$0xff]  ;;  %v2228_v30 = vld [vmem:[%s11475_s3 + $0x5b8] sm:$0xff]  ;;  %v2225_v21 = vld [vmem:[%s11475_s3 + $0x5a0] sm:$0xff] }
 0x321   :  { %5069 = vmatpush1.bf16.msra.mxu1 %v3637_v61  ;;  %5480 = vmatprep.mubr.bf16.mxu0 %v6374_v17  ;;  %v6385_v61 = vld [vmem:[%s11476_s4 + $0x270] ss:$44 sps:$4 sm:$0xff]   ;;  %v6389_v19 = vld [vmem:[%s11476_s4 + $0x2cc] ss:$44 sps:$4 sm:$0xff]   ;;  %v3403_v16 = vmul.f32 %v2839_v12, %v2227_v42 }
 0x322   :  { %v3639_v13 = vpack.c.bf16 %v3387_v46, %v3385_v56  ;;  %v3640_v7 = vpack.c.bf16 %v3388_v15, %v3386_v59  ;;  %v2226_v46 = vld [vmem:[%s11475_s3 + $0x5a8] sm:$0xff]  ;;  %v3404_v59 = vmul.f32 %v2839_v12, %v2228_v30 }
 0x323   :  { %v2804_v31 = vpop.permute.xlu1 %2803 }
 0x324   :  { %v3389_v39 = vmul.f32 %v2804_v31, %v2213_v51  ;;  %v3390_v0 = vmul.f32 %v2804_v31, %v2214_v26  ;;  %4962 = vmatmul.mubr.bf16.gmra.mrb[20].mxu1 %v6373_v55  ;;  %5070 = vmatprep.subr.bf16.mxu1 %v3640_v7  ;;  %v2849_v15 = vpop.permute.xlu0 %2848  ;;  %v2371_v55 = vld [vmem:[%s11475_s3 + $0xa30] sm:$0xff]  ;;  %v2372_v51 = vld [vmem:[%s11475_s3 + $0xa38] sm:$0xff]  ;;  %v2369_v7 = vld [vmem:[%s11475_s3 + $0xa20] sm:$0xff] }
 0x325   :  { %5071 = vmatpush1.bf16.msra.mxu1 %v3639_v13  ;;  %4971 = vmatprep.mubr.bf16.mxu1 %v6377_v41  ;;  %v6388_v13 = vld [vmem:[%s11476_s4 + $0x288] ss:$44 sps:$4 sm:$0xff]   ;;  %v6392_v31 = vld [vmem:[%s11476_s4 + $0x2e4] ss:$44 sps:$4 sm:$0xff]   ;;  %v3547_v57 = vmul.f32 %v3199_v28, %v2371_v55 }
 0x326   :  { %v3641_v47 = vpack.c.bf16 %v3391_v43, %v3389_v39  ;;  %v3642_v5 = vpack.c.bf16 %v3392_v63, %v3390_v0  ;;  %v2370_v43 = vld [vmem:[%s11475_s3 + $0xa28] sm:$0xff]  ;;  %v3548_v0 = vmul.f32 %v3199_v28, %v2372_v51 }
 0x327   :  { %v2814_v9 = vpop.permute.xlu1 %2813 }
 0x328   :  { %v3393_v48 = vmul.f32 %v2814_v9, %v2217_v6  ;;  %v3394_v27 = vmul.f32 %v2814_v9, %v2218_v52  ;;  %5072 = vmatprep.subr.bf16.mxu1 %v3642_v5  ;;  %5481 = vmatmul.mubr.bf16.gmra.mrb[20].mxu0 %v6376_v23  ;;  %v2231_v23 = vld [vmem:[%s11475_s3 + $0x5d0] sm:$0xff]  ;;  %v2232_v6 = vld [vmem:[%s11475_s3 + $0x5d8] sm:$0xff]  ;;  %v3209_v52 = vpop.permute.xlu0 %3208  ;;  %v2229_v5 = vld [vmem:[%s11475_s3 + $0x5c0] sm:$0xff] }
 0x329   :  { %5073 = vmatpush1.bf16.msra.mxu1 %v3641_v47  ;;  %5490 = vmatprep.mubr.bf16.mxu0 %v6380_v40  ;;  %v6391_v47 = vld [vmem:[%s11476_s4 + $0x2c8] ss:$44 sps:$4 sm:$0xff]   ;;  %v6395_v9 = vld [vmem:[%s11476_s4 + $0x324] ss:$44 sps:$4 sm:$0xff]   ;;  %v3407_v38 = vmul.f32 %v2849_v15, %v2231_v23  ;;  %v6413_v23 = vld [vmem:[%s11476_s4 + $0x42c] ss:$44 sps:$4 sm:$0xff]  }
 0x32a   :  { %v3643_v32 = vpack.c.bf16 %v3395_v45, %v3393_v48  ;;  %v3644_v36 = vpack.c.bf16 %v3396_v18, %v3394_v27  ;;  %v2230_v45 = vld [vmem:[%s11475_s3 + $0x5c8] sm:$0xff]  ;;  %v3408_v27 = vmul.f32 %v2849_v15, %v2232_v6 }
 0x32b   :  { %v2824_v3 = vpop.permute.xlu1 %2823  ;;  %v6412_v6 = vld [vmem:[%s11476_s4 + $0x3e8] ss:$44 sps:$4 sm:$0xff]  }
 0x32c   :  { %v3397_v4 = vmul.f32 %v2824_v3, %v2221_v11  ;;  %v3398_v29 = vmul.f32 %v2824_v3, %v2222_v20  ;;  %4972 = vmatmul.mubr.bf16.gmra.mrb[24].mxu1 %v6379_v33  ;;  %5074 = vmatprep.subr.bf16.mxu1 %v3644_v36  ;;  %v2375_v33 = vld [vmem:[%s11475_s3 + $0xa50] sm:$0xff]  ;;  %v2376_v11 = vld [vmem:[%s11475_s3 + $0xa58] sm:$0xff]  ;;  %v2373_v36 = vld [vmem:[%s11475_s3 + $0xa40] sm:$0xff] }
 0x32d   :  { %5075 = vmatpush1.bf16.msra.mxu1 %v3643_v32  ;;  %4981 = vmatprep.mubr.bf16.mxu1 %v6383_v54  ;;  %v6394_v32 = vld [vmem:[%s11476_s4 + $0x2e0] ss:$44 sps:$4 sm:$0xff]   ;;  %v6398_v3 = vld [vmem:[%s11476_s4 + $0x33c] ss:$44 sps:$4 sm:$0xff]   ;;  %v3551_v28 = vmul.f32 %v3209_v52, %v2375_v33 }
 0x32e   :  { %v3645_v14 = vpack.c.bf16 %v3399_v49, %v3397_v4  ;;  %v3646_v62 = vpack.c.bf16 %v3400_v34, %v3398_v29  ;;  %v2374_v49 = vld [vmem:[%s11475_s3 + $0xa48] sm:$0xff]  ;;  %v2859_v34 = vpop.permute.xlu0 %2858  ;;  %v3552_v29 = vmul.f32 %v3209_v52, %v2376_v11  ;;  %v6416_v52 = vld [vmem:[%s11476_s4 + $0x444] ss:$44 sps:$4 sm:$0xff]  }
 0x32f   :  { %v3184_v24 = vpop.permute.xlu1 %3183  ;;  %v6431_v33 = vld [vmem:[%s11476_s4 + $0x68] ss:$44 sps:$4 sm:$0xff]   ;;  %v6433_v11 = vld [vmem:[%s11476_s4 + $0xc4] ss:$44 sps:$4 sm:$0xff]  }
 0x330   :  { %v3541_v50 = vmul.f32 %v3184_v24, %v2365_v58  ;;  %v3542_v17 = vmul.f32 %v3184_v24, %v2366_v2  ;;  %5076 = vmatprep.subr.bf16.mxu1 %v3646_v62  ;;  %5491 = vmatmul.mubr.bf16.gmra.mrb[24].mxu0 %v6382_v37  ;;  %v2235_v37 = vld [vmem:[%s11475_s3 + $0x5f0] sm:$0xff]  ;;  %v2236_v58 = vld [vmem:[%s11475_s3 + $0x5f8] sm:$0xff]  ;;  %v2233_v62 = vld [vmem:[%s11475_s3 + $0x5e0] sm:$0xff] }
 0x331   :  { %5077 = vmatpush1.bf16.msra.mxu1 %v3645_v14  ;;  %5500 = vmatprep.mubr.bf16.mxu0 %v6386_v22  ;;  %v6397_v14 = vld [vmem:[%s11476_s4 + $0x320] ss:$44 sps:$4 sm:$0xff]   ;;  %v6401_v24 = vld [vmem:[%s11476_s4 + $0x37c] ss:$44 sps:$4 sm:$0xff]   ;;  %v3411_v30 = vmul.f32 %v2859_v34, %v2235_v37 }
 0x332   :  { %v3717_v53 = vpack.c.bf16 %v3543_v60, %v3541_v50  ;;  %v3718_v10 = vpack.c.bf16 %v3544_v44, %v3542_v17  ;;  %v2234_v60 = vld [vmem:[%s11475_s3 + $0x5e8] sm:$0xff]  ;;  %v3412_v17 = vmul.f32 %v2859_v34, %v2236_v58  ;;  %v6440_v34 = vld [vmem:[%s11476_s4 + $0x130] ss:$44 sps:$4 sm:$0xff]  }
 0x333   :  { %v2834_v56 = vpop.permute.xlu1 %2833  ;;  %v6448_v37 = vld [vmem:[%s11476_s4 + $0x1e0] ss:$44 sps:$4 sm:$0xff]  }
 0x334   :  { %v3401_v26 = vmul.f32 %v2834_v56, %v2225_v21  ;;  %v3402_v41 = vmul.f32 %v2834_v56, %v2226_v46  ;;  %4982 = vmatmul.mubr.bf16.gmra.mrb[28].mxu1 %v6385_v61  ;;  %5571 = vmatprep.subr.bf16.mxu0 %v3718_v10  ;;  %v2379_v61 = vld [vmem:[%s11475_s3 + $0xa70] sm:$0xff]  ;;  %v2380_v21 = vld [vmem:[%s11475_s3 + $0xa78] sm:$0xff]  ;;  %v3219_v46 = vpop.permute.xlu0 %3218  ;;  %v2377_v10 = vld [vmem:[%s11475_s3 + $0xa60] sm:$0xff] }
 0x335   :  { %5572 = vmatpush1.bf16.msra.mxu0 %v3717_v53  ;;  %4991 = vmatprep.mubr.bf16.mxu1 %v6389_v19  ;;  %v6400_v53 = vld [vmem:[%s11476_s4 + $0x338] ss:$44 sps:$4 sm:$0xff]   ;;  %v6404_v56 = vld [vmem:[%s11476_s4 + $0x394] ss:$44 sps:$4 sm:$0xff]   ;;  %v3555_v51 = vmul.f32 %v3219_v46, %v2379_v61 }
 0x336   :  { %v3647_v63 = vpack.c.bf16 %v3403_v16, %v3401_v26  ;;  %v3648_v1 = vpack.c.bf16 %v3404_v59, %v3402_v41  ;;  %v2378_v16 = vld [vmem:[%s11475_s3 + $0xa68] sm:$0xff]  ;;  %v3556_v41 = vmul.f32 %v3219_v46, %v2380_v21  ;;  %v6468_v46 = vld [vmem:[%s11476_s4 + $0x398] ss:$44 sps:$4 sm:$0xff]  }
 0x337   :  { %v3194_v39 = vpop.permute.xlu1 %3193  ;;  %v6451_v58 = vld [vmem:[%s11476_s4 + $0x220] ss:$44 sps:$4 sm:$0xff]   ;;  %v6469_v21 = vld [vmem:[%s11476_s4 + $0x3dc] ss:$44 sps:$4 sm:$0xff]  }
 0x338   :  { %v3545_v40 = vmul.f32 %v3194_v39, %v2369_v7  ;;  %v3546_v12 = vmul.f32 %v3194_v39, %v2370_v43  ;;  %5078 = vmatprep.subr.bf16.mxu1 %v3648_v1  ;;  %5501 = vmatmul.mubr.bf16.gmra.mrb[28].mxu0 %v6388_v13  ;;  %v6403_v43 = vld [vmem:[%s11476_s4 + $0x378] ss:$44 sps:$4 sm:$0xff]   ;;  %v6467_v61 = vld [vmem:[%s11476_s4 + $0x380] ss:$44 sps:$4 sm:$0xff]  }
 0x339   :  { %5079 = vmatpush1.bf16.msra.mxu1 %v3647_v63  ;;  %5510 = vmatprep.mubr.bf16.mxu0 %v6392_v31  ;;  %v6407_v31 = vld [vmem:[%s11476_s4 + $0x3d4] ss:$44 sps:$4 sm:$0xff]   ;;  %v6410_v39 = vld [vmem:[%s11476_s4 + $0x3ec] ss:$44 sps:$4 sm:$0xff]  }
 0x33a   :  { %v3719_v18 = vpack.c.bf16 %v3547_v57, %v3545_v40  ;;  %v3720_v25 = vpack.c.bf16 %v3548_v0, %v3546_v12  ;;  %v6406_v57 = vld [vmem:[%s11476_s4 + $0x390] ss:$44 sps:$4 sm:$0xff]   ;;  %v6415_v40 = vld [vmem:[%s11476_s4 + $0x428] ss:$44 sps:$4 sm:$0xff]  }
 0x33b   :  { %v2844_v48 = vpop.permute.xlu1 %2843  ;;  %v6409_v0 = vld [vmem:[%s11476_s4 + $0x3d0] ss:$44 sps:$4 sm:$0xff]  }
 0x33c   :  { %v3405_v20 = vmul.f32 %v2844_v48, %v2229_v5  ;;  %v3406_v54 = vmul.f32 %v2844_v48, %v2230_v45  ;;  %4992 = vmatmul.mubr.bf16.gmra.mrb[32].mxu1 %v6391_v47  ;;  %5573 = vmatprep.subr.bf16.mxu0 %v3720_v25  ;;  %v6419_v12 = vld [vmem:[%s11476_s4 + $0x484] ss:$44 sps:$4 sm:$0xff]   ;;  %v6418_v47 = vld [vmem:[%s11476_s4 + $0x440] ss:$44 sps:$4 sm:$0xff]   ;;  %v6422_v5 = vld [vmem:[%s11476_s4 + $0x49c] ss:$44 sps:$4 sm:$0xff]  }
 0x33d   :  { %5574 = vmatpush1.bf16.msra.mxu0 %v3719_v18  ;;  %5001 = vmatprep.mubr.bf16.mxu1 %v6395_v9  ;;  %v6421_v45 = vld [vmem:[%s11476_s4 + $0x480] ss:$44 sps:$4 sm:$0xff]   ;;  %v6424_v18 = vld [vmem:[%s11476_s4 + $0x498] ss:$44 sps:$4 sm:$0xff]   ;;  %v6425_v25 = vld [vmem:[%s11476_s4 + $0x10] ss:$44 sps:$4 sm:$0xff]  }
 0x33e   :  { %v3649_v35 = vpack.c.bf16 %v3407_v38, %v3405_v20  ;;  %v3650_v8 = vpack.c.bf16 %v3408_v27, %v3406_v54  ;;  %v6427_v9 = vld [vmem:[%s11476_s4 + $0x14] ss:$44 sps:$4 sm:$0xff]   ;;  %v11618_v38 = vmov 0   ;;  %v6429_v48 = vld [vmem:[%s11476_s4 + $0x6c] ss:$44 sps:$4 sm:$0xff]  }
 0x33f   :  { %v3204_v4 = vpop.permute.xlu1 %3203  ;;  %v6428_v27 = vld [vmem:[%s11476_s4 + $0x28] ss:$44 sps:$4 sm:$0xff]   ;;  %v6432_v20 = vld [vmem:[%s11476_s4 + $0x80] ss:$44 sps:$4 sm:$0xff]  }
 0x340   :  { %v3549_v2 = vmul.f32 %v3204_v4, %v2373_v36  ;;  %v3550_v22 = vmul.f32 %v3204_v4, %v2374_v49  ;;  %5080 = vmatprep.subr.bf16.mxu1 %v3650_v8  ;;  %5511 = vmatmul.mubr.bf16.gmra.mrb[32].mxu0 %v6394_v32  ;;  %v6435_v54 = vld [vmem:[%s11476_s4 + $0xc0] ss:$44 sps:$4 sm:$0xff]   ;;  %v6437_v32 = vld [vmem:[%s11476_s4 + $0x11c] ss:$44 sps:$4 sm:$0xff]   ;;  %v6436_v36 = vld [vmem:[%s11476_s4 + $0xd8] ss:$44 sps:$4 sm:$0xff]  }
 0x341   :  { %5081 = vmatpush1.bf16.msra.mxu1 %v3649_v35  ;;  %5520 = vmatprep.mubr.bf16.mxu0 %v6398_v3  ;;  %v6439_v49 = vld [vmem:[%s11476_s4 + $0x118] ss:$44 sps:$4 sm:$0xff]   ;;  %v6441_v3 = vld [vmem:[%s11476_s4 + $0x174] ss:$44 sps:$4 sm:$0xff]   ;;  %v6443_v35 = vld [vmem:[%s11476_s4 + $0x170] ss:$44 sps:$4 sm:$0xff]  }
 0x342   :  { %v3721_v44 = vpack.c.bf16 %v3551_v28, %v3549_v2  ;;  %v3722_v42 = vpack.c.bf16 %v3552_v29, %v3550_v22  ;;  %v6445_v8 = vld [vmem:[%s11476_s4 + $0x1cc] ss:$44 sps:$4 sm:$0xff]   ;;  %v6444_v28 = vld [vmem:[%s11476_s4 + $0x188] ss:$44 sps:$4 sm:$0xff]   ;;  %v6449_v29 = vld [vmem:[%s11476_s4 + $0x224] ss:$44 sps:$4 sm:$0xff]  }
 0x343   :  { %v2854_v50 = vpop.permute.xlu1 %2853  ;;  %v6447_v4 = vld [vmem:[%s11476_s4 + $0x1c8] ss:$44 sps:$4 sm:$0xff]   ;;  %v6452_v22 = vld [vmem:[%s11476_s4 + $0x238] ss:$44 sps:$4 sm:$0xff]  }
 0x344   :  { %v3409_v19 = vmul.f32 %v2854_v50, %v2233_v62  ;;  %v3410_v15 = vmul.f32 %v2854_v50, %v2234_v60  ;;  %5002 = vmatmul.mubr.bf16.gmra.mrb[36].mxu1 %v6397_v14  ;;  %5575 = vmatprep.subr.bf16.mxu0 %v3722_v42  ;;  %v6453_v2 = vld [vmem:[%s11476_s4 + $0x27c] ss:$44 sps:$4 sm:$0xff]   ;;  %v6455_v14 = vld [vmem:[%s11476_s4 + $0x278] ss:$44 sps:$4 sm:$0xff]   ;;  %v6457_v62 = vld [vmem:[%s11476_s4 + $0x2d4] ss:$44 sps:$4 sm:$0xff]  }
 0x345   :  { %5576 = vmatpush1.bf16.msra.mxu0 %v3721_v44  ;;  %5011 = vmatprep.mubr.bf16.mxu1 %v6401_v24  ;;  %v6456_v60 = vld [vmem:[%s11476_s4 + $0x290] ss:$44 sps:$4 sm:$0xff]   ;;  %v6461_v44 = vld [vmem:[%s11476_s4 + $0x32c] ss:$44 sps:$4 sm:$0xff]   ;;  %v6460_v42 = vld [vmem:[%s11476_s4 + $0x2e8] ss:$44 sps:$4 sm:$0xff]  }
 0x346   :  { %v3651_v59 = vpack.c.bf16 %v3411_v30, %v3409_v19  ;;  %v3652_v55 = vpack.c.bf16 %v3412_v17, %v3410_v15  ;;  %v6459_v24 = vld [vmem:[%s11476_s4 + $0x2d0] ss:$44 sps:$4 sm:$0xff]   ;;  %v6463_v30 = vld [vmem:[%s11476_s4 + $0x328] ss:$44 sps:$4 sm:$0xff]   ;;  %v6464_v17 = vld [vmem:[%s11476_s4 + $0x340] ss:$44 sps:$4 sm:$0xff]  }
 0x347   :  { %v3214_v26 = vpop.permute.xlu1 %3213  ;;  %v6465_v50 = vld [vmem:[%s11476_s4 + $0x384] ss:$44 sps:$4 sm:$0xff]   ;;  %v6473_v15 = vld [vmem:[%s11476_s4 + $0x434] ss:$44 sps:$4 sm:$0xff]  }
 0x348   :  { %v3553_v13 = vmul.f32 %v3214_v26, %v2377_v10  ;;  %v3554_v7 = vmul.f32 %v3214_v26, %v2378_v16  ;;  %5082 = vmatprep.subr.bf16.mxu1 %v3652_v55  ;;  %5521 = vmatmul.mubr.bf16.gmra.mrb[36].mxu0 %v6400_v53  ;;  %v6471_v19 = vld [vmem:[%s11476_s4 + $0x3d8] ss:$44 sps:$4 sm:$0xff]   ;;  %v6472_v53 = vld [vmem:[%s11476_s4 + $0x3f0] ss:$44 sps:$4 sm:$0xff]   ;;  %v6480_v55 = vld [vmem:[%s11476_s4 + $0x4a0] ss:$44 sps:$4 sm:$0xff]  }
 0x349   :  { %5083 = vmatpush1.bf16.msra.mxu1 %v3651_v59  ;;  %5530 = vmatprep.mubr.bf16.mxu0 %v6404_v56  ;;  %v6475_v10 = vld [vmem:[%s11476_s4 + $0x430] ss:$44 sps:$4 sm:$0xff]   ;;  %v6477_v16 = vld [vmem:[%s11476_s4 + $0x48c] ss:$44 sps:$4 sm:$0xff]   ;;  %v6476_v56 = vld [vmem:[%s11476_s4 + $0x448] ss:$44 sps:$4 sm:$0xff]  }
 0x34a   :  { %v3723_v63 = vpack.c.bf16 %v3555_v51, %v3553_v13  ;;  %v3724_v1 = vpack.c.bf16 %v3556_v41, %v3554_v7  ;;  %v6479_v59 = vld [vmem:[%s11476_s4 + $0x488] ss:$44 sps:$4 sm:$0xff]  }
 0x34c   :  { %5012 = vmatmul.mubr.bf16.gmra.mrb[40].mxu1 %v6403_v43  ;;  %5577 = vmatprep.subr.bf16.mxu0 %v3724_v1 }
 0x34d   :  { %5578 = vmatpush1.bf16.msra.mxu0 %v3723_v63  ;;  %5021 = vmatprep.mubr.bf16.mxu1 %v6407_v31 }
 0x350   :  { %5531 = vmatmul.mubr.bf16.gmra.mrb[40].mxu0 %v6406_v57 }
 0x351   :  { %5540 = vmatprep.mubr.bf16.mxu0 %v6410_v39 }
 0x354   :  { %5022 = vmatmul.mubr.bf16.gmra.mrb[44].mxu1 %v6409_v0 }
 0x355   :  { %5031 = vmatprep.mubr.bf16.mxu1 %v6413_v23 }
 0x358   :  { %5541 = vmatmul.mubr.bf16.gmra.mrb[44].mxu0 %v6412_v6 }
 0x359   :  { %5550 = vmatprep.mubr.bf16.mxu0 %v6416_v52 }
 0x35c   :  { %5032 = vmatmul.mubr.bf16.gmra.mrb[48].mxu1 %v6415_v40 }
 0x35d   :  { %5041 = vmatprep.mubr.bf16.mxu1 %v6419_v12 }
 0x360   :  { %5551 = vmatmul.mubr.bf16.gmra.mrb[48].mxu0 %v6418_v47 }
 0x361   :  { %5560 = vmatprep.mubr.bf16.mxu0 %v6422_v5 }
 0x364   :  { %5042 = vmatmul.mubr.bf16.gmra.mrb[52].mxu1 %v6421_v45 }
 0x365   :  { %5084 = vmatprep.mubr.bf16.mxu1 %v6427_v9 }
 0x368   :  { %5561 = vmatmul.mubr.bf16.gmra.mrb[52].mxu0 %v6424_v18 }
 0x369   :  { %5603 = vmatprep.mubr.bf16.mxu0 %v11618_v38 }
 0x36c   :  { %5085 = vmatmul.mubr.bf16.vlgmr.msra.gmra.mrb[0].mxu1 %v6425_v25 }
 0x36d   :  { %5094 = vmatprep.mubr.bf16.mxu1 %v6429_v48 }
 0x370   :  { %5960 = vmatmul.mubr.msk.bf16.vlgmr.msra.gmra.mrb[0].mxu0 %vm4663_vm1, %v6428_v27 }
 0x371   :  { %5613 = vmatprep.mubr.bf16.mxu0 %v11618_v38 }
 0x374   :  { %5095 = vmatmul.mubr.bf16.gmra.mrb[4].mxu1 %v6431_v33 }
 0x375   :  { %5104 = vmatprep.mubr.bf16.mxu1 %v6433_v11 }
 0x378   :  { %5961 = vmatmul.mubr.msk.bf16.gmra.mrb[4].mxu0 %vm4663_vm1, %v6432_v20 }
 0x379   :  { %5623 = vmatprep.mubr.bf16.mxu0 %v11618_v38 }
 0x37c   :  { %5105 = vmatmul.mubr.bf16.gmra.mrb[8].mxu1 %v6435_v54 }
 0x37d   :  { %5114 = vmatprep.mubr.bf16.mxu1 %v6437_v32 }
 0x380   :  { %5962 = vmatmul.mubr.msk.bf16.gmra.mrb[8].mxu0 %vm4663_vm1, %v6436_v36 }
 0x381   :  { %5633 = vmatprep.mubr.bf16.mxu0 %v11618_v38 }
 0x384   :  { %5115 = vmatmul.mubr.bf16.gmra.mrb[12].mxu1 %v6439_v49 }
 0x385   :  { %5124 = vmatprep.mubr.bf16.mxu1 %v6441_v3 }
 0x388   :  { %5963 = vmatmul.mubr.msk.bf16.gmra.mrb[12].mxu0 %vm4663_vm1, %v6440_v34 }
 0x389   :  { %5643 = vmatprep.mubr.bf16.mxu0 %v11618_v38 }
 0x38c   :  { %5125 = vmatmul.mubr.bf16.gmra.mrb[16].mxu1 %v6443_v35 }
 0x38d   :  { %5134 = vmatprep.mubr.bf16.mxu1 %v6445_v8 }
 0x390   :  { %5964 = vmatmul.mubr.msk.bf16.gmra.mrb[16].mxu0 %vm4663_vm1, %v6444_v28 }
 0x391   :  { %5653 = vmatprep.mubr.bf16.mxu0 %v11618_v38 }
 0x394   :  { %5135 = vmatmul.mubr.bf16.gmra.mrb[20].mxu1 %v6447_v4 }
 0x395   :  { %5144 = vmatprep.mubr.bf16.mxu1 %v6449_v29 }
 0x398   :  { %5965 = vmatmul.mubr.msk.bf16.gmra.mrb[20].mxu0 %vm4663_vm1, %v6448_v37 }
 0x399   :  { %5663 = vmatprep.mubr.bf16.mxu0 %v11618_v38 }
 0x39c   :  { %5145 = vmatmul.mubr.bf16.gmra.mrb[24].mxu1 %v6451_v58 }
 0x39d   :  { %5154 = vmatprep.mubr.bf16.mxu1 %v6453_v2 }
 0x3a0   :  { %5966 = vmatmul.mubr.msk.bf16.gmra.mrb[24].mxu0 %vm4663_vm1, %v6452_v22 }
 0x3a1   :  { %5673 = vmatprep.mubr.bf16.mxu0 %v11618_v38 }
 0x3a4   :  { %5155 = vmatmul.mubr.bf16.gmra.mrb[28].mxu1 %v6455_v14 }
 0x3a5   :  { %5164 = vmatprep.mubr.bf16.mxu1 %v6457_v62 }
 0x3a8   :  { %5967 = vmatmul.mubr.msk.bf16.gmra.mrb[28].mxu0 %vm4663_vm1, %v6456_v60 }
 0x3a9   :  { %5683 = vmatprep.mubr.bf16.mxu0 %v11618_v38 }
 0x3ac   :  { %5165 = vmatmul.mubr.bf16.gmra.mrb[32].mxu1 %v6459_v24 }
 0x3ad   :  { %5174 = vmatprep.mubr.bf16.mxu1 %v6461_v44 }
 0x3b0   :  { %5968 = vmatmul.mubr.msk.bf16.gmra.mrb[32].mxu0 %vm4663_vm1, %v6460_v42 }
 0x3b1   :  { %5693 = vmatprep.mubr.bf16.mxu0 %v11618_v38 }
 0x3b4   :  { %5175 = vmatmul.mubr.bf16.gmra.mrb[36].mxu1 %v6463_v30 }
 0x3b5   :  { %5184 = vmatprep.mubr.bf16.mxu1 %v6465_v50 }
 0x3b8   :  { %5969 = vmatmul.mubr.msk.bf16.gmra.mrb[36].mxu0 %vm4663_vm1, %v6464_v17 }
 0x3b9   :  { %5703 = vmatprep.mubr.bf16.mxu0 %v11618_v38 }
 0x3bc   :  { %5185 = vmatmul.mubr.bf16.gmra.mrb[40].mxu1 %v6467_v61 }
 0x3bd   :  { %5194 = vmatprep.mubr.bf16.mxu1 %v6469_v21 }
 0x3c0   :  { %5970 = vmatmul.mubr.msk.bf16.gmra.mrb[40].mxu0 %vm4663_vm1, %v6468_v46 }
 0x3c1   :  { %5713 = vmatprep.mubr.bf16.mxu0 %v11618_v38 }
 0x3c4   :  { %5195 = vmatmul.mubr.bf16.gmra.mrb[44].mxu1 %v6471_v19 }
 0x3c5   :  { %5204 = vmatprep.mubr.bf16.mxu1 %v6473_v15 }
 0x3c8   :  { %5971 = vmatmul.mubr.msk.bf16.gmra.mrb[44].mxu0 %vm4663_vm1, %v6472_v53 }
 0x3c9   :  { %5723 = vmatprep.mubr.bf16.mxu0 %v11618_v38 }
 0x3cc   :  { %5205 = vmatmul.mubr.bf16.gmra.mrb[48].mxu1 %v6475_v10 }
 0x3cd   :  { %5214 = vmatprep.mubr.bf16.mxu1 %v6477_v16 }
 0x3d0   :  { %5972 = vmatmul.mubr.msk.bf16.gmra.mrb[48].mxu0 %vm4663_vm1, %v6476_v56 }
 0x3d1   :  { %5733 = vmatprep.mubr.bf16.mxu0 %v11618_v38 }
 0x3d4   :  { %5215 = vmatmul.mubr.bf16.gmra.mrb[52].mxu1 %v6479_v59 }
 0x3d8   :  { %5973 = vmatmul.mubr.msk.bf16.gmra.mrb[52].mxu0 %vm4663_vm1, %v6480_v55 }
 0x43f   :  { %v5086_v51 = vpop.f32.mrb[0].mxu1 }
 0x440   :  { %v5088_v26 = vpop.f32.mrb[1].mxu1 }
 0x441   :  { %v5090_v41 = vpop.f32.mrb[2].mxu1 }
 0x442   :  { %v5092_v13 = vpop.f32.mrb[3].mxu1 }
 0x443   :  { %v5605_v7 = vpop.f32.mrb[0].mxu0 }
 0x444   :  { %v5974_v43 = vadd.f32 %v5605_v7, %v5086_v51  ;;  %v5607_v31 = vpop.f32.mrb[1].mxu0 }
 0x445   :  { %v5975_v63 = vadd.f32 %v5607_v31, %v5088_v26  ;;  %v5609_v1 = vpop.f32.mrb[2].mxu0 }
 0x446   :  { %5744 = vst [vmem:[%s11477_s5] sm:$0xff] %v5974_v43  ;;  %v5976_v57 = vadd.f32 %v5609_v1, %v5090_v41  ;;  %v5611_v39 = vpop.f32.mrb[3].mxu0 }
 0x447   :  { %5746 = vst.msk [vmem:[%s11477_s5 + $0x8] sm:$0xff] %vm5745_vm2, %v5975_v63  ;;  %v5977_v0 = vadd.f32 %v5611_v39, %v5092_v13  ;;  %v5096_v23 = vpop.f32.mrb[4].mxu1 }
 0x448   :  { %5747 = vst [vmem:[%s11477_s5 + $0x10] sm:$0xff] %v5976_v57  ;;  %v5098_v6 = vpop.f32.mrb[5].mxu1 }
 0x449   :  { %5748 = vst.msk [vmem:[%s11477_s5 + $0x18] sm:$0xff] %vm5745_vm2, %v5977_v0  ;;  %v5100_v52 = vpop.f32.mrb[6].mxu1 }
 0x44a   :  { %v5102_v40 = vpop.f32.mrb[7].mxu1 }
 0x44b   :  { %v5615_v12 = vpop.f32.mrb[4].mxu0 }
 0x44c   :  { %v5978_v47 = vadd.f32 %v5615_v12, %v5096_v23  ;;  %v5617_v5 = vpop.f32.mrb[5].mxu0 }
 0x44d   :  { %v5979_v45 = vadd.f32 %v5617_v5, %v5098_v6  ;;  %v5619_v9 = vpop.f32.mrb[6].mxu0 }
 0x44e   :  { %5749 = vst [vmem:[%s11477_s5 + $0x20] sm:$0xff] %v5978_v47  ;;  %v5980_v18 = vadd.f32 %v5619_v9, %v5100_v52  ;;  %v5621_v25 = vpop.f32.mrb[7].mxu0 }
 0x44f   :  { %5750 = vst.msk [vmem:[%s11477_s5 + $0x28] sm:$0xff] %vm5745_vm2, %v5979_v45  ;;  %v5981_v38 = vadd.f32 %v5621_v25, %v5102_v40  ;;  %v5106_v48 = vpop.f32.mrb[8].mxu1 }
 0x450   :  { %5751 = vst [vmem:[%s11477_s5 + $0x30] sm:$0xff] %v5980_v18  ;;  %v5108_v27 = vpop.f32.mrb[9].mxu1 }
 0x451   :  { %5752 = vst.msk [vmem:[%s11477_s5 + $0x38] sm:$0xff] %vm5745_vm2, %v5981_v38  ;;  %v5110_v33 = vpop.f32.mrb[10].mxu1 }
 0x452   :  { %v5112_v11 = vpop.f32.mrb[11].mxu1 }
 0x453   :  { %v5625_v20 = vpop.f32.mrb[8].mxu0 }
 0x454   :  { %v5982_v54 = vadd.f32 %v5625_v20, %v5106_v48  ;;  %v5627_v32 = vpop.f32.mrb[9].mxu0 }
 0x455   :  { %v5983_v36 = vadd.f32 %v5627_v32, %v5108_v27  ;;  %v5629_v49 = vpop.f32.mrb[10].mxu0 }
 0x456   :  { %5753 = vst [vmem:[%s11477_s5 + $0x40] sm:$0xff] %v5982_v54  ;;  %v5984_v3 = vadd.f32 %v5629_v49, %v5110_v33  ;;  %v5631_v34 = vpop.f32.mrb[11].mxu0 }
 0x457   :  { %5754 = vst.msk [vmem:[%s11477_s5 + $0x48] sm:$0xff] %vm5745_vm2, %v5983_v36  ;;  %v5985_v35 = vadd.f32 %v5631_v34, %v5112_v11  ;;  %v5116_v8 = vpop.f32.mrb[12].mxu1 }
 0x458   :  { %5755 = vst [vmem:[%s11477_s5 + $0x50] sm:$0xff] %v5984_v3  ;;  %v5118_v28 = vpop.f32.mrb[13].mxu1 }
 0x459   :  { %5756 = vst.msk [vmem:[%s11477_s5 + $0x58] sm:$0xff] %vm5745_vm2, %v5985_v35  ;;  %v5120_v4 = vpop.f32.mrb[14].mxu1 }
 0x45a   :  { %v5122_v29 = vpop.f32.mrb[15].mxu1 }
 0x45b   :  { %v5635_v37 = vpop.f32.mrb[12].mxu0 }
 0x45c   :  { %v5986_v58 = vadd.f32 %v5635_v37, %v5116_v8  ;;  %v5637_v2 = vpop.f32.mrb[13].mxu0 }
 0x45d   :  { %v5987_v22 = vadd.f32 %v5637_v2, %v5118_v28  ;;  %v5639_v14 = vpop.f32.mrb[14].mxu0 }
 0x45e   :  { %5757 = vst [vmem:[%s11477_s5 + $0x60] sm:$0xff] %v5986_v58  ;;  %v5988_v62 = vadd.f32 %v5639_v14, %v5120_v4  ;;  %v5641_v60 = vpop.f32.mrb[15].mxu0 }
 0x45f   :  { %5758 = vst.msk [vmem:[%s11477_s5 + $0x68] sm:$0xff] %vm5745_vm2, %v5987_v22  ;;  %v5989_v24 = vadd.f32 %v5641_v60, %v5122_v29  ;;  %v5126_v44 = vpop.f32.mrb[16].mxu1 }
 0x460   :  { %5759 = vst [vmem:[%s11477_s5 + $0x70] sm:$0xff] %v5988_v62  ;;  %v5128_v42 = vpop.f32.mrb[17].mxu1 }
 0x461   :  { %5760 = vst.msk [vmem:[%s11477_s5 + $0x78] sm:$0xff] %vm5745_vm2, %v5989_v24  ;;  %v5130_v30 = vpop.f32.mrb[18].mxu1 }
 0x462   :  { %v5132_v50 = vpop.f32.mrb[19].mxu1 }
 0x463   :  { %v5645_v17 = vpop.f32.mrb[16].mxu0 }
 0x464   :  { %v5990_v61 = vadd.f32 %v5645_v17, %v5126_v44  ;;  %v5647_v21 = vpop.f32.mrb[17].mxu0 }
 0x465   :  { %v5991_v46 = vadd.f32 %v5647_v21, %v5128_v42  ;;  %v5649_v19 = vpop.f32.mrb[18].mxu0 }
 0x466   :  { %5761 = vst [vmem:[%s11477_s5 + $0x80] sm:$0xff] %v5990_v61  ;;  %v5992_v15 = vadd.f32 %v5649_v19, %v5130_v30  ;;  %v5651_v53 = vpop.f32.mrb[19].mxu0 }
 0x467   :  { %5762 = vst.msk [vmem:[%s11477_s5 + $0x88] sm:$0xff] %vm5745_vm2, %v5991_v46  ;;  %v5993_v10 = vadd.f32 %v5651_v53, %v5132_v50  ;;  %v5136_v16 = vpop.f32.mrb[20].mxu1 }
 0x468   :  { %5763 = vst [vmem:[%s11477_s5 + $0x90] sm:$0xff] %v5992_v15  ;;  %v5138_v56 = vpop.f32.mrb[21].mxu1 }
 0x469   :  { %5764 = vst.msk [vmem:[%s11477_s5 + $0x98] sm:$0xff] %vm5745_vm2, %v5993_v10  ;;  %v5140_v59 = vpop.f32.mrb[22].mxu1 }
 0x46a   :  { %v5142_v55 = vpop.f32.mrb[23].mxu1 }
 0x46b   :  { %v5655_v51 = vpop.f32.mrb[20].mxu0 }
 0x46c   :  { %v5994_v26 = vadd.f32 %v5655_v51, %v5136_v16  ;;  %v5657_v41 = vpop.f32.mrb[21].mxu0 }
 0x46d   :  { %v5995_v13 = vadd.f32 %v5657_v41, %v5138_v56  ;;  %v5659_v7 = vpop.f32.mrb[22].mxu0 }
 0x46e   :  { %5765 = vst [vmem:[%s11477_s5 + $0xa0] sm:$0xff] %v5994_v26  ;;  %v5996_v43 = vadd.f32 %v5659_v7, %v5140_v59  ;;  %v5661_v31 = vpop.f32.mrb[23].mxu0 }
 0x46f   :  { %5766 = vst.msk [vmem:[%s11477_s5 + $0xa8] sm:$0xff] %vm5745_vm2, %v5995_v13  ;;  %v5997_v63 = vadd.f32 %v5661_v31, %v5142_v55  ;;  %v5146_v1 = vpop.f32.mrb[24].mxu1 }
 0x470   :  { %5767 = vst [vmem:[%s11477_s5 + $0xb0] sm:$0xff] %v5996_v43  ;;  %v5148_v57 = vpop.f32.mrb[25].mxu1 }
 0x471   :  { %5768 = vst.msk [vmem:[%s11477_s5 + $0xb8] sm:$0xff] %vm5745_vm2, %v5997_v63  ;;  %v5150_v39 = vpop.f32.mrb[26].mxu1 }
 0x472   :  { %v5152_v0 = vpop.f32.mrb[27].mxu1 }
 0x473   :  { %v5665_v23 = vpop.f32.mrb[24].mxu0 }
 0x474   :  { %v5998_v6 = vadd.f32 %v5665_v23, %v5146_v1  ;;  %v5667_v52 = vpop.f32.mrb[25].mxu0 }
 0x475   :  { %v5999_v40 = vadd.f32 %v5667_v52, %v5148_v57  ;;  %v5669_v12 = vpop.f32.mrb[26].mxu0 }
 0x476   :  { %5769 = vst [vmem:[%s11477_s5 + $0xc0] sm:$0xff] %v5998_v6  ;;  %v6000_v47 = vadd.f32 %v5669_v12, %v5150_v39  ;;  %v5671_v5 = vpop.f32.mrb[27].mxu0 }
 0x477   :  { %5770 = vst.msk [vmem:[%s11477_s5 + $0xc8] sm:$0xff] %vm5745_vm2, %v5999_v40  ;;  %v6001_v45 = vadd.f32 %v5671_v5, %v5152_v0  ;;  %v5156_v9 = vpop.f32.mrb[28].mxu1 }
 0x478   :  { %5771 = vst [vmem:[%s11477_s5 + $0xd0] sm:$0xff] %v6000_v47  ;;  %v5158_v18 = vpop.f32.mrb[29].mxu1 }
 0x479   :  { %5772 = vst.msk [vmem:[%s11477_s5 + $0xd8] sm:$0xff] %vm5745_vm2, %v6001_v45  ;;  %v5160_v25 = vpop.f32.mrb[30].mxu1 }
 0x47a   :  { %v5162_v38 = vpop.f32.mrb[31].mxu1 }
 0x47b   :  { %v5675_v48 = vpop.f32.mrb[28].mxu0 }
 0x47c   :  { %v6002_v27 = vadd.f32 %v5675_v48, %v5156_v9  ;;  %v5677_v33 = vpop.f32.mrb[29].mxu0 }
 0x47d   :  { %v6003_v11 = vadd.f32 %v5677_v33, %v5158_v18  ;;  %v5679_v20 = vpop.f32.mrb[30].mxu0 }
 0x47e   :  { %5773 = vst [vmem:[%s11477_s5 + $0xe0] sm:$0xff] %v6002_v27  ;;  %v6004_v54 = vadd.f32 %v5679_v20, %v5160_v25  ;;  %v5681_v32 = vpop.f32.mrb[31].mxu0 }
 0x47f   :  { %5774 = vst.msk [vmem:[%s11477_s5 + $0xe8] sm:$0xff] %vm5745_vm2, %v6003_v11  ;;  %v6005_v36 = vadd.f32 %v5681_v32, %v5162_v38  ;;  %v5166_v49 = vpop.f32.mrb[32].mxu1 }
 0x480   :  { %5775 = vst [vmem:[%s11477_s5 + $0xf0] sm:$0xff] %v6004_v54  ;;  %v5168_v3 = vpop.f32.mrb[33].mxu1 }
 0x481   :  { %5776 = vst.msk [vmem:[%s11477_s5 + $0xf8] sm:$0xff] %vm5745_vm2, %v6005_v36  ;;  %v5170_v34 = vpop.f32.mrb[34].mxu1 }
 0x482   :  { %v5172_v35 = vpop.f32.mrb[35].mxu1 }
 0x483   :  { %v5685_v8 = vpop.f32.mrb[32].mxu0 }
 0x484   :  { %v6006_v28 = vadd.f32 %v5685_v8, %v5166_v49  ;;  %v5687_v4 = vpop.f32.mrb[33].mxu0 }
 0x485   :  { %v6007_v29 = vadd.f32 %v5687_v4, %v5168_v3  ;;  %v5689_v37 = vpop.f32.mrb[34].mxu0 }
 0x486   :  { %5777 = vst [vmem:[%s11477_s5 + $0x100] sm:$0xff] %v6006_v28  ;;  %v6008_v58 = vadd.f32 %v5689_v37, %v5170_v34  ;;  %v5691_v2 = vpop.f32.mrb[35].mxu0 }
 0x487   :  { %5778 = vst.msk [vmem:[%s11477_s5 + $0x108] sm:$0xff] %vm5745_vm2, %v6007_v29  ;;  %v6009_v22 = vadd.f32 %v5691_v2, %v5172_v35  ;;  %v5176_v14 = vpop.f32.mrb[36].mxu1 }
 0x488   :  { %5779 = vst [vmem:[%s11477_s5 + $0x110] sm:$0xff] %v6008_v58  ;;  %v5178_v62 = vpop.f32.mrb[37].mxu1 }
 0x489   :  { %5780 = vst.msk [vmem:[%s11477_s5 + $0x118] sm:$0xff] %vm5745_vm2, %v6009_v22  ;;  %v5180_v60 = vpop.f32.mrb[38].mxu1 }
 0x48a   :  { %v5182_v24 = vpop.f32.mrb[39].mxu1 }
 0x48b   :  { %v5695_v44 = vpop.f32.mrb[36].mxu0 }
 0x48c   :  { %v6010_v42 = vadd.f32 %v5695_v44, %v5176_v14  ;;  %v5697_v30 = vpop.f32.mrb[37].mxu0 }
 0x48d   :  { %v6011_v50 = vadd.f32 %v5697_v30, %v5178_v62  ;;  %v5699_v17 = vpop.f32.mrb[38].mxu0 }
 0x48e   :  { %5781 = vst [vmem:[%s11477_s5 + $0x120] sm:$0xff] %v6010_v42  ;;  %v6012_v61 = vadd.f32 %v5699_v17, %v5180_v60  ;;  %v5701_v21 = vpop.f32.mrb[39].mxu0 }
 0x48f   :  { %5782 = vst.msk [vmem:[%s11477_s5 + $0x128] sm:$0xff] %vm5745_vm2, %v6011_v50  ;;  %v6013_v46 = vadd.f32 %v5701_v21, %v5182_v24  ;;  %v5186_v19 = vpop.f32.mrb[40].mxu1 }
 0x490   :  { %5783 = vst [vmem:[%s11477_s5 + $0x130] sm:$0xff] %v6012_v61  ;;  %v5188_v15 = vpop.f32.mrb[41].mxu1 }
 0x491   :  { %5784 = vst.msk [vmem:[%s11477_s5 + $0x138] sm:$0xff] %vm5745_vm2, %v6013_v46  ;;  %v5190_v53 = vpop.f32.mrb[42].mxu1 }
 0x492   :  { %v5192_v10 = vpop.f32.mrb[43].mxu1 }
 0x493   :  { %v5705_v16 = vpop.f32.mrb[40].mxu0 }
 0x494   :  { %v6014_v56 = vadd.f32 %v5705_v16, %v5186_v19  ;;  %v5707_v59 = vpop.f32.mrb[41].mxu0 }
 0x495   :  { %v6015_v55 = vadd.f32 %v5707_v59, %v5188_v15  ;;  %v5709_v51 = vpop.f32.mrb[42].mxu0 }
 0x496   :  { %5785 = vst [vmem:[%s11477_s5 + $0x140] sm:$0xff] %v6014_v56  ;;  %v6016_v26 = vadd.f32 %v5709_v51, %v5190_v53  ;;  %v5711_v41 = vpop.f32.mrb[43].mxu0 }
 0x497   :  { %5786 = vst.msk [vmem:[%s11477_s5 + $0x148] sm:$0xff] %vm5745_vm2, %v6015_v55  ;;  %v6017_v13 = vadd.f32 %v5711_v41, %v5192_v10  ;;  %v5196_v7 = vpop.f32.mrb[44].mxu1 }
 0x498   :  { %5787 = vst [vmem:[%s11477_s5 + $0x150] sm:$0xff] %v6016_v26  ;;  %v5198_v43 = vpop.f32.mrb[45].mxu1 }
 0x499   :  { %5788 = vst.msk [vmem:[%s11477_s5 + $0x158] sm:$0xff] %vm5745_vm2, %v6017_v13  ;;  %v5200_v31 = vpop.f32.mrb[46].mxu1 }
 0x49a   :  { %v5202_v63 = vpop.f32.mrb[47].mxu1 }
 0x49b   :  { %v5715_v1 = vpop.f32.mrb[44].mxu0 }
 0x49c   :  { %v6018_v57 = vadd.f32 %v5715_v1, %v5196_v7  ;;  %v5717_v39 = vpop.f32.mrb[45].mxu0 }
 0x49d   :  { %v6019_v0 = vadd.f32 %v5717_v39, %v5198_v43  ;;  %v5719_v23 = vpop.f32.mrb[46].mxu0 }
 0x49e   :  { %5789 = vst [vmem:[%s11477_s5 + $0x160] sm:$0xff] %v6018_v57  ;;  %v6020_v6 = vadd.f32 %v5719_v23, %v5200_v31  ;;  %v5721_v52 = vpop.f32.mrb[47].mxu0 }
 0x49f   :  { %5790 = vst.msk [vmem:[%s11477_s5 + $0x168] sm:$0xff] %vm5745_vm2, %v6019_v0  ;;  %v6021_v40 = vadd.f32 %v5721_v52, %v5202_v63  ;;  %v5206_v12 = vpop.f32.mrb[48].mxu1 }
 0x4a0   :  { %5791 = vst [vmem:[%s11477_s5 + $0x170] sm:$0xff] %v6020_v6  ;;  %v5208_v47 = vpop.f32.mrb[49].mxu1 }
 0x4a1   :  { %5792 = vst.msk [vmem:[%s11477_s5 + $0x178] sm:$0xff] %vm5745_vm2, %v6021_v40  ;;  %v5210_v5 = vpop.f32.mrb[50].mxu1 }
 0x4a2   :  { %v5212_v45 = vpop.f32.mrb[51].mxu1 }
 0x4a3   :  { %v5725_v9 = vpop.f32.mrb[48].mxu0 }
 0x4a4   :  { %v6022_v18 = vadd.f32 %v5725_v9, %v5206_v12  ;;  %v5727_v25 = vpop.f32.mrb[49].mxu0 }
 0x4a5   :  { %v6023_v38 = vadd.f32 %v5727_v25, %v5208_v47  ;;  %v5729_v48 = vpop.f32.mrb[50].mxu0 }
 0x4a6   :  { %5793 = vst [vmem:[%s11477_s5 + $0x180] sm:$0xff] %v6022_v18  ;;  %v6024_v27 = vadd.f32 %v5729_v48, %v5210_v5  ;;  %v5731_v33 = vpop.f32.mrb[51].mxu0 }
 0x4a7   :  { %5794 = vst.msk [vmem:[%s11477_s5 + $0x188] sm:$0xff] %vm5745_vm2, %v6023_v38  ;;  %v6025_v11 = vadd.f32 %v5731_v33, %v5212_v45  ;;  %v5216_v20 = vpop.f32.mrb[52].mxu1 }
 0x4a8   :  { %5795 = vst [vmem:[%s11477_s5 + $0x190] sm:$0xff] %v6024_v27  ;;  %v5218_v54 = vpop.f32.mrb[53].mxu1 }
 0x4a9   :  { %5796 = vst.msk [vmem:[%s11477_s5 + $0x198] sm:$0xff] %vm5745_vm2, %v6025_v11  ;;  %v5220_v32 = vpop.f32.mrb[54].mxu1 }
 0x4aa   :  { %v5222_v36 = vpop.f32.mrb[55].mxu1 }
 0x4ab   :  { %v5735_v49 = vpop.f32.mrb[52].mxu0 }
 0x4ac   :  { %v6026_v3 = vadd.f32 %v5735_v49, %v5216_v20  ;;  %v5737_v34 = vpop.f32.mrb[53].mxu0 }
 0x4ad   :  { %v6027_v35 = vadd.f32 %v5737_v34, %v5218_v54  ;;  %v5739_v8 = vpop.f32.mrb[54].mxu0 }
 0x4ae   :  { %5797 = vst [vmem:[%s11477_s5 + $0x1a0] sm:$0xff] %v6026_v3  ;;  %v6028_v28 = vadd.f32 %v5739_v8, %v5220_v32  ;;  %v5741_v4 = vpop.f32.mrb[55].mxu0 }
 0x4af   :  { %5798 = vst.msk [vmem:[%s11477_s5 + $0x1a8] sm:$0xff] %vm5745_vm2, %v6027_v35  ;;  %v6029_v29 = vadd.f32 %v5741_v4, %v5222_v36 }
 0x4b0   :  { %5799 = vst [vmem:[%s11477_s5 + $0x1b0] sm:$0xff] %v6028_v28 }
 0x4b1   :  { %5800 = vst.msk [vmem:[%s11477_s5 + $0x1b8] sm:$0xff] %vm5745_vm2, %v6029_v29 }

</bundles_post_ra>
